<compile_context>
chip_gen: v7x
topology: tpu7x:2x2x1
jax: 0.10.0
libtpu: 0.0.40
codegen_flags: <defaults>
</compile_context>

<pallas_src>
import jax
import jax.numpy as jnp
from jax import lax
from jax.experimental import pallas as pl
from jax.experimental.pallas import tpu as pltpu

INPLANES = 4            # concatenated input channels (x1 has 2, x2 has 2)
C_MID = INPLANES * 2    # dynamic-conv output channels = 8
K_KERNELS = INPLANES    # K = inplanes = 4 attention kernels
C_UP = 4                # upsample conv output channels (before PixelShuffle(2))
KS = 3                  # upsample conv kernel size
TEMPERATURE = 34.0      # Dynamic_conv2d default temperature
LANE_BLOCK = 128        # batch (lane) tile for the large-batch kernel
SMALL_B_MAX = 32        # below this use the per-sample (H,W)->(sublane,lane) kernel

N_WTAP = C_UP * INPLANES * KS * KS          # 144 folded data-tap weights / sample
N_BIAS = C_UP * 9                           # 36 folded bias terms / sample
N_WROW = C_UP * (INPLANES + 1) * KS * KS    # 180 rows (large-batch weight layout)


# ----------------------------------------------------------------------------
# Small-batch kernel: one sample per grid step, (H, W) -> (sublane, lane).
# ----------------------------------------------------------------------------
def mda_small_kernel(w_ref, xp_ref, o_ref):
    """w_ref : (B, 180) SMEM  scalar-prefetched per-sample weights:
                 rows   0..143  folded 3x3 taps, idx ((o*4+cin)*3+kh)*3+kw
                 rows 144..179  per-(o) bias terms
                 [interior-sum, top, bot, left, right, tl, tr, bl, br]
       xp_ref: (4, H+2, W+2)   zero-padded sample (batch dim squeezed)   VMEM
       o_ref : (4, H, W)       sigmoid(conv) output, pre-PixelShuffle    VMEM
    """
    b = pl.program_id(0)
    _, HP, WP = xp_ref.shape
    H, W = HP - 2, WP - 2

    # The 9 bias ("ones-carrier") taps are folded into the accumulator init:
    # interior pixels get the full 9-tap sum, the 1-px border gets small
    # corrections (built once from iota masks; sample-independent).
    row = lax.broadcasted_iota(jnp.int32, (H, W), 0)
    col = lax.broadcasted_iota(jnp.int32, (H, W), 1)
    top = (row == 0).astype(jnp.float32)
    bot = (row == H - 1).astype(jnp.float32)
    left = (col == 0).astype(jnp.float32)
    right = (col == W - 1).astype(jnp.float32)
    tl, tr = top * left, top * right
    bl, br = bot * left, bot * right

    accs = []
    for o in range(C_UP):
        k = N_WTAP + o * 9
        acc = (w_ref[b, k + 0]
               - w_ref[b, k + 1] * top - w_ref[b, k + 2] * bot
               - w_ref[b, k + 3] * left - w_ref[b, k + 4] * right
               + w_ref[b, k + 5] * tl + w_ref[b, k + 6] * tr
               + w_ref[b, k + 7] * bl + w_ref[b, k + 8] * br)
        accs.append(acc)

    # 144 data taps: SMEM-scalar x plane MACs; each shifted slice is loaded
    # once and reused by the 4 output channels; the 4 accumulators
    # (4 x 2 vregs at H=W=16) stay in registers -> single store per channel.
    for cin in range(INPLANES):
        for kh in range(KS):
            for kw in range(KS):
                xsh = xp_ref[cin, kh:kh + H, kw:kw + W]          # (H, W)
                for o in range(C_UP):
                    widx = ((o * INPLANES + cin) * KS + kh) * KS + kw
                    accs[o] = accs[o] + xsh * w_ref[b, widx]

    for o in range(C_UP):
        o_ref[o, :, :] = jax.nn.sigmoid(accs[o]).astype(o_ref.dtype)


# ----------------------------------------------------------------------------
# Large-batch kernel: batch-last lanes, H strip-blocked so accs stay in vregs.
# ----------------------------------------------------------------------------
def _make_lane_kernel(rs):
    cin_total = INPLANES + 1     # 4 data channels + ones-carrier (bias) channel

    def kernel(xp_ref, w_ref, o_ref):
        """xp_ref: (5, H+2, W+2, bt)  zero-padded input + carrier, batch-last
           w_ref : (180, bt)          per-sample folded weights, row = o*45+tap
           o_ref : (4, HB, W, bt)     sigmoid(conv) rows of this H-block
        """
        _, HP, WP, bt = xp_ref.shape
        W = WP - 2
        HB = o_ref.shape[1]
        h0 = pl.program_id(1) * HB          # global output-row offset of block
        n_strips = HB // rs

        def strip_body(st, carry):
            r0 = h0 + st * rs               # global padded-row base for kh = 0
            accs = [jnp.zeros((rs, W, bt), jnp.float32) for _ in range(C_UP)]
            # TODO(synk): the 9 carrier taps (36/180 MACs) could be folded into
            # the strip accumulator init as on the small-batch path; needs
            # global-row-conditional border fixups across the dynamic strip /
            # H-block indices, so they are kept as regular taps here.
            for cin in range(cin_total):
                for kh in range(KS):
                    for kw in range(KS):
                        # one shifted-slice load per tap, reused by 4 channels
                        # (sublane-offset starts stay on the load/XLU path)
                        xsh = xp_ref[cin, pl.ds(r0 + kh, rs), kw:kw + W, :]
                        tap = (cin * KS + kh) * KS + kw
                        for o in range(C_UP):
                            ri = o * cin_total * KS * KS + tap
                            accs[o] = accs[o] + xsh * w_ref[ri:ri + 1, :]
            for o in range(C_UP):
                o_ref[o, pl.ds(st * rs, rs), :, :] = (
                    jax.nn.sigmoid(accs[o]).astype(o_ref.dtype))
            return carry

        lax.fori_loop(0, n_strips, strip_body, 0, unroll=True)

    return kernel


# ----------------------------------------------------------------------------
# Parameter init / weight folding (plain JAX glue).
# ----------------------------------------------------------------------------
def init_params(key):
    k = jax.random.split(key, 7)
    hidden = int(INPLANES * 0.25) + 1  # attention2d hidden planes = 2
    return {
        "fc1_w": jax.random.normal(k[0], (hidden, INPLANES), jnp.float32) * 0.5,
        "fc2_w": jax.random.normal(k[1], (K_KERNELS, hidden), jnp.float32) * 0.5,
        "fc2_b": jax.random.normal(k[2], (K_KERNELS,), jnp.float32) * 0.1,
        # Dynamic_conv2d kernel bank: (K, out_planes, in_planes//groups, 1, 1)
        "wk": jax.random.normal(k[3], (K_KERNELS, C_MID, 1, 1, 1), jnp.float32) * 0.5,
        "bk": jax.random.normal(k[4], (K_KERNELS, C_MID), jnp.float32) * 0.1,
        # upsample Conv2d(8, 4, 3, padding=1), OIHW
        "conv_w": jax.random.normal(k[5], (C_UP, C_MID, KS, KS), jnp.float32) * 0.2,
        "conv_b": jax.random.normal(k[6], (C_UP,), jnp.float32) * 0.1,
    }


def _fold_weights(att, params, B):
    """Fold the attention-aggregated dynamic 1x1 affine into per-sample 3x3
    conv weights (4->4 channels) and per-sample 3x3 bias taps."""
    w_agg = att @ params["wk"].reshape(K_KERNELS, C_MID)          # (B, 8)
    b_agg = att @ params["bk"]                                    # (B, 8)
    cw = params["conv_w"]                                         # (4, 8, 3, 3)
    # mid channel c = 2*cin + t reads input channel cin
    w_eff = jnp.einsum("bct,octhw->bochw",
                       w_agg.reshape(B, INPLANES, 2),
                       cw.reshape(C_UP, INPLANES, 2, KS, KS))     # (B,4,4,3,3)
    bias_tap = jnp.einsum("bc,ochw->bohw", b_agg, cw)             # (B,4,3,3)
    # conv bias contributes exactly once per output pixel via the
    # never-excluded centre tap.
    bias_tap = bias_tap.at[:, :, 1, 1].add(params["conv_b"][None, :])
    return w_eff, bias_tap


def _bias_terms(bias_tap):
    """(B, 4, 3, 3) bias taps -> (B, 4, 9) border-decomposed terms:
    [interior sum, top row, bottom row, left col, right col, tl, tr, bl, br]."""
    s_all = bias_tap.sum(axis=(-2, -1))
    top = bias_tap[..., 0, :].sum(-1)
    bot = bias_tap[..., 2, :].sum(-1)
    left = bias_tap[..., :, 0].sum(-1)
    right = bias_tap[..., :, 2].sum(-1)
    return jnp.stack(
        [s_all, top, bot, left, right,
         bias_tap[..., 0, 0], bias_tap[..., 0, 2],
         bias_tap[..., 2, 0], bias_tap[..., 2, 2]], axis=-1)


def _pixel_shuffle_nchw(conv_out):
    """(B, 4, H, W) -> (B, 1, 2H, 2W); channel o = 2r + s."""
    B, _, H, W = conv_out.shape
    y = conv_out.reshape(B, 2, 2, H, W).transpose(0, 3, 1, 4, 2)
    return y.reshape(B, 1, 2 * H, 2 * W)


def _lane_out_to_final(out, B, H, W):
    """(4, H, W, bp) batch-last -> (B, 1, 2H, 2W); one fused transpose."""
    out = out[..., :B]
    y = out.reshape(2, 2, H, W, B).transpose(4, 2, 0, 3, 1)
    return y.reshape(B, 1, 2 * H, 2 * W)


# ----------------------------------------------------------------------------
# pallas_call wrappers.
# ----------------------------------------------------------------------------
def _mda_small_conv(xp, w_all, H, W):
    """xp: (B, 4, H+2, W+2), w_all: (B, 180) -> (B, 4, H, W)."""
    B = xp.shape[0]
    cost = pl.CostEstimate(
        flops=2 * (N_WTAP + 9 * C_UP) * H * W * B,
        transcendentals=C_UP * H * W * B,
        bytes_accessed=4 * (xp.size + w_all.size + B * C_UP * H * W))
    return pl.pallas_call(
        mda_small_kernel,
        out_shape=jax.ShapeDtypeStruct((B, C_UP, H, W), jnp.float32),
        grid_spec=pltpu.PrefetchScalarGridSpec(
            num_scalar_prefetch=1,
            grid=(B,),
            in_specs=[pl.BlockSpec((None, INPLANES, H + 2, W + 2),
                                   lambda b, w: (b, 0, 0, 0))],
            out_specs=pl.BlockSpec((None, C_UP, H, W),
                                   lambda b, w: (b, 0, 0, 0)),
        ),
        compiler_params=pltpu.CompilerParams(
            dimension_semantics=("parallel",)),
        cost_estimate=cost,
    )(w_all, xp)


def _mda_lane(xp, w_eff, bias_tap, H, W):
    """xp: (B, 4, H+2, W+2) -> final (B, 1, 2H, 2W) via the batch-last kernel."""
    B = xp.shape[0]
    # strip rows per inner iteration; H-blocks as a second parallel grid axis
    # (>= 2 grid steps so both v7x TensorCores get work at a single batch tile)
    rs = 4 if H % 4 == 0 else (2 if H % 2 == 0 else 1)
    n_hb = 2 if H % (2 * rs) == 0 else 1
    hb = H // n_hb

    # batch-last lanes: 128-lane tiles for big batches, otherwise one full tile
    if B >= 2 * LANE_BLOCK:
        bt = LANE_BLOCK
        bp = -(-B // bt) * bt
    else:
        bt = bp = B

    # Wrapper-side zero padding + ones-carrier channel: the kernel receives a
    # ready (5, H+2, W+2, bt) block, no scratch and no in-kernel interior copy.
    xp_t = jnp.transpose(xp, (1, 2, 3, 0))                        # (4,H+2,W+2,B)
    carrier = jnp.pad(jnp.ones((1, H, W, B), jnp.float32),
                      ((0, 0), (1, 1), (1, 1), (0, 0)))
    xp5 = jnp.concatenate([xp_t, carrier], axis=0)                # (5,H+2,W+2,B)

    wcomb = jnp.concatenate([w_eff, bias_tap[:, :, None, :, :]], axis=2)
    w_t = wcomb.reshape(B, N_WROW).T                              # (180, B)

    if bp != B:
        xp5 = jnp.pad(xp5, ((0, 0), (0, 0), (0, 0), (0, bp - B)))
        w_t = jnp.pad(w_t, ((0, 0), (0, bp - B)))

    cost = pl.CostEstimate(
        flops=2 * N_WROW * H * W * bp,
        transcendentals=C_UP * H * W * bp,
        bytes_accessed=4 * (xp5.size + w_t.size + C_UP * H * W * bp))

    out = pl.pallas_call(
        _make_lane_kernel(rs),
        out_shape=jax.ShapeDtypeStruct((C_UP, H, W, bp), jnp.float32),
        grid=(bp // bt, n_hb),
        in_specs=[
            pl.BlockSpec((INPLANES + 1, H + 2, W + 2, bt),
                         lambda b, h: (0, 0, 0, b)),
            pl.BlockSpec((N_WROW, bt), lambda b, h: (0, b)),
        ],
        out_specs=pl.BlockSpec((C_UP, hb, W, bt), lambda b, h: (0, h, 0, b)),
        compiler_params=pltpu.CompilerParams(
            dimension_semantics=("parallel", "parallel")),
        cost_estimate=cost,
    )(xp5, w_t)

    # padded lanes (sigmoid(0) = 0.5) are sliced off inside _lane_out_to_final
    return _lane_out_to_final(out, B, H, W)


@jax.jit
def mda_forward(x1, x2, params):
    x = jnp.concatenate([x1, x2], axis=1)                         # (B, 4, H, W)
    B, _, H, W = x.shape

    # Attention branch (per-sample 4 scalars; tiny -> plain JAX glue).
    pooled = jnp.mean(x, axis=(2, 3))                             # (B, 4)
    h = jnp.maximum(pooled @ params["fc1_w"].T, 0.0)              # (B, 2)
    logits = h @ params["fc2_w"].T + params["fc2_b"]              # (B, 4)
    att = jax.nn.softmax(logits / TEMPERATURE, axis=1)            # (B, K)

    w_eff, bias_tap = _fold_weights(att, params, B)
    xp = jnp.pad(x, ((0, 0), (0, 0), (1, 1), (1, 1)))             # (B,4,H+2,W+2)

    if B < SMALL_B_MAX:
        w_all = jnp.concatenate(
            [w_eff.reshape(B, N_WTAP),
             _bias_terms(bias_tap).reshape(B, N_BIAS)], axis=1)   # (B, 180)
        conv_out = _mda_small_conv(xp, w_all, H, W)               # (B, 4, H, W)
        return _pixel_shuffle_nchw(conv_out)

    return _mda_lane(xp, w_eff, bias_tap, H, W)


# ----------------------------------------------------------------------------
# Pure-JAX reference (same math, different code path) for validation.
# ----------------------------------------------------------------------------
def mda_reference(x1, x2, params):
    x = jnp.concatenate([x1, x2], axis=1)
    B, C, H, W = x.shape
    pooled = jnp.mean(x, axis=(2, 3))
    h = jnp.maximum(pooled @ params["fc1_w"].T, 0.0)
    logits = h @ params["fc2_w"].T + params["fc2_b"]
    att = jax.nn.softmax(logits / TEMPERATURE, axis=1)
    w_agg = att @ params["wk"].reshape(K_KERNELS, -1)      # (B, 8)
    b_agg = att @ params["bk"]                             # (B, 8)
    xg = jnp.repeat(x, 2, axis=1)                          # x[:, c//2]
    y1 = xg * w_agg[:, :, None, None] + b_agg[:, :, None, None]
    y2 = lax.conv_general_dilated(
        y1, params["conv_w"], (1, 1), "SAME",
        dimension_numbers=("NCHW", "OIHW", "NCHW"),
    ) + params["conv_b"][None, :, None, None]
    y3 = jax.nn.sigmoid(y2)
    y = y3.reshape(B, 1, 2, 2, H, W).transpose(0, 1, 4, 2, 5, 3)
    return y.reshape(B, 1, 2 * H, 2 * W)


if __name__ == "__main__":
    key = jax.random.PRNGKey(0)
    kp, k1, k2 = jax.random.split(key, 3)
    params = init_params(kp)

    # Primary test: small batch -> per-sample kernel.
    B, H, W = 2, 16, 16
    x1 = jax.random.normal(k1, (B, INPLANES // 2, H, W), jnp.float32)
    x2 = jax.random.normal(k2, (B, INPLANES // 2, H, W), jnp.float32)
    out = jax.block_until_ready(mda_forward(x1, x2, params))
    ref = jax.block_until_ready(mda_reference(x1, x2, params))
    assert out.shape == (B, 1, 2 * H, 2 * W), out.shape
    assert jnp.allclose(out, ref, atol=1e-4, rtol=1e-4), (
        float(jnp.max(jnp.abs(out - ref))))

    # Secondary test: larger batch -> batch-last strip-blocked kernel.
    B2 = 40
    k3, k4 = jax.random.split(jax.random.PRNGKey(1))
    x1b = jax.random.normal(k3, (B2, INPLANES // 2, H, W), jnp.float32)
    x2b = jax.random.normal(k4, (B2, INPLANES // 2, H, W), jnp.float32)
    out_b = jax.block_until_ready(mda_forward(x1b, x2b, params))
    ref_b = jax.block_until_ready(mda_reference(x1b, x2b, params))
    assert out_b.shape == (B2, 1, 2 * H, 2 * W), out_b.shape
    assert jnp.allclose(out_b, ref_b, atol=1e-4, rtol=1e-4), (
        float(jnp.max(jnp.abs(out_b - ref_b))))

    print("KERNEL_OK")
</pallas_src>

<mosaic_0001>
module attributes {stable_mosaic.version = 11 : i64} {
  func.func @mda_small_kernel(%arg0: i32, %arg1: memref<2x180xf32, #tpu.memory_space<smem>>, %arg2: memref<1x4x18x18xf32, #tpu.memory_space<vmem>>, %arg3: memref<1x4x16x16xf32, #tpu.memory_space<vmem>>) attributes {dimension_semantics = [#tpu.dimension_semantics<parallel>], iteration_bounds = array<i64: 2>, scalar_prefetch = 1 : i64, scratch_operands = 0 : i64, tpu.core_type = #tpu.core_type<tc>, window_params = [{transform_indices = @transform_0, window_bounds = array<i64: 1, 4, 18, 18>}, {transform_indices = @transform_1, window_bounds = array<i64: 1, 4, 16, 16>}]} {
    %0 = tpu.iota {dimensions = array<i32: 0>} : vector<16x16xi32>
    %1 = tpu.iota {dimensions = array<i32: 1>} : vector<16x16xi32>
    %c0_i32 = arith.constant 0 : i32
    %2 = vector.broadcast %c0_i32 : i32 to vector<16x16xi32>
    %3 = arith.cmpi eq, %0, %2 : vector<16x16xi32>
    %4 = arith.extui %3 : vector<16x16xi1> to vector<16x16xi32>
    %5 = arith.sitofp %4 : vector<16x16xi32> to vector<16x16xf32>
    %c15_i32 = arith.constant 15 : i32
    %6 = vector.broadcast %c15_i32 : i32 to vector<16x16xi32>
    %7 = arith.cmpi eq, %0, %6 : vector<16x16xi32>
    %8 = arith.extui %7 : vector<16x16xi1> to vector<16x16xi32>
    %9 = arith.sitofp %8 : vector<16x16xi32> to vector<16x16xf32>
    %c0_i32_0 = arith.constant 0 : i32
    %10 = vector.broadcast %c0_i32_0 : i32 to vector<16x16xi32>
    %11 = arith.cmpi eq, %1, %10 : vector<16x16xi32>
    %12 = arith.extui %11 : vector<16x16xi1> to vector<16x16xi32>
    %13 = arith.sitofp %12 : vector<16x16xi32> to vector<16x16xf32>
    %c15_i32_1 = arith.constant 15 : i32
    %14 = vector.broadcast %c15_i32_1 : i32 to vector<16x16xi32>
    %15 = arith.cmpi eq, %1, %14 : vector<16x16xi32>
    %16 = arith.extui %15 : vector<16x16xi1> to vector<16x16xi32>
    %17 = arith.sitofp %16 : vector<16x16xi32> to vector<16x16xf32>
    %18 = arith.mulf %5, %13 : vector<16x16xf32>
    %19 = arith.mulf %5, %17 : vector<16x16xf32>
    %20 = arith.mulf %9, %13 : vector<16x16xf32>
    %21 = arith.mulf %9, %17 : vector<16x16xf32>
    %22 = arith.index_cast %arg0 : i32 to index
    %c144 = arith.constant 144 : index
    %23 = memref.load %arg1[%22, %c144] : memref<2x180xf32, #tpu.memory_space<smem>>
    %24 = arith.index_cast %arg0 : i32 to index
    %c145 = arith.constant 145 : index
    %25 = memref.load %arg1[%24, %c145] : memref<2x180xf32, #tpu.memory_space<smem>>
    %26 = vector.broadcast %25 : f32 to vector<16x16xf32>
    %27 = arith.mulf %26, %5 : vector<16x16xf32>
    %28 = vector.broadcast %23 : f32 to vector<16x16xf32>
    %29 = arith.subf %28, %27 : vector<16x16xf32>
    %30 = arith.index_cast %arg0 : i32 to index
    %c146 = arith.constant 146 : index
    %31 = memref.load %arg1[%30, %c146] : memref<2x180xf32, #tpu.memory_space<smem>>
    %32 = vector.broadcast %31 : f32 to vector<16x16xf32>
    %33 = arith.mulf %32, %9 : vector<16x16xf32>
    %34 = arith.subf %29, %33 : vector<16x16xf32>
    %35 = arith.index_cast %arg0 : i32 to index
    %c147 = arith.constant 147 : index
    %36 = memref.load %arg1[%35, %c147] : memref<2x180xf32, #tpu.memory_space<smem>>
    %37 = vector.broadcast %36 : f32 to vector<16x16xf32>
    %38 = arith.mulf %37, %13 : vector<16x16xf32>
    %39 = arith.subf %34, %38 : vector<16x16xf32>
    %40 = arith.index_cast %arg0 : i32 to index
    %c148 = arith.constant 148 : index
    %41 = memref.load %arg1[%40, %c148] : memref<2x180xf32, #tpu.memory_space<smem>>
    %42 = vector.broadcast %41 : f32 to vector<16x16xf32>
    %43 = arith.mulf %42, %17 : vector<16x16xf32>
    %44 = arith.subf %39, %43 : vector<16x16xf32>
    %45 = arith.index_cast %arg0 : i32 to index
    %c149 = arith.constant 149 : index
    %46 = memref.load %arg1[%45, %c149] : memref<2x180xf32, #tpu.memory_space<smem>>
    %47 = vector.broadcast %46 : f32 to vector<16x16xf32>
    %48 = arith.mulf %47, %18 : vector<16x16xf32>
    %49 = arith.addf %44, %48 : vector<16x16xf32>
    %50 = arith.index_cast %arg0 : i32 to index
    %c150 = arith.constant 150 : index
    %51 = memref.load %arg1[%50, %c150] : memref<2x180xf32, #tpu.memory_space<smem>>
    %52 = vector.broadcast %51 : f32 to vector<16x16xf32>
    %53 = arith.mulf %52, %19 : vector<16x16xf32>
    %54 = arith.addf %49, %53 : vector<16x16xf32>
    %55 = arith.index_cast %arg0 : i32 to index
    %c151 = arith.constant 151 : index
    %56 = memref.load %arg1[%55, %c151] : memref<2x180xf32, #tpu.memory_space<smem>>
    %57 = vector.broadcast %56 : f32 to vector<16x16xf32>
    %58 = arith.mulf %57, %20 : vector<16x16xf32>
    %59 = arith.addf %54, %58 : vector<16x16xf32>
    %60 = arith.index_cast %arg0 : i32 to index
    %c152 = arith.constant 152 : index
    %61 = memref.load %arg1[%60, %c152] : memref<2x180xf32, #tpu.memory_space<smem>>
    %62 = vector.broadcast %61 : f32 to vector<16x16xf32>
    %63 = arith.mulf %62, %21 : vector<16x16xf32>
    %64 = arith.addf %59, %63 : vector<16x16xf32>
    %65 = arith.index_cast %arg0 : i32 to index
    %c153 = arith.constant 153 : index
    %66 = memref.load %arg1[%65, %c153] : memref<2x180xf32, #tpu.memory_space<smem>>
    %67 = arith.index_cast %arg0 : i32 to index
    %c154 = arith.constant 154 : index
    %68 = memref.load %arg1[%67, %c154] : memref<2x180xf32, #tpu.memory_space<smem>>
    %69 = vector.broadcast %68 : f32 to vector<16x16xf32>
    %70 = arith.mulf %69, %5 : vector<16x16xf32>
    %71 = vector.broadcast %66 : f32 to vector<16x16xf32>
    %72 = arith.subf %71, %70 : vector<16x16xf32>
    %73 = arith.index_cast %arg0 : i32 to index
    %c155 = arith.constant 155 : index
    %74 = memref.load %arg1[%73, %c155] : memref<2x180xf32, #tpu.memory_space<smem>>
    %75 = vector.broadcast %74 : f32 to vector<16x16xf32>
    %76 = arith.mulf %75, %9 : vector<16x16xf32>
    %77 = arith.subf %72, %76 : vector<16x16xf32>
    %78 = arith.index_cast %arg0 : i32 to index
    %c156 = arith.constant 156 : index
    %79 = memref.load %arg1[%78, %c156] : memref<2x180xf32, #tpu.memory_space<smem>>
    %80 = vector.broadcast %79 : f32 to vector<16x16xf32>
    %81 = arith.mulf %80, %13 : vector<16x16xf32>
    %82 = arith.subf %77, %81 : vector<16x16xf32>
    %83 = arith.index_cast %arg0 : i32 to index
    %c157 = arith.constant 157 : index
    %84 = memref.load %arg1[%83, %c157] : memref<2x180xf32, #tpu.memory_space<smem>>
    %85 = vector.broadcast %84 : f32 to vector<16x16xf32>
    %86 = arith.mulf %85, %17 : vector<16x16xf32>
    %87 = arith.subf %82, %86 : vector<16x16xf32>
    %88 = arith.index_cast %arg0 : i32 to index
    %c158 = arith.constant 158 : index
    %89 = memref.load %arg1[%88, %c158] : memref<2x180xf32, #tpu.memory_space<smem>>
    %90 = vector.broadcast %89 : f32 to vector<16x16xf32>
    %91 = arith.mulf %90, %18 : vector<16x16xf32>
    %92 = arith.addf %87, %91 : vector<16x16xf32>
    %93 = arith.index_cast %arg0 : i32 to index
    %c159 = arith.constant 159 : index
    %94 = memref.load %arg1[%93, %c159] : memref<2x180xf32, #tpu.memory_space<smem>>
    %95 = vector.broadcast %94 : f32 to vector<16x16xf32>
    %96 = arith.mulf %95, %19 : vector<16x16xf32>
    %97 = arith.addf %92, %96 : vector<16x16xf32>
    %98 = arith.index_cast %arg0 : i32 to index
    %c160 = arith.constant 160 : index
    %99 = memref.load %arg1[%98, %c160] : memref<2x180xf32, #tpu.memory_space<smem>>
    %100 = vector.broadcast %99 : f32 to vector<16x16xf32>
    %101 = arith.mulf %100, %20 : vector<16x16xf32>
    %102 = arith.addf %97, %101 : vector<16x16xf32>
    %103 = arith.index_cast %arg0 : i32 to index
    %c161 = arith.constant 161 : index
    %104 = memref.load %arg1[%103, %c161] : memref<2x180xf32, #tpu.memory_space<smem>>
    %105 = vector.broadcast %104 : f32 to vector<16x16xf32>
    %106 = arith.mulf %105, %21 : vector<16x16xf32>
    %107 = arith.addf %102, %106 : vector<16x16xf32>
    %108 = arith.index_cast %arg0 : i32 to index
    %c162 = arith.constant 162 : index
    %109 = memref.load %arg1[%108, %c162] : memref<2x180xf32, #tpu.memory_space<smem>>
    %110 = arith.index_cast %arg0 : i32 to index
    %c163 = arith.constant 163 : index
    %111 = memref.load %arg1[%110, %c163] : memref<2x180xf32, #tpu.memory_space<smem>>
    %112 = vector.broadcast %111 : f32 to vector<16x16xf32>
    %113 = arith.mulf %112, %5 : vector<16x16xf32>
    %114 = vector.broadcast %109 : f32 to vector<16x16xf32>
    %115 = arith.subf %114, %113 : vector<16x16xf32>
    %116 = arith.index_cast %arg0 : i32 to index
    %c164 = arith.constant 164 : index
    %117 = memref.load %arg1[%116, %c164] : memref<2x180xf32, #tpu.memory_space<smem>>
    %118 = vector.broadcast %117 : f32 to vector<16x16xf32>
    %119 = arith.mulf %118, %9 : vector<16x16xf32>
    %120 = arith.subf %115, %119 : vector<16x16xf32>
    %121 = arith.index_cast %arg0 : i32 to index
    %c165 = arith.constant 165 : index
    %122 = memref.load %arg1[%121, %c165] : memref<2x180xf32, #tpu.memory_space<smem>>
    %123 = vector.broadcast %122 : f32 to vector<16x16xf32>
    %124 = arith.mulf %123, %13 : vector<16x16xf32>
    %125 = arith.subf %120, %124 : vector<16x16xf32>
    %126 = arith.index_cast %arg0 : i32 to index
    %c166 = arith.constant 166 : index
    %127 = memref.load %arg1[%126, %c166] : memref<2x180xf32, #tpu.memory_space<smem>>
    %128 = vector.broadcast %127 : f32 to vector<16x16xf32>
    %129 = arith.mulf %128, %17 : vector<16x16xf32>
    %130 = arith.subf %125, %129 : vector<16x16xf32>
    %131 = arith.index_cast %arg0 : i32 to index
    %c167 = arith.constant 167 : index
    %132 = memref.load %arg1[%131, %c167] : memref<2x180xf32, #tpu.memory_space<smem>>
    %133 = vector.broadcast %132 : f32 to vector<16x16xf32>
    %134 = arith.mulf %133, %18 : vector<16x16xf32>
    %135 = arith.addf %130, %134 : vector<16x16xf32>
    %136 = arith.index_cast %arg0 : i32 to index
    %c168 = arith.constant 168 : index
    %137 = memref.load %arg1[%136, %c168] : memref<2x180xf32, #tpu.memory_space<smem>>
    %138 = vector.broadcast %137 : f32 to vector<16x16xf32>
    %139 = arith.mulf %138, %19 : vector<16x16xf32>
    %140 = arith.addf %135, %139 : vector<16x16xf32>
    %141 = arith.index_cast %arg0 : i32 to index
    %c169 = arith.constant 169 : index
    %142 = memref.load %arg1[%141, %c169] : memref<2x180xf32, #tpu.memory_space<smem>>
    %143 = vector.broadcast %142 : f32 to vector<16x16xf32>
    %144 = arith.mulf %143, %20 : vector<16x16xf32>
    %145 = arith.addf %140, %144 : vector<16x16xf32>
    %146 = arith.index_cast %arg0 : i32 to index
    %c170 = arith.constant 170 : index
    %147 = memref.load %arg1[%146, %c170] : memref<2x180xf32, #tpu.memory_space<smem>>
    %148 = vector.broadcast %147 : f32 to vector<16x16xf32>
    %149 = arith.mulf %148, %21 : vector<16x16xf32>
    %150 = arith.addf %145, %149 : vector<16x16xf32>
    %151 = arith.index_cast %arg0 : i32 to index
    %c171 = arith.constant 171 : index
    %152 = memref.load %arg1[%151, %c171] : memref<2x180xf32, #tpu.memory_space<smem>>
    %153 = arith.index_cast %arg0 : i32 to index
    %c172 = arith.constant 172 : index
    %154 = memref.load %arg1[%153, %c172] : memref<2x180xf32, #tpu.memory_space<smem>>
    %155 = vector.broadcast %154 : f32 to vector<16x16xf32>
    %156 = arith.mulf %155, %5 : vector<16x16xf32>
    %157 = vector.broadcast %152 : f32 to vector<16x16xf32>
    %158 = arith.subf %157, %156 : vector<16x16xf32>
    %159 = arith.index_cast %arg0 : i32 to index
    %c173 = arith.constant 173 : index
    %160 = memref.load %arg1[%159, %c173] : memref<2x180xf32, #tpu.memory_space<smem>>
    %161 = vector.broadcast %160 : f32 to vector<16x16xf32>
    %162 = arith.mulf %161, %9 : vector<16x16xf32>
    %163 = arith.subf %158, %162 : vector<16x16xf32>
    %164 = arith.index_cast %arg0 : i32 to index
    %c174 = arith.constant 174 : index
    %165 = memref.load %arg1[%164, %c174] : memref<2x180xf32, #tpu.memory_space<smem>>
    %166 = vector.broadcast %165 : f32 to vector<16x16xf32>
    %167 = arith.mulf %166, %13 : vector<16x16xf32>
    %168 = arith.subf %163, %167 : vector<16x16xf32>
    %169 = arith.index_cast %arg0 : i32 to index
    %c175 = arith.constant 175 : index
    %170 = memref.load %arg1[%169, %c175] : memref<2x180xf32, #tpu.memory_space<smem>>
    %171 = vector.broadcast %170 : f32 to vector<16x16xf32>
    %172 = arith.mulf %171, %17 : vector<16x16xf32>
    %173 = arith.subf %168, %172 : vector<16x16xf32>
    %174 = arith.index_cast %arg0 : i32 to index
    %c176 = arith.constant 176 : index
    %175 = memref.load %arg1[%174, %c176] : memref<2x180xf32, #tpu.memory_space<smem>>
    %176 = vector.broadcast %175 : f32 to vector<16x16xf32>
    %177 = arith.mulf %176, %18 : vector<16x16xf32>
    %178 = arith.addf %173, %177 : vector<16x16xf32>
    %179 = arith.index_cast %arg0 : i32 to index
    %c177 = arith.constant 177 : index
    %180 = memref.load %arg1[%179, %c177] : memref<2x180xf32, #tpu.memory_space<smem>>
    %181 = vector.broadcast %180 : f32 to vector<16x16xf32>
    %182 = arith.mulf %181, %19 : vector<16x16xf32>
    %183 = arith.addf %178, %182 : vector<16x16xf32>
    %184 = arith.index_cast %arg0 : i32 to index
    %c178 = arith.constant 178 : index
    %185 = memref.load %arg1[%184, %c178] : memref<2x180xf32, #tpu.memory_space<smem>>
    %186 = vector.broadcast %185 : f32 to vector<16x16xf32>
    %187 = arith.mulf %186, %20 : vector<16x16xf32>
    %188 = arith.addf %183, %187 : vector<16x16xf32>
    %189 = arith.index_cast %arg0 : i32 to index
    %c179 = arith.constant 179 : index
    %190 = memref.load %arg1[%189, %c179] : memref<2x180xf32, #tpu.memory_space<smem>>
    %191 = vector.broadcast %190 : f32 to vector<16x16xf32>
    %192 = arith.mulf %191, %21 : vector<16x16xf32>
    %193 = arith.addf %188, %192 : vector<16x16xf32>
    %c0 = arith.constant 0 : index
    %c0_2 = arith.constant 0 : index
    %c0_3 = arith.constant 0 : index
    %c0_4 = arith.constant 0 : index
    %194 = vector.load %arg2[%c0, %c0_2, %c0_3, %c0_4] : memref<1x4x18x18xf32, #tpu.memory_space<vmem>>, vector<1x1x16x16xf32>
    %195 = vector.shape_cast %194 : vector<1x1x16x16xf32> to vector<16x16xf32>
    %196 = arith.index_cast %arg0 : i32 to index
    %c0_5 = arith.constant 0 : index
    %197 = memref.load %arg1[%196, %c0_5] : memref<2x180xf32, #tpu.memory_space<smem>>
    %198 = vector.broadcast %197 : f32 to vector<16x16xf32>
    %199 = arith.mulf %195, %198 : vector<16x16xf32>
    %200 = arith.addf %64, %199 : vector<16x16xf32>
    %201 = arith.index_cast %arg0 : i32 to index
    %c36 = arith.constant 36 : index
    %202 = memref.load %arg1[%201, %c36] : memref<2x180xf32, #tpu.memory_space<smem>>
    %203 = vector.broadcast %202 : f32 to vector<16x16xf32>
    %204 = arith.mulf %195, %203 : vector<16x16xf32>
    %205 = arith.addf %107, %204 : vector<16x16xf32>
    %206 = arith.index_cast %arg0 : i32 to index
    %c72 = arith.constant 72 : index
    %207 = memref.load %arg1[%206, %c72] : memref<2x180xf32, #tpu.memory_space<smem>>
    %208 = vector.broadcast %207 : f32 to vector<16x16xf32>
    %209 = arith.mulf %195, %208 : vector<16x16xf32>
    %210 = arith.addf %150, %209 : vector<16x16xf32>
    %211 = arith.index_cast %arg0 : i32 to index
    %c108 = arith.constant 108 : index
    %212 = memref.load %arg1[%211, %c108] : memref<2x180xf32, #tpu.memory_space<smem>>
    %213 = vector.broadcast %212 : f32 to vector<16x16xf32>
    %214 = arith.mulf %195, %213 : vector<16x16xf32>
    %215 = arith.addf %193, %214 : vector<16x16xf32>
    %c0_6 = arith.constant 0 : index
    %c0_7 = arith.constant 0 : index
    %c0_8 = arith.constant 0 : index
    %c1 = arith.constant 1 : index
    %216 = vector.load %arg2[%c0_6, %c0_7, %c0_8, %c1] : memref<1x4x18x18xf32, #tpu.memory_space<vmem>>, vector<1x1x16x16xf32>
    %217 = vector.shape_cast %216 : vector<1x1x16x16xf32> to vector<16x16xf32>
    %218 = arith.index_cast %arg0 : i32 to index
    %c1_9 = arith.constant 1 : index
    %219 = memref.load %arg1[%218, %c1_9] : memref<2x180xf32, #tpu.memory_space<smem>>
    %220 = vector.broadcast %219 : f32 to vector<16x16xf32>
    %221 = arith.mulf %217, %220 : vector<16x16xf32>
    %222 = arith.addf %200, %221 : vector<16x16xf32>
    %223 = arith.index_cast %arg0 : i32 to index
    %c37 = arith.constant 37 : index
    %224 = memref.load %arg1[%223, %c37] : memref<2x180xf32, #tpu.memory_space<smem>>
    %225 = vector.broadcast %224 : f32 to vector<16x16xf32>
    %226 = arith.mulf %217, %225 : vector<16x16xf32>
    %227 = arith.addf %205, %226 : vector<16x16xf32>
    %228 = arith.index_cast %arg0 : i32 to index
    %c73 = arith.constant 73 : index
    %229 = memref.load %arg1[%228, %c73] : memref<2x180xf32, #tpu.memory_space<smem>>
    %230 = vector.broadcast %229 : f32 to vector<16x16xf32>
    %231 = arith.mulf %217, %230 : vector<16x16xf32>
    %232 = arith.addf %210, %231 : vector<16x16xf32>
    %233 = arith.index_cast %arg0 : i32 to index
    %c109 = arith.constant 109 : index
    %234 = memref.load %arg1[%233, %c109] : memref<2x180xf32, #tpu.memory_space<smem>>
    %235 = vector.broadcast %234 : f32 to vector<16x16xf32>
    %236 = arith.mulf %217, %235 : vector<16x16xf32>
    %237 = arith.addf %215, %236 : vector<16x16xf32>
    %c0_10 = arith.constant 0 : index
    %c0_11 = arith.constant 0 : index
    %c0_12 = arith.constant 0 : index
    %c2 = arith.constant 2 : index
    %238 = vector.load %arg2[%c0_10, %c0_11, %c0_12, %c2] : memref<1x4x18x18xf32, #tpu.memory_space<vmem>>, vector<1x1x16x16xf32>
    %239 = vector.shape_cast %238 : vector<1x1x16x16xf32> to vector<16x16xf32>
    %240 = arith.index_cast %arg0 : i32 to index
    %c2_13 = arith.constant 2 : index
    %241 = memref.load %arg1[%240, %c2_13] : memref<2x180xf32, #tpu.memory_space<smem>>
    %242 = vector.broadcast %241 : f32 to vector<16x16xf32>
    %243 = arith.mulf %239, %242 : vector<16x16xf32>
    %244 = arith.addf %222, %243 : vector<16x16xf32>
    %245 = arith.index_cast %arg0 : i32 to index
    %c38 = arith.constant 38 : index
    %246 = memref.load %arg1[%245, %c38] : memref<2x180xf32, #tpu.memory_space<smem>>
    %247 = vector.broadcast %246 : f32 to vector<16x16xf32>
    %248 = arith.mulf %239, %247 : vector<16x16xf32>
    %249 = arith.addf %227, %248 : vector<16x16xf32>
    %250 = arith.index_cast %arg0 : i32 to index
    %c74 = arith.constant 74 : index
    %251 = memref.load %arg1[%250, %c74] : memref<2x180xf32, #tpu.memory_space<smem>>
    %252 = vector.broadcast %251 : f32 to vector<16x16xf32>
    %253 = arith.mulf %239, %252 : vector<16x16xf32>
    %254 = arith.addf %232, %253 : vector<16x16xf32>
    %255 = arith.index_cast %arg0 : i32 to index
    %c110 = arith.constant 110 : index
    %256 = memref.load %arg1[%255, %c110] : memref<2x180xf32, #tpu.memory_space<smem>>
    %257 = vector.broadcast %256 : f32 to vector<16x16xf32>
    %258 = arith.mulf %239, %257 : vector<16x16xf32>
    %259 = arith.addf %237, %258 : vector<16x16xf32>
    %c0_14 = arith.constant 0 : index
    %c0_15 = arith.constant 0 : index
    %c1_16 = arith.constant 1 : index
    %c0_17 = arith.constant 0 : index
    %260 = vector.load %arg2[%c0_14, %c0_15, %c1_16, %c0_17] : memref<1x4x18x18xf32, #tpu.memory_space<vmem>>, vector<1x1x16x16xf32>
    %261 = vector.shape_cast %260 : vector<1x1x16x16xf32> to vector<16x16xf32>
    %262 = arith.index_cast %arg0 : i32 to index
    %c3 = arith.constant 3 : index
    %263 = memref.load %arg1[%262, %c3] : memref<2x180xf32, #tpu.memory_space<smem>>
    %264 = vector.broadcast %263 : f32 to vector<16x16xf32>
    %265 = arith.mulf %261, %264 : vector<16x16xf32>
    %266 = arith.addf %244, %265 : vector<16x16xf32>
    %267 = arith.index_cast %arg0 : i32 to index
    %c39 = arith.constant 39 : index
    %268 = memref.load %arg1[%267, %c39] : memref<2x180xf32, #tpu.memory_space<smem>>
    %269 = vector.broadcast %268 : f32 to vector<16x16xf32>
    %270 = arith.mulf %261, %269 : vector<16x16xf32>
    %271 = arith.addf %249, %270 : vector<16x16xf32>
    %272 = arith.index_cast %arg0 : i32 to index
    %c75 = arith.constant 75 : index
    %273 = memref.load %arg1[%272, %c75] : memref<2x180xf32, #tpu.memory_space<smem>>
    %274 = vector.broadcast %273 : f32 to vector<16x16xf32>
    %275 = arith.mulf %261, %274 : vector<16x16xf32>
    %276 = arith.addf %254, %275 : vector<16x16xf32>
    %277 = arith.index_cast %arg0 : i32 to index
    %c111 = arith.constant 111 : index
    %278 = memref.load %arg1[%277, %c111] : memref<2x180xf32, #tpu.memory_space<smem>>
    %279 = vector.broadcast %278 : f32 to vector<16x16xf32>
    %280 = arith.mulf %261, %279 : vector<16x16xf32>
    %281 = arith.addf %259, %280 : vector<16x16xf32>
    %c0_18 = arith.constant 0 : index
    %c0_19 = arith.constant 0 : index
    %c1_20 = arith.constant 1 : index
    %c1_21 = arith.constant 1 : index
    %282 = vector.load %arg2[%c0_18, %c0_19, %c1_20, %c1_21] : memref<1x4x18x18xf32, #tpu.memory_space<vmem>>, vector<1x1x16x16xf32>
    %283 = vector.shape_cast %282 : vector<1x1x16x16xf32> to vector<16x16xf32>
    %284 = arith.index_cast %arg0 : i32 to index
    %c4 = arith.constant 4 : index
    %285 = memref.load %arg1[%284, %c4] : memref<2x180xf32, #tpu.memory_space<smem>>
    %286 = vector.broadcast %285 : f32 to vector<16x16xf32>
    %287 = arith.mulf %283, %286 : vector<16x16xf32>
    %288 = arith.addf %266, %287 : vector<16x16xf32>
    %289 = arith.index_cast %arg0 : i32 to index
    %c40 = arith.constant 40 : index
    %290 = memref.load %arg1[%289, %c40] : memref<2x180xf32, #tpu.memory_space<smem>>
    %291 = vector.broadcast %290 : f32 to vector<16x16xf32>
    %292 = arith.mulf %283, %291 : vector<16x16xf32>
    %293 = arith.addf %271, %292 : vector<16x16xf32>
    %294 = arith.index_cast %arg0 : i32 to index
    %c76 = arith.constant 76 : index
    %295 = memref.load %arg1[%294, %c76] : memref<2x180xf32, #tpu.memory_space<smem>>
    %296 = vector.broadcast %295 : f32 to vector<16x16xf32>
    %297 = arith.mulf %283, %296 : vector<16x16xf32>
    %298 = arith.addf %276, %297 : vector<16x16xf32>
    %299 = arith.index_cast %arg0 : i32 to index
    %c112 = arith.constant 112 : index
    %300 = memref.load %arg1[%299, %c112] : memref<2x180xf32, #tpu.memory_space<smem>>
    %301 = vector.broadcast %300 : f32 to vector<16x16xf32>
    %302 = arith.mulf %283, %301 : vector<16x16xf32>
    %303 = arith.addf %281, %302 : vector<16x16xf32>
    %c0_22 = arith.constant 0 : index
    %c0_23 = arith.constant 0 : index
    %c1_24 = arith.constant 1 : index
    %c2_25 = arith.constant 2 : index
    %304 = vector.load %arg2[%c0_22, %c0_23, %c1_24, %c2_25] : memref<1x4x18x18xf32, #tpu.memory_space<vmem>>, vector<1x1x16x16xf32>
    %305 = vector.shape_cast %304 : vector<1x1x16x16xf32> to vector<16x16xf32>
    %306 = arith.index_cast %arg0 : i32 to index
    %c5 = arith.constant 5 : index
    %307 = memref.load %arg1[%306, %c5] : memref<2x180xf32, #tpu.memory_space<smem>>
    %308 = vector.broadcast %307 : f32 to vector<16x16xf32>
    %309 = arith.mulf %305, %308 : vector<16x16xf32>
    %310 = arith.addf %288, %309 : vector<16x16xf32>
    %311 = arith.index_cast %arg0 : i32 to index
    %c41 = arith.constant 41 : index
    %312 = memref.load %arg1[%311, %c41] : memref<2x180xf32, #tpu.memory_space<smem>>
    %313 = vector.broadcast %312 : f32 to vector<16x16xf32>
    %314 = arith.mulf %305, %313 : vector<16x16xf32>
    %315 = arith.addf %293, %314 : vector<16x16xf32>
    %316 = arith.index_cast %arg0 : i32 to index
    %c77 = arith.constant 77 : index
    %317 = memref.load %arg1[%316, %c77] : memref<2x180xf32, #tpu.memory_space<smem>>
    %318 = vector.broadcast %317 : f32 to vector<16x16xf32>
    %319 = arith.mulf %305, %318 : vector<16x16xf32>
    %320 = arith.addf %298, %319 : vector<16x16xf32>
    %321 = arith.index_cast %arg0 : i32 to index
    %c113 = arith.constant 113 : index
    %322 = memref.load %arg1[%321, %c113] : memref<2x180xf32, #tpu.memory_space<smem>>
    %323 = vector.broadcast %322 : f32 to vector<16x16xf32>
    %324 = arith.mulf %305, %323 : vector<16x16xf32>
    %325 = arith.addf %303, %324 : vector<16x16xf32>
    %c0_26 = arith.constant 0 : index
    %c0_27 = arith.constant 0 : index
    %c2_28 = arith.constant 2 : index
    %c0_29 = arith.constant 0 : index
    %326 = vector.load %arg2[%c0_26, %c0_27, %c2_28, %c0_29] : memref<1x4x18x18xf32, #tpu.memory_space<vmem>>, vector<1x1x16x16xf32>
    %327 = vector.shape_cast %326 : vector<1x1x16x16xf32> to vector<16x16xf32>
    %328 = arith.index_cast %arg0 : i32 to index
    %c6 = arith.constant 6 : index
    %329 = memref.load %arg1[%328, %c6] : memref<2x180xf32, #tpu.memory_space<smem>>
    %330 = vector.broadcast %329 : f32 to vector<16x16xf32>
    %331 = arith.mulf %327, %330 : vector<16x16xf32>
    %332 = arith.addf %310, %331 : vector<16x16xf32>
    %333 = arith.index_cast %arg0 : i32 to index
    %c42 = arith.constant 42 : index
    %334 = memref.load %arg1[%333, %c42] : memref<2x180xf32, #tpu.memory_space<smem>>
    %335 = vector.broadcast %334 : f32 to vector<16x16xf32>
    %336 = arith.mulf %327, %335 : vector<16x16xf32>
    %337 = arith.addf %315, %336 : vector<16x16xf32>
    %338 = arith.index_cast %arg0 : i32 to index
    %c78 = arith.constant 78 : index
    %339 = memref.load %arg1[%338, %c78] : memref<2x180xf32, #tpu.memory_space<smem>>
    %340 = vector.broadcast %339 : f32 to vector<16x16xf32>
    %341 = arith.mulf %327, %340 : vector<16x16xf32>
    %342 = arith.addf %320, %341 : vector<16x16xf32>
    %343 = arith.index_cast %arg0 : i32 to index
    %c114 = arith.constant 114 : index
    %344 = memref.load %arg1[%343, %c114] : memref<2x180xf32, #tpu.memory_space<smem>>
    %345 = vector.broadcast %344 : f32 to vector<16x16xf32>
    %346 = arith.mulf %327, %345 : vector<16x16xf32>
    %347 = arith.addf %325, %346 : vector<16x16xf32>
    %c0_30 = arith.constant 0 : index
    %c0_31 = arith.constant 0 : index
    %c2_32 = arith.constant 2 : index
    %c1_33 = arith.constant 1 : index
    %348 = vector.load %arg2[%c0_30, %c0_31, %c2_32, %c1_33] : memref<1x4x18x18xf32, #tpu.memory_space<vmem>>, vector<1x1x16x16xf32>
    %349 = vector.shape_cast %348 : vector<1x1x16x16xf32> to vector<16x16xf32>
    %350 = arith.index_cast %arg0 : i32 to index
    %c7 = arith.constant 7 : index
    %351 = memref.load %arg1[%350, %c7] : memref<2x180xf32, #tpu.memory_space<smem>>
    %352 = vector.broadcast %351 : f32 to vector<16x16xf32>
    %353 = arith.mulf %349, %352 : vector<16x16xf32>
    %354 = arith.addf %332, %353 : vector<16x16xf32>
    %355 = arith.index_cast %arg0 : i32 to index
    %c43 = arith.constant 43 : index
    %356 = memref.load %arg1[%355, %c43] : memref<2x180xf32, #tpu.memory_space<smem>>
    %357 = vector.broadcast %356 : f32 to vector<16x16xf32>
    %358 = arith.mulf %349, %357 : vector<16x16xf32>
    %359 = arith.addf %337, %358 : vector<16x16xf32>
    %360 = arith.index_cast %arg0 : i32 to index
    %c79 = arith.constant 79 : index
    %361 = memref.load %arg1[%360, %c79] : memref<2x180xf32, #tpu.memory_space<smem>>
    %362 = vector.broadcast %361 : f32 to vector<16x16xf32>
    %363 = arith.mulf %349, %362 : vector<16x16xf32>
    %364 = arith.addf %342, %363 : vector<16x16xf32>
    %365 = arith.index_cast %arg0 : i32 to index
    %c115 = arith.constant 115 : index
    %366 = memref.load %arg1[%365, %c115] : memref<2x180xf32, #tpu.memory_space<smem>>
    %367 = vector.broadcast %366 : f32 to vector<16x16xf32>
    %368 = arith.mulf %349, %367 : vector<16x16xf32>
    %369 = arith.addf %347, %368 : vector<16x16xf32>
    %c0_34 = arith.constant 0 : index
    %c0_35 = arith.constant 0 : index
    %c2_36 = arith.constant 2 : index
    %c2_37 = arith.constant 2 : index
    %370 = vector.load %arg2[%c0_34, %c0_35, %c2_36, %c2_37] : memref<1x4x18x18xf32, #tpu.memory_space<vmem>>, vector<1x1x16x16xf32>
    %371 = vector.shape_cast %370 : vector<1x1x16x16xf32> to vector<16x16xf32>
    %372 = arith.index_cast %arg0 : i32 to index
    %c8 = arith.constant 8 : index
    %373 = memref.load %arg1[%372, %c8] : memref<2x180xf32, #tpu.memory_space<smem>>
    %374 = vector.broadcast %373 : f32 to vector<16x16xf32>
    %375 = arith.mulf %371, %374 : vector<16x16xf32>
    %376 = arith.addf %354, %375 : vector<16x16xf32>
    %377 = arith.index_cast %arg0 : i32 to index
    %c44 = arith.constant 44 : index
    %378 = memref.load %arg1[%377, %c44] : memref<2x180xf32, #tpu.memory_space<smem>>
    %379 = vector.broadcast %378 : f32 to vector<16x16xf32>
    %380 = arith.mulf %371, %379 : vector<16x16xf32>
    %381 = arith.addf %359, %380 : vector<16x16xf32>
    %382 = arith.index_cast %arg0 : i32 to index
    %c80 = arith.constant 80 : index
    %383 = memref.load %arg1[%382, %c80] : memref<2x180xf32, #tpu.memory_space<smem>>
    %384 = vector.broadcast %383 : f32 to vector<16x16xf32>
    %385 = arith.mulf %371, %384 : vector<16x16xf32>
    %386 = arith.addf %364, %385 : vector<16x16xf32>
    %387 = arith.index_cast %arg0 : i32 to index
    %c116 = arith.constant 116 : index
    %388 = memref.load %arg1[%387, %c116] : memref<2x180xf32, #tpu.memory_space<smem>>
    %389 = vector.broadcast %388 : f32 to vector<16x16xf32>
    %390 = arith.mulf %371, %389 : vector<16x16xf32>
    %391 = arith.addf %369, %390 : vector<16x16xf32>
    %c0_38 = arith.constant 0 : index
    %c1_39 = arith.constant 1 : index
    %c0_40 = arith.constant 0 : index
    %c0_41 = arith.constant 0 : index
    %392 = vector.load %arg2[%c0_38, %c1_39, %c0_40, %c0_41] : memref<1x4x18x18xf32, #tpu.memory_space<vmem>>, vector<1x1x16x16xf32>
    %393 = vector.shape_cast %392 : vector<1x1x16x16xf32> to vector<16x16xf32>
    %394 = arith.index_cast %arg0 : i32 to index
    %c9 = arith.constant 9 : index
    %395 = memref.load %arg1[%394, %c9] : memref<2x180xf32, #tpu.memory_space<smem>>
    %396 = vector.broadcast %395 : f32 to vector<16x16xf32>
    %397 = arith.mulf %393, %396 : vector<16x16xf32>
    %398 = arith.addf %376, %397 : vector<16x16xf32>
    %399 = arith.index_cast %arg0 : i32 to index
    %c45 = arith.constant 45 : index
    %400 = memref.load %arg1[%399, %c45] : memref<2x180xf32, #tpu.memory_space<smem>>
    %401 = vector.broadcast %400 : f32 to vector<16x16xf32>
    %402 = arith.mulf %393, %401 : vector<16x16xf32>
    %403 = arith.addf %381, %402 : vector<16x16xf32>
    %404 = arith.index_cast %arg0 : i32 to index
    %c81 = arith.constant 81 : index
    %405 = memref.load %arg1[%404, %c81] : memref<2x180xf32, #tpu.memory_space<smem>>
    %406 = vector.broadcast %405 : f32 to vector<16x16xf32>
    %407 = arith.mulf %393, %406 : vector<16x16xf32>
    %408 = arith.addf %386, %407 : vector<16x16xf32>
    %409 = arith.index_cast %arg0 : i32 to index
    %c117 = arith.constant 117 : index
    %410 = memref.load %arg1[%409, %c117] : memref<2x180xf32, #tpu.memory_space<smem>>
    %411 = vector.broadcast %410 : f32 to vector<16x16xf32>
    %412 = arith.mulf %393, %411 : vector<16x16xf32>
    %413 = arith.addf %391, %412 : vector<16x16xf32>
    %c0_42 = arith.constant 0 : index
    %c1_43 = arith.constant 1 : index
    %c0_44 = arith.constant 0 : index
    %c1_45 = arith.constant 1 : index
    %414 = vector.load %arg2[%c0_42, %c1_43, %c0_44, %c1_45] : memref<1x4x18x18xf32, #tpu.memory_space<vmem>>, vector<1x1x16x16xf32>
    %415 = vector.shape_cast %414 : vector<1x1x16x16xf32> to vector<16x16xf32>
    %416 = arith.index_cast %arg0 : i32 to index
    %c10 = arith.constant 10 : index
    %417 = memref.load %arg1[%416, %c10] : memref<2x180xf32, #tpu.memory_space<smem>>
    %418 = vector.broadcast %417 : f32 to vector<16x16xf32>
    %419 = arith.mulf %415, %418 : vector<16x16xf32>
    %420 = arith.addf %398, %419 : vector<16x16xf32>
    %421 = arith.index_cast %arg0 : i32 to index
    %c46 = arith.constant 46 : index
    %422 = memref.load %arg1[%421, %c46] : memref<2x180xf32, #tpu.memory_space<smem>>
    %423 = vector.broadcast %422 : f32 to vector<16x16xf32>
    %424 = arith.mulf %415, %423 : vector<16x16xf32>
    %425 = arith.addf %403, %424 : vector<16x16xf32>
    %426 = arith.index_cast %arg0 : i32 to index
    %c82 = arith.constant 82 : index
    %427 = memref.load %arg1[%426, %c82] : memref<2x180xf32, #tpu.memory_space<smem>>
    %428 = vector.broadcast %427 : f32 to vector<16x16xf32>
    %429 = arith.mulf %415, %428 : vector<16x16xf32>
    %430 = arith.addf %408, %429 : vector<16x16xf32>
    %431 = arith.index_cast %arg0 : i32 to index
    %c118 = arith.constant 118 : index
    %432 = memref.load %arg1[%431, %c118] : memref<2x180xf32, #tpu.memory_space<smem>>
    %433 = vector.broadcast %432 : f32 to vector<16x16xf32>
    %434 = arith.mulf %415, %433 : vector<16x16xf32>
    %435 = arith.addf %413, %434 : vector<16x16xf32>
    %c0_46 = arith.constant 0 : index
    %c1_47 = arith.constant 1 : index
    %c0_48 = arith.constant 0 : index
    %c2_49 = arith.constant 2 : index
    %436 = vector.load %arg2[%c0_46, %c1_47, %c0_48, %c2_49] : memref<1x4x18x18xf32, #tpu.memory_space<vmem>>, vector<1x1x16x16xf32>
    %437 = vector.shape_cast %436 : vector<1x1x16x16xf32> to vector<16x16xf32>
    %438 = arith.index_cast %arg0 : i32 to index
    %c11 = arith.constant 11 : index
    %439 = memref.load %arg1[%438, %c11] : memref<2x180xf32, #tpu.memory_space<smem>>
    %440 = vector.broadcast %439 : f32 to vector<16x16xf32>
    %441 = arith.mulf %437, %440 : vector<16x16xf32>
    %442 = arith.addf %420, %441 : vector<16x16xf32>
    %443 = arith.index_cast %arg0 : i32 to index
    %c47 = arith.constant 47 : index
    %444 = memref.load %arg1[%443, %c47] : memref<2x180xf32, #tpu.memory_space<smem>>
    %445 = vector.broadcast %444 : f32 to vector<16x16xf32>
    %446 = arith.mulf %437, %445 : vector<16x16xf32>
    %447 = arith.addf %425, %446 : vector<16x16xf32>
    %448 = arith.index_cast %arg0 : i32 to index
    %c83 = arith.constant 83 : index
    %449 = memref.load %arg1[%448, %c83] : memref<2x180xf32, #tpu.memory_space<smem>>
    %450 = vector.broadcast %449 : f32 to vector<16x16xf32>
    %451 = arith.mulf %437, %450 : vector<16x16xf32>
    %452 = arith.addf %430, %451 : vector<16x16xf32>
    %453 = arith.index_cast %arg0 : i32 to index
    %c119 = arith.constant 119 : index
    %454 = memref.load %arg1[%453, %c119] : memref<2x180xf32, #tpu.memory_space<smem>>
    %455 = vector.broadcast %454 : f32 to vector<16x16xf32>
    %456 = arith.mulf %437, %455 : vector<16x16xf32>
    %457 = arith.addf %435, %456 : vector<16x16xf32>
    %c0_50 = arith.constant 0 : index
    %c1_51 = arith.constant 1 : index
    %c1_52 = arith.constant 1 : index
    %c0_53 = arith.constant 0 : index
    %458 = vector.load %arg2[%c0_50, %c1_51, %c1_52, %c0_53] : memref<1x4x18x18xf32, #tpu.memory_space<vmem>>, vector<1x1x16x16xf32>
    %459 = vector.shape_cast %458 : vector<1x1x16x16xf32> to vector<16x16xf32>
    %460 = arith.index_cast %arg0 : i32 to index
    %c12 = arith.constant 12 : index
    %461 = memref.load %arg1[%460, %c12] : memref<2x180xf32, #tpu.memory_space<smem>>
    %462 = vector.broadcast %461 : f32 to vector<16x16xf32>
    %463 = arith.mulf %459, %462 : vector<16x16xf32>
    %464 = arith.addf %442, %463 : vector<16x16xf32>
    %465 = arith.index_cast %arg0 : i32 to index
    %c48 = arith.constant 48 : index
    %466 = memref.load %arg1[%465, %c48] : memref<2x180xf32, #tpu.memory_space<smem>>
    %467 = vector.broadcast %466 : f32 to vector<16x16xf32>
    %468 = arith.mulf %459, %467 : vector<16x16xf32>
    %469 = arith.addf %447, %468 : vector<16x16xf32>
    %470 = arith.index_cast %arg0 : i32 to index
    %c84 = arith.constant 84 : index
    %471 = memref.load %arg1[%470, %c84] : memref<2x180xf32, #tpu.memory_space<smem>>
    %472 = vector.broadcast %471 : f32 to vector<16x16xf32>
    %473 = arith.mulf %459, %472 : vector<16x16xf32>
    %474 = arith.addf %452, %473 : vector<16x16xf32>
    %475 = arith.index_cast %arg0 : i32 to index
    %c120 = arith.constant 120 : index
    %476 = memref.load %arg1[%475, %c120] : memref<2x180xf32, #tpu.memory_space<smem>>
    %477 = vector.broadcast %476 : f32 to vector<16x16xf32>
    %478 = arith.mulf %459, %477 : vector<16x16xf32>
    %479 = arith.addf %457, %478 : vector<16x16xf32>
    %c0_54 = arith.constant 0 : index
    %c1_55 = arith.constant 1 : index
    %c1_56 = arith.constant 1 : index
    %c1_57 = arith.constant 1 : index
    %480 = vector.load %arg2[%c0_54, %c1_55, %c1_56, %c1_57] : memref<1x4x18x18xf32, #tpu.memory_space<vmem>>, vector<1x1x16x16xf32>
    %481 = vector.shape_cast %480 : vector<1x1x16x16xf32> to vector<16x16xf32>
    %482 = arith.index_cast %arg0 : i32 to index
    %c13 = arith.constant 13 : index
    %483 = memref.load %arg1[%482, %c13] : memref<2x180xf32, #tpu.memory_space<smem>>
    %484 = vector.broadcast %483 : f32 to vector<16x16xf32>
    %485 = arith.mulf %481, %484 : vector<16x16xf32>
    %486 = arith.addf %464, %485 : vector<16x16xf32>
    %487 = arith.index_cast %arg0 : i32 to index
    %c49 = arith.constant 49 : index
    %488 = memref.load %arg1[%487, %c49] : memref<2x180xf32, #tpu.memory_space<smem>>
    %489 = vector.broadcast %488 : f32 to vector<16x16xf32>
    %490 = arith.mulf %481, %489 : vector<16x16xf32>
    %491 = arith.addf %469, %490 : vector<16x16xf32>
    %492 = arith.index_cast %arg0 : i32 to index
    %c85 = arith.constant 85 : index
    %493 = memref.load %arg1[%492, %c85] : memref<2x180xf32, #tpu.memory_space<smem>>
    %494 = vector.broadcast %493 : f32 to vector<16x16xf32>
    %495 = arith.mulf %481, %494 : vector<16x16xf32>
    %496 = arith.addf %474, %495 : vector<16x16xf32>
    %497 = arith.index_cast %arg0 : i32 to index
    %c121 = arith.constant 121 : index
    %498 = memref.load %arg1[%497, %c121] : memref<2x180xf32, #tpu.memory_space<smem>>
    %499 = vector.broadcast %498 : f32 to vector<16x16xf32>
    %500 = arith.mulf %481, %499 : vector<16x16xf32>
    %501 = arith.addf %479, %500 : vector<16x16xf32>
    %c0_58 = arith.constant 0 : index
    %c1_59 = arith.constant 1 : index
    %c1_60 = arith.constant 1 : index
    %c2_61 = arith.constant 2 : index
    %502 = vector.load %arg2[%c0_58, %c1_59, %c1_60, %c2_61] : memref<1x4x18x18xf32, #tpu.memory_space<vmem>>, vector<1x1x16x16xf32>
    %503 = vector.shape_cast %502 : vector<1x1x16x16xf32> to vector<16x16xf32>
    %504 = arith.index_cast %arg0 : i32 to index
    %c14 = arith.constant 14 : index
    %505 = memref.load %arg1[%504, %c14] : memref<2x180xf32, #tpu.memory_space<smem>>
    %506 = vector.broadcast %505 : f32 to vector<16x16xf32>
    %507 = arith.mulf %503, %506 : vector<16x16xf32>
    %508 = arith.addf %486, %507 : vector<16x16xf32>
    %509 = arith.index_cast %arg0 : i32 to index
    %c50 = arith.constant 50 : index
    %510 = memref.load %arg1[%509, %c50] : memref<2x180xf32, #tpu.memory_space<smem>>
    %511 = vector.broadcast %510 : f32 to vector<16x16xf32>
    %512 = arith.mulf %503, %511 : vector<16x16xf32>
    %513 = arith.addf %491, %512 : vector<16x16xf32>
    %514 = arith.index_cast %arg0 : i32 to index
    %c86 = arith.constant 86 : index
    %515 = memref.load %arg1[%514, %c86] : memref<2x180xf32, #tpu.memory_space<smem>>
    %516 = vector.broadcast %515 : f32 to vector<16x16xf32>
    %517 = arith.mulf %503, %516 : vector<16x16xf32>
    %518 = arith.addf %496, %517 : vector<16x16xf32>
    %519 = arith.index_cast %arg0 : i32 to index
    %c122 = arith.constant 122 : index
    %520 = memref.load %arg1[%519, %c122] : memref<2x180xf32, #tpu.memory_space<smem>>
    %521 = vector.broadcast %520 : f32 to vector<16x16xf32>
    %522 = arith.mulf %503, %521 : vector<16x16xf32>
    %523 = arith.addf %501, %522 : vector<16x16xf32>
    %c0_62 = arith.constant 0 : index
    %c1_63 = arith.constant 1 : index
    %c2_64 = arith.constant 2 : index
    %c0_65 = arith.constant 0 : index
    %524 = vector.load %arg2[%c0_62, %c1_63, %c2_64, %c0_65] : memref<1x4x18x18xf32, #tpu.memory_space<vmem>>, vector<1x1x16x16xf32>
    %525 = vector.shape_cast %524 : vector<1x1x16x16xf32> to vector<16x16xf32>
    %526 = arith.index_cast %arg0 : i32 to index
    %c15 = arith.constant 15 : index
    %527 = memref.load %arg1[%526, %c15] : memref<2x180xf32, #tpu.memory_space<smem>>
    %528 = vector.broadcast %527 : f32 to vector<16x16xf32>
    %529 = arith.mulf %525, %528 : vector<16x16xf32>
    %530 = arith.addf %508, %529 : vector<16x16xf32>
    %531 = arith.index_cast %arg0 : i32 to index
    %c51 = arith.constant 51 : index
    %532 = memref.load %arg1[%531, %c51] : memref<2x180xf32, #tpu.memory_space<smem>>
    %533 = vector.broadcast %532 : f32 to vector<16x16xf32>
    %534 = arith.mulf %525, %533 : vector<16x16xf32>
    %535 = arith.addf %513, %534 : vector<16x16xf32>
    %536 = arith.index_cast %arg0 : i32 to index
    %c87 = arith.constant 87 : index
    %537 = memref.load %arg1[%536, %c87] : memref<2x180xf32, #tpu.memory_space<smem>>
    %538 = vector.broadcast %537 : f32 to vector<16x16xf32>
    %539 = arith.mulf %525, %538 : vector<16x16xf32>
    %540 = arith.addf %518, %539 : vector<16x16xf32>
    %541 = arith.index_cast %arg0 : i32 to index
    %c123 = arith.constant 123 : index
    %542 = memref.load %arg1[%541, %c123] : memref<2x180xf32, #tpu.memory_space<smem>>
    %543 = vector.broadcast %542 : f32 to vector<16x16xf32>
    %544 = arith.mulf %525, %543 : vector<16x16xf32>
    %545 = arith.addf %523, %544 : vector<16x16xf32>
    %c0_66 = arith.constant 0 : index
    %c1_67 = arith.constant 1 : index
    %c2_68 = arith.constant 2 : index
    %c1_69 = arith.constant 1 : index
    %546 = vector.load %arg2[%c0_66, %c1_67, %c2_68, %c1_69] : memref<1x4x18x18xf32, #tpu.memory_space<vmem>>, vector<1x1x16x16xf32>
    %547 = vector.shape_cast %546 : vector<1x1x16x16xf32> to vector<16x16xf32>
    %548 = arith.index_cast %arg0 : i32 to index
    %c16 = arith.constant 16 : index
    %549 = memref.load %arg1[%548, %c16] : memref<2x180xf32, #tpu.memory_space<smem>>
    %550 = vector.broadcast %549 : f32 to vector<16x16xf32>
    %551 = arith.mulf %547, %550 : vector<16x16xf32>
    %552 = arith.addf %530, %551 : vector<16x16xf32>
    %553 = arith.index_cast %arg0 : i32 to index
    %c52 = arith.constant 52 : index
    %554 = memref.load %arg1[%553, %c52] : memref<2x180xf32, #tpu.memory_space<smem>>
    %555 = vector.broadcast %554 : f32 to vector<16x16xf32>
    %556 = arith.mulf %547, %555 : vector<16x16xf32>
    %557 = arith.addf %535, %556 : vector<16x16xf32>
    %558 = arith.index_cast %arg0 : i32 to index
    %c88 = arith.constant 88 : index
    %559 = memref.load %arg1[%558, %c88] : memref<2x180xf32, #tpu.memory_space<smem>>
    %560 = vector.broadcast %559 : f32 to vector<16x16xf32>
    %561 = arith.mulf %547, %560 : vector<16x16xf32>
    %562 = arith.addf %540, %561 : vector<16x16xf32>
    %563 = arith.index_cast %arg0 : i32 to index
    %c124 = arith.constant 124 : index
    %564 = memref.load %arg1[%563, %c124] : memref<2x180xf32, #tpu.memory_space<smem>>
    %565 = vector.broadcast %564 : f32 to vector<16x16xf32>
    %566 = arith.mulf %547, %565 : vector<16x16xf32>
    %567 = arith.addf %545, %566 : vector<16x16xf32>
    %c0_70 = arith.constant 0 : index
    %c1_71 = arith.constant 1 : index
    %c2_72 = arith.constant 2 : index
    %c2_73 = arith.constant 2 : index
    %568 = vector.load %arg2[%c0_70, %c1_71, %c2_72, %c2_73] : memref<1x4x18x18xf32, #tpu.memory_space<vmem>>, vector<1x1x16x16xf32>
    %569 = vector.shape_cast %568 : vector<1x1x16x16xf32> to vector<16x16xf32>
    %570 = arith.index_cast %arg0 : i32 to index
    %c17 = arith.constant 17 : index
    %571 = memref.load %arg1[%570, %c17] : memref<2x180xf32, #tpu.memory_space<smem>>
    %572 = vector.broadcast %571 : f32 to vector<16x16xf32>
    %573 = arith.mulf %569, %572 : vector<16x16xf32>
    %574 = arith.addf %552, %573 : vector<16x16xf32>
    %575 = arith.index_cast %arg0 : i32 to index
    %c53 = arith.constant 53 : index
    %576 = memref.load %arg1[%575, %c53] : memref<2x180xf32, #tpu.memory_space<smem>>
    %577 = vector.broadcast %576 : f32 to vector<16x16xf32>
    %578 = arith.mulf %569, %577 : vector<16x16xf32>
    %579 = arith.addf %557, %578 : vector<16x16xf32>
    %580 = arith.index_cast %arg0 : i32 to index
    %c89 = arith.constant 89 : index
    %581 = memref.load %arg1[%580, %c89] : memref<2x180xf32, #tpu.memory_space<smem>>
    %582 = vector.broadcast %581 : f32 to vector<16x16xf32>
    %583 = arith.mulf %569, %582 : vector<16x16xf32>
    %584 = arith.addf %562, %583 : vector<16x16xf32>
    %585 = arith.index_cast %arg0 : i32 to index
    %c125 = arith.constant 125 : index
    %586 = memref.load %arg1[%585, %c125] : memref<2x180xf32, #tpu.memory_space<smem>>
    %587 = vector.broadcast %586 : f32 to vector<16x16xf32>
    %588 = arith.mulf %569, %587 : vector<16x16xf32>
    %589 = arith.addf %567, %588 : vector<16x16xf32>
    %c0_74 = arith.constant 0 : index
    %c2_75 = arith.constant 2 : index
    %c0_76 = arith.constant 0 : index
    %c0_77 = arith.constant 0 : index
    %590 = vector.load %arg2[%c0_74, %c2_75, %c0_76, %c0_77] : memref<1x4x18x18xf32, #tpu.memory_space<vmem>>, vector<1x1x16x16xf32>
    %591 = vector.shape_cast %590 : vector<1x1x16x16xf32> to vector<16x16xf32>
    %592 = arith.index_cast %arg0 : i32 to index
    %c18 = arith.constant 18 : index
    %593 = memref.load %arg1[%592, %c18] : memref<2x180xf32, #tpu.memory_space<smem>>
    %594 = vector.broadcast %593 : f32 to vector<16x16xf32>
    %595 = arith.mulf %591, %594 : vector<16x16xf32>
    %596 = arith.addf %574, %595 : vector<16x16xf32>
    %597 = arith.index_cast %arg0 : i32 to index
    %c54 = arith.constant 54 : index
    %598 = memref.load %arg1[%597, %c54] : memref<2x180xf32, #tpu.memory_space<smem>>
    %599 = vector.broadcast %598 : f32 to vector<16x16xf32>
    %600 = arith.mulf %591, %599 : vector<16x16xf32>
    %601 = arith.addf %579, %600 : vector<16x16xf32>
    %602 = arith.index_cast %arg0 : i32 to index
    %c90 = arith.constant 90 : index
    %603 = memref.load %arg1[%602, %c90] : memref<2x180xf32, #tpu.memory_space<smem>>
    %604 = vector.broadcast %603 : f32 to vector<16x16xf32>
    %605 = arith.mulf %591, %604 : vector<16x16xf32>
    %606 = arith.addf %584, %605 : vector<16x16xf32>
    %607 = arith.index_cast %arg0 : i32 to index
    %c126 = arith.constant 126 : index
    %608 = memref.load %arg1[%607, %c126] : memref<2x180xf32, #tpu.memory_space<smem>>
    %609 = vector.broadcast %608 : f32 to vector<16x16xf32>
    %610 = arith.mulf %591, %609 : vector<16x16xf32>
    %611 = arith.addf %589, %610 : vector<16x16xf32>
    %c0_78 = arith.constant 0 : index
    %c2_79 = arith.constant 2 : index
    %c0_80 = arith.constant 0 : index
    %c1_81 = arith.constant 1 : index
    %612 = vector.load %arg2[%c0_78, %c2_79, %c0_80, %c1_81] : memref<1x4x18x18xf32, #tpu.memory_space<vmem>>, vector<1x1x16x16xf32>
    %613 = vector.shape_cast %612 : vector<1x1x16x16xf32> to vector<16x16xf32>
    %614 = arith.index_cast %arg0 : i32 to index
    %c19 = arith.constant 19 : index
    %615 = memref.load %arg1[%614, %c19] : memref<2x180xf32, #tpu.memory_space<smem>>
    %616 = vector.broadcast %615 : f32 to vector<16x16xf32>
    %617 = arith.mulf %613, %616 : vector<16x16xf32>
    %618 = arith.addf %596, %617 : vector<16x16xf32>
    %619 = arith.index_cast %arg0 : i32 to index
    %c55 = arith.constant 55 : index
    %620 = memref.load %arg1[%619, %c55] : memref<2x180xf32, #tpu.memory_space<smem>>
    %621 = vector.broadcast %620 : f32 to vector<16x16xf32>
    %622 = arith.mulf %613, %621 : vector<16x16xf32>
    %623 = arith.addf %601, %622 : vector<16x16xf32>
    %624 = arith.index_cast %arg0 : i32 to index
    %c91 = arith.constant 91 : index
    %625 = memref.load %arg1[%624, %c91] : memref<2x180xf32, #tpu.memory_space<smem>>
    %626 = vector.broadcast %625 : f32 to vector<16x16xf32>
    %627 = arith.mulf %613, %626 : vector<16x16xf32>
    %628 = arith.addf %606, %627 : vector<16x16xf32>
    %629 = arith.index_cast %arg0 : i32 to index
    %c127 = arith.constant 127 : index
    %630 = memref.load %arg1[%629, %c127] : memref<2x180xf32, #tpu.memory_space<smem>>
    %631 = vector.broadcast %630 : f32 to vector<16x16xf32>
    %632 = arith.mulf %613, %631 : vector<16x16xf32>
    %633 = arith.addf %611, %632 : vector<16x16xf32>
    %c0_82 = arith.constant 0 : index
    %c2_83 = arith.constant 2 : index
    %c0_84 = arith.constant 0 : index
    %c2_85 = arith.constant 2 : index
    %634 = vector.load %arg2[%c0_82, %c2_83, %c0_84, %c2_85] : memref<1x4x18x18xf32, #tpu.memory_space<vmem>>, vector<1x1x16x16xf32>
    %635 = vector.shape_cast %634 : vector<1x1x16x16xf32> to vector<16x16xf32>
    %636 = arith.index_cast %arg0 : i32 to index
    %c20 = arith.constant 20 : index
    %637 = memref.load %arg1[%636, %c20] : memref<2x180xf32, #tpu.memory_space<smem>>
    %638 = vector.broadcast %637 : f32 to vector<16x16xf32>
    %639 = arith.mulf %635, %638 : vector<16x16xf32>
    %640 = arith.addf %618, %639 : vector<16x16xf32>
    %641 = arith.index_cast %arg0 : i32 to index
    %c56 = arith.constant 56 : index
    %642 = memref.load %arg1[%641, %c56] : memref<2x180xf32, #tpu.memory_space<smem>>
    %643 = vector.broadcast %642 : f32 to vector<16x16xf32>
    %644 = arith.mulf %635, %643 : vector<16x16xf32>
    %645 = arith.addf %623, %644 : vector<16x16xf32>
    %646 = arith.index_cast %arg0 : i32 to index
    %c92 = arith.constant 92 : index
    %647 = memref.load %arg1[%646, %c92] : memref<2x180xf32, #tpu.memory_space<smem>>
    %648 = vector.broadcast %647 : f32 to vector<16x16xf32>
    %649 = arith.mulf %635, %648 : vector<16x16xf32>
    %650 = arith.addf %628, %649 : vector<16x16xf32>
    %651 = arith.index_cast %arg0 : i32 to index
    %c128 = arith.constant 128 : index
    %652 = memref.load %arg1[%651, %c128] : memref<2x180xf32, #tpu.memory_space<smem>>
    %653 = vector.broadcast %652 : f32 to vector<16x16xf32>
    %654 = arith.mulf %635, %653 : vector<16x16xf32>
    %655 = arith.addf %633, %654 : vector<16x16xf32>
    %c0_86 = arith.constant 0 : index
    %c2_87 = arith.constant 2 : index
    %c1_88 = arith.constant 1 : index
    %c0_89 = arith.constant 0 : index
    %656 = vector.load %arg2[%c0_86, %c2_87, %c1_88, %c0_89] : memref<1x4x18x18xf32, #tpu.memory_space<vmem>>, vector<1x1x16x16xf32>
    %657 = vector.shape_cast %656 : vector<1x1x16x16xf32> to vector<16x16xf32>
    %658 = arith.index_cast %arg0 : i32 to index
    %c21 = arith.constant 21 : index
    %659 = memref.load %arg1[%658, %c21] : memref<2x180xf32, #tpu.memory_space<smem>>
    %660 = vector.broadcast %659 : f32 to vector<16x16xf32>
    %661 = arith.mulf %657, %660 : vector<16x16xf32>
    %662 = arith.addf %640, %661 : vector<16x16xf32>
    %663 = arith.index_cast %arg0 : i32 to index
    %c57 = arith.constant 57 : index
    %664 = memref.load %arg1[%663, %c57] : memref<2x180xf32, #tpu.memory_space<smem>>
    %665 = vector.broadcast %664 : f32 to vector<16x16xf32>
    %666 = arith.mulf %657, %665 : vector<16x16xf32>
    %667 = arith.addf %645, %666 : vector<16x16xf32>
    %668 = arith.index_cast %arg0 : i32 to index
    %c93 = arith.constant 93 : index
    %669 = memref.load %arg1[%668, %c93] : memref<2x180xf32, #tpu.memory_space<smem>>
    %670 = vector.broadcast %669 : f32 to vector<16x16xf32>
    %671 = arith.mulf %657, %670 : vector<16x16xf32>
    %672 = arith.addf %650, %671 : vector<16x16xf32>
    %673 = arith.index_cast %arg0 : i32 to index
    %c129 = arith.constant 129 : index
    %674 = memref.load %arg1[%673, %c129] : memref<2x180xf32, #tpu.memory_space<smem>>
    %675 = vector.broadcast %674 : f32 to vector<16x16xf32>
    %676 = arith.mulf %657, %675 : vector<16x16xf32>
    %677 = arith.addf %655, %676 : vector<16x16xf32>
    %c0_90 = arith.constant 0 : index
    %c2_91 = arith.constant 2 : index
    %c1_92 = arith.constant 1 : index
    %c1_93 = arith.constant 1 : index
    %678 = vector.load %arg2[%c0_90, %c2_91, %c1_92, %c1_93] : memref<1x4x18x18xf32, #tpu.memory_space<vmem>>, vector<1x1x16x16xf32>
    %679 = vector.shape_cast %678 : vector<1x1x16x16xf32> to vector<16x16xf32>
    %680 = arith.index_cast %arg0 : i32 to index
    %c22 = arith.constant 22 : index
    %681 = memref.load %arg1[%680, %c22] : memref<2x180xf32, #tpu.memory_space<smem>>
    %682 = vector.broadcast %681 : f32 to vector<16x16xf32>
    %683 = arith.mulf %679, %682 : vector<16x16xf32>
    %684 = arith.addf %662, %683 : vector<16x16xf32>
    %685 = arith.index_cast %arg0 : i32 to index
    %c58 = arith.constant 58 : index
    %686 = memref.load %arg1[%685, %c58] : memref<2x180xf32, #tpu.memory_space<smem>>
    %687 = vector.broadcast %686 : f32 to vector<16x16xf32>
    %688 = arith.mulf %679, %687 : vector<16x16xf32>
    %689 = arith.addf %667, %688 : vector<16x16xf32>
    %690 = arith.index_cast %arg0 : i32 to index
    %c94 = arith.constant 94 : index
    %691 = memref.load %arg1[%690, %c94] : memref<2x180xf32, #tpu.memory_space<smem>>
    %692 = vector.broadcast %691 : f32 to vector<16x16xf32>
    %693 = arith.mulf %679, %692 : vector<16x16xf32>
    %694 = arith.addf %672, %693 : vector<16x16xf32>
    %695 = arith.index_cast %arg0 : i32 to index
    %c130 = arith.constant 130 : index
    %696 = memref.load %arg1[%695, %c130] : memref<2x180xf32, #tpu.memory_space<smem>>
    %697 = vector.broadcast %696 : f32 to vector<16x16xf32>
    %698 = arith.mulf %679, %697 : vector<16x16xf32>
    %699 = arith.addf %677, %698 : vector<16x16xf32>
    %c0_94 = arith.constant 0 : index
    %c2_95 = arith.constant 2 : index
    %c1_96 = arith.constant 1 : index
    %c2_97 = arith.constant 2 : index
    %700 = vector.load %arg2[%c0_94, %c2_95, %c1_96, %c2_97] : memref<1x4x18x18xf32, #tpu.memory_space<vmem>>, vector<1x1x16x16xf32>
    %701 = vector.shape_cast %700 : vector<1x1x16x16xf32> to vector<16x16xf32>
    %702 = arith.index_cast %arg0 : i32 to index
    %c23 = arith.constant 23 : index
    %703 = memref.load %arg1[%702, %c23] : memref<2x180xf32, #tpu.memory_space<smem>>
    %704 = vector.broadcast %703 : f32 to vector<16x16xf32>
    %705 = arith.mulf %701, %704 : vector<16x16xf32>
    %706 = arith.addf %684, %705 : vector<16x16xf32>
    %707 = arith.index_cast %arg0 : i32 to index
    %c59 = arith.constant 59 : index
    %708 = memref.load %arg1[%707, %c59] : memref<2x180xf32, #tpu.memory_space<smem>>
    %709 = vector.broadcast %708 : f32 to vector<16x16xf32>
    %710 = arith.mulf %701, %709 : vector<16x16xf32>
    %711 = arith.addf %689, %710 : vector<16x16xf32>
    %712 = arith.index_cast %arg0 : i32 to index
    %c95 = arith.constant 95 : index
    %713 = memref.load %arg1[%712, %c95] : memref<2x180xf32, #tpu.memory_space<smem>>
    %714 = vector.broadcast %713 : f32 to vector<16x16xf32>
    %715 = arith.mulf %701, %714 : vector<16x16xf32>
    %716 = arith.addf %694, %715 : vector<16x16xf32>
    %717 = arith.index_cast %arg0 : i32 to index
    %c131 = arith.constant 131 : index
    %718 = memref.load %arg1[%717, %c131] : memref<2x180xf32, #tpu.memory_space<smem>>
    %719 = vector.broadcast %718 : f32 to vector<16x16xf32>
    %720 = arith.mulf %701, %719 : vector<16x16xf32>
    %721 = arith.addf %699, %720 : vector<16x16xf32>
    %c0_98 = arith.constant 0 : index
    %c2_99 = arith.constant 2 : index
    %c2_100 = arith.constant 2 : index
    %c0_101 = arith.constant 0 : index
    %722 = vector.load %arg2[%c0_98, %c2_99, %c2_100, %c0_101] : memref<1x4x18x18xf32, #tpu.memory_space<vmem>>, vector<1x1x16x16xf32>
    %723 = vector.shape_cast %722 : vector<1x1x16x16xf32> to vector<16x16xf32>
    %724 = arith.index_cast %arg0 : i32 to index
    %c24 = arith.constant 24 : index
    %725 = memref.load %arg1[%724, %c24] : memref<2x180xf32, #tpu.memory_space<smem>>
    %726 = vector.broadcast %725 : f32 to vector<16x16xf32>
    %727 = arith.mulf %723, %726 : vector<16x16xf32>
    %728 = arith.addf %706, %727 : vector<16x16xf32>
    %729 = arith.index_cast %arg0 : i32 to index
    %c60 = arith.constant 60 : index
    %730 = memref.load %arg1[%729, %c60] : memref<2x180xf32, #tpu.memory_space<smem>>
    %731 = vector.broadcast %730 : f32 to vector<16x16xf32>
    %732 = arith.mulf %723, %731 : vector<16x16xf32>
    %733 = arith.addf %711, %732 : vector<16x16xf32>
    %734 = arith.index_cast %arg0 : i32 to index
    %c96 = arith.constant 96 : index
    %735 = memref.load %arg1[%734, %c96] : memref<2x180xf32, #tpu.memory_space<smem>>
    %736 = vector.broadcast %735 : f32 to vector<16x16xf32>
    %737 = arith.mulf %723, %736 : vector<16x16xf32>
    %738 = arith.addf %716, %737 : vector<16x16xf32>
    %739 = arith.index_cast %arg0 : i32 to index
    %c132 = arith.constant 132 : index
    %740 = memref.load %arg1[%739, %c132] : memref<2x180xf32, #tpu.memory_space<smem>>
    %741 = vector.broadcast %740 : f32 to vector<16x16xf32>
    %742 = arith.mulf %723, %741 : vector<16x16xf32>
    %743 = arith.addf %721, %742 : vector<16x16xf32>
    %c0_102 = arith.constant 0 : index
    %c2_103 = arith.constant 2 : index
    %c2_104 = arith.constant 2 : index
    %c1_105 = arith.constant 1 : index
    %744 = vector.load %arg2[%c0_102, %c2_103, %c2_104, %c1_105] : memref<1x4x18x18xf32, #tpu.memory_space<vmem>>, vector<1x1x16x16xf32>
    %745 = vector.shape_cast %744 : vector<1x1x16x16xf32> to vector<16x16xf32>
    %746 = arith.index_cast %arg0 : i32 to index
    %c25 = arith.constant 25 : index
    %747 = memref.load %arg1[%746, %c25] : memref<2x180xf32, #tpu.memory_space<smem>>
    %748 = vector.broadcast %747 : f32 to vector<16x16xf32>
    %749 = arith.mulf %745, %748 : vector<16x16xf32>
    %750 = arith.addf %728, %749 : vector<16x16xf32>
    %751 = arith.index_cast %arg0 : i32 to index
    %c61 = arith.constant 61 : index
    %752 = memref.load %arg1[%751, %c61] : memref<2x180xf32, #tpu.memory_space<smem>>
    %753 = vector.broadcast %752 : f32 to vector<16x16xf32>
    %754 = arith.mulf %745, %753 : vector<16x16xf32>
    %755 = arith.addf %733, %754 : vector<16x16xf32>
    %756 = arith.index_cast %arg0 : i32 to index
    %c97 = arith.constant 97 : index
    %757 = memref.load %arg1[%756, %c97] : memref<2x180xf32, #tpu.memory_space<smem>>
    %758 = vector.broadcast %757 : f32 to vector<16x16xf32>
    %759 = arith.mulf %745, %758 : vector<16x16xf32>
    %760 = arith.addf %738, %759 : vector<16x16xf32>
    %761 = arith.index_cast %arg0 : i32 to index
    %c133 = arith.constant 133 : index
    %762 = memref.load %arg1[%761, %c133] : memref<2x180xf32, #tpu.memory_space<smem>>
    %763 = vector.broadcast %762 : f32 to vector<16x16xf32>
    %764 = arith.mulf %745, %763 : vector<16x16xf32>
    %765 = arith.addf %743, %764 : vector<16x16xf32>
    %c0_106 = arith.constant 0 : index
    %c2_107 = arith.constant 2 : index
    %c2_108 = arith.constant 2 : index
    %c2_109 = arith.constant 2 : index
    %766 = vector.load %arg2[%c0_106, %c2_107, %c2_108, %c2_109] : memref<1x4x18x18xf32, #tpu.memory_space<vmem>>, vector<1x1x16x16xf32>
    %767 = vector.shape_cast %766 : vector<1x1x16x16xf32> to vector<16x16xf32>
    %768 = arith.index_cast %arg0 : i32 to index
    %c26 = arith.constant 26 : index
    %769 = memref.load %arg1[%768, %c26] : memref<2x180xf32, #tpu.memory_space<smem>>
    %770 = vector.broadcast %769 : f32 to vector<16x16xf32>
    %771 = arith.mulf %767, %770 : vector<16x16xf32>
    %772 = arith.addf %750, %771 : vector<16x16xf32>
    %773 = arith.index_cast %arg0 : i32 to index
    %c62 = arith.constant 62 : index
    %774 = memref.load %arg1[%773, %c62] : memref<2x180xf32, #tpu.memory_space<smem>>
    %775 = vector.broadcast %774 : f32 to vector<16x16xf32>
    %776 = arith.mulf %767, %775 : vector<16x16xf32>
    %777 = arith.addf %755, %776 : vector<16x16xf32>
    %778 = arith.index_cast %arg0 : i32 to index
    %c98 = arith.constant 98 : index
    %779 = memref.load %arg1[%778, %c98] : memref<2x180xf32, #tpu.memory_space<smem>>
    %780 = vector.broadcast %779 : f32 to vector<16x16xf32>
    %781 = arith.mulf %767, %780 : vector<16x16xf32>
    %782 = arith.addf %760, %781 : vector<16x16xf32>
    %783 = arith.index_cast %arg0 : i32 to index
    %c134 = arith.constant 134 : index
    %784 = memref.load %arg1[%783, %c134] : memref<2x180xf32, #tpu.memory_space<smem>>
    %785 = vector.broadcast %784 : f32 to vector<16x16xf32>
    %786 = arith.mulf %767, %785 : vector<16x16xf32>
    %787 = arith.addf %765, %786 : vector<16x16xf32>
    %c0_110 = arith.constant 0 : index
    %c3_111 = arith.constant 3 : index
    %c0_112 = arith.constant 0 : index
    %c0_113 = arith.constant 0 : index
    %788 = vector.load %arg2[%c0_110, %c3_111, %c0_112, %c0_113] : memref<1x4x18x18xf32, #tpu.memory_space<vmem>>, vector<1x1x16x16xf32>
    %789 = vector.shape_cast %788 : vector<1x1x16x16xf32> to vector<16x16xf32>
    %790 = arith.index_cast %arg0 : i32 to index
    %c27 = arith.constant 27 : index
    %791 = memref.load %arg1[%790, %c27] : memref<2x180xf32, #tpu.memory_space<smem>>
    %792 = vector.broadcast %791 : f32 to vector<16x16xf32>
    %793 = arith.mulf %789, %792 : vector<16x16xf32>
    %794 = arith.addf %772, %793 : vector<16x16xf32>
    %795 = arith.index_cast %arg0 : i32 to index
    %c63 = arith.constant 63 : index
    %796 = memref.load %arg1[%795, %c63] : memref<2x180xf32, #tpu.memory_space<smem>>
    %797 = vector.broadcast %796 : f32 to vector<16x16xf32>
    %798 = arith.mulf %789, %797 : vector<16x16xf32>
    %799 = arith.addf %777, %798 : vector<16x16xf32>
    %800 = arith.index_cast %arg0 : i32 to index
    %c99 = arith.constant 99 : index
    %801 = memref.load %arg1[%800, %c99] : memref<2x180xf32, #tpu.memory_space<smem>>
    %802 = vector.broadcast %801 : f32 to vector<16x16xf32>
    %803 = arith.mulf %789, %802 : vector<16x16xf32>
    %804 = arith.addf %782, %803 : vector<16x16xf32>
    %805 = arith.index_cast %arg0 : i32 to index
    %c135 = arith.constant 135 : index
    %806 = memref.load %arg1[%805, %c135] : memref<2x180xf32, #tpu.memory_space<smem>>
    %807 = vector.broadcast %806 : f32 to vector<16x16xf32>
    %808 = arith.mulf %789, %807 : vector<16x16xf32>
    %809 = arith.addf %787, %808 : vector<16x16xf32>
    %c0_114 = arith.constant 0 : index
    %c3_115 = arith.constant 3 : index
    %c0_116 = arith.constant 0 : index
    %c1_117 = arith.constant 1 : index
    %810 = vector.load %arg2[%c0_114, %c3_115, %c0_116, %c1_117] : memref<1x4x18x18xf32, #tpu.memory_space<vmem>>, vector<1x1x16x16xf32>
    %811 = vector.shape_cast %810 : vector<1x1x16x16xf32> to vector<16x16xf32>
    %812 = arith.index_cast %arg0 : i32 to index
    %c28 = arith.constant 28 : index
    %813 = memref.load %arg1[%812, %c28] : memref<2x180xf32, #tpu.memory_space<smem>>
    %814 = vector.broadcast %813 : f32 to vector<16x16xf32>
    %815 = arith.mulf %811, %814 : vector<16x16xf32>
    %816 = arith.addf %794, %815 : vector<16x16xf32>
    %817 = arith.index_cast %arg0 : i32 to index
    %c64 = arith.constant 64 : index
    %818 = memref.load %arg1[%817, %c64] : memref<2x180xf32, #tpu.memory_space<smem>>
    %819 = vector.broadcast %818 : f32 to vector<16x16xf32>
    %820 = arith.mulf %811, %819 : vector<16x16xf32>
    %821 = arith.addf %799, %820 : vector<16x16xf32>
    %822 = arith.index_cast %arg0 : i32 to index
    %c100 = arith.constant 100 : index
    %823 = memref.load %arg1[%822, %c100] : memref<2x180xf32, #tpu.memory_space<smem>>
    %824 = vector.broadcast %823 : f32 to vector<16x16xf32>
    %825 = arith.mulf %811, %824 : vector<16x16xf32>
    %826 = arith.addf %804, %825 : vector<16x16xf32>
    %827 = arith.index_cast %arg0 : i32 to index
    %c136 = arith.constant 136 : index
    %828 = memref.load %arg1[%827, %c136] : memref<2x180xf32, #tpu.memory_space<smem>>
    %829 = vector.broadcast %828 : f32 to vector<16x16xf32>
    %830 = arith.mulf %811, %829 : vector<16x16xf32>
    %831 = arith.addf %809, %830 : vector<16x16xf32>
    %c0_118 = arith.constant 0 : index
    %c3_119 = arith.constant 3 : index
    %c0_120 = arith.constant 0 : index
    %c2_121 = arith.constant 2 : index
    %832 = vector.load %arg2[%c0_118, %c3_119, %c0_120, %c2_121] : memref<1x4x18x18xf32, #tpu.memory_space<vmem>>, vector<1x1x16x16xf32>
    %833 = vector.shape_cast %832 : vector<1x1x16x16xf32> to vector<16x16xf32>
    %834 = arith.index_cast %arg0 : i32 to index
    %c29 = arith.constant 29 : index
    %835 = memref.load %arg1[%834, %c29] : memref<2x180xf32, #tpu.memory_space<smem>>
    %836 = vector.broadcast %835 : f32 to vector<16x16xf32>
    %837 = arith.mulf %833, %836 : vector<16x16xf32>
    %838 = arith.addf %816, %837 : vector<16x16xf32>
    %839 = arith.index_cast %arg0 : i32 to index
    %c65 = arith.constant 65 : index
    %840 = memref.load %arg1[%839, %c65] : memref<2x180xf32, #tpu.memory_space<smem>>
    %841 = vector.broadcast %840 : f32 to vector<16x16xf32>
    %842 = arith.mulf %833, %841 : vector<16x16xf32>
    %843 = arith.addf %821, %842 : vector<16x16xf32>
    %844 = arith.index_cast %arg0 : i32 to index
    %c101 = arith.constant 101 : index
    %845 = memref.load %arg1[%844, %c101] : memref<2x180xf32, #tpu.memory_space<smem>>
    %846 = vector.broadcast %845 : f32 to vector<16x16xf32>
    %847 = arith.mulf %833, %846 : vector<16x16xf32>
    %848 = arith.addf %826, %847 : vector<16x16xf32>
    %849 = arith.index_cast %arg0 : i32 to index
    %c137 = arith.constant 137 : index
    %850 = memref.load %arg1[%849, %c137] : memref<2x180xf32, #tpu.memory_space<smem>>
    %851 = vector.broadcast %850 : f32 to vector<16x16xf32>
    %852 = arith.mulf %833, %851 : vector<16x16xf32>
    %853 = arith.addf %831, %852 : vector<16x16xf32>
    %c0_122 = arith.constant 0 : index
    %c3_123 = arith.constant 3 : index
    %c1_124 = arith.constant 1 : index
    %c0_125 = arith.constant 0 : index
    %854 = vector.load %arg2[%c0_122, %c3_123, %c1_124, %c0_125] : memref<1x4x18x18xf32, #tpu.memory_space<vmem>>, vector<1x1x16x16xf32>
    %855 = vector.shape_cast %854 : vector<1x1x16x16xf32> to vector<16x16xf32>
    %856 = arith.index_cast %arg0 : i32 to index
    %c30 = arith.constant 30 : index
    %857 = memref.load %arg1[%856, %c30] : memref<2x180xf32, #tpu.memory_space<smem>>
    %858 = vector.broadcast %857 : f32 to vector<16x16xf32>
    %859 = arith.mulf %855, %858 : vector<16x16xf32>
    %860 = arith.addf %838, %859 : vector<16x16xf32>
    %861 = arith.index_cast %arg0 : i32 to index
    %c66 = arith.constant 66 : index
    %862 = memref.load %arg1[%861, %c66] : memref<2x180xf32, #tpu.memory_space<smem>>
    %863 = vector.broadcast %862 : f32 to vector<16x16xf32>
    %864 = arith.mulf %855, %863 : vector<16x16xf32>
    %865 = arith.addf %843, %864 : vector<16x16xf32>
    %866 = arith.index_cast %arg0 : i32 to index
    %c102 = arith.constant 102 : index
    %867 = memref.load %arg1[%866, %c102] : memref<2x180xf32, #tpu.memory_space<smem>>
    %868 = vector.broadcast %867 : f32 to vector<16x16xf32>
    %869 = arith.mulf %855, %868 : vector<16x16xf32>
    %870 = arith.addf %848, %869 : vector<16x16xf32>
    %871 = arith.index_cast %arg0 : i32 to index
    %c138 = arith.constant 138 : index
    %872 = memref.load %arg1[%871, %c138] : memref<2x180xf32, #tpu.memory_space<smem>>
    %873 = vector.broadcast %872 : f32 to vector<16x16xf32>
    %874 = arith.mulf %855, %873 : vector<16x16xf32>
    %875 = arith.addf %853, %874 : vector<16x16xf32>
    %c0_126 = arith.constant 0 : index
    %c3_127 = arith.constant 3 : index
    %c1_128 = arith.constant 1 : index
    %c1_129 = arith.constant 1 : index
    %876 = vector.load %arg2[%c0_126, %c3_127, %c1_128, %c1_129] : memref<1x4x18x18xf32, #tpu.memory_space<vmem>>, vector<1x1x16x16xf32>
    %877 = vector.shape_cast %876 : vector<1x1x16x16xf32> to vector<16x16xf32>
    %878 = arith.index_cast %arg0 : i32 to index
    %c31 = arith.constant 31 : index
    %879 = memref.load %arg1[%878, %c31] : memref<2x180xf32, #tpu.memory_space<smem>>
    %880 = vector.broadcast %879 : f32 to vector<16x16xf32>
    %881 = arith.mulf %877, %880 : vector<16x16xf32>
    %882 = arith.addf %860, %881 : vector<16x16xf32>
    %883 = arith.index_cast %arg0 : i32 to index
    %c67 = arith.constant 67 : index
    %884 = memref.load %arg1[%883, %c67] : memref<2x180xf32, #tpu.memory_space<smem>>
    %885 = vector.broadcast %884 : f32 to vector<16x16xf32>
    %886 = arith.mulf %877, %885 : vector<16x16xf32>
    %887 = arith.addf %865, %886 : vector<16x16xf32>
    %888 = arith.index_cast %arg0 : i32 to index
    %c103 = arith.constant 103 : index
    %889 = memref.load %arg1[%888, %c103] : memref<2x180xf32, #tpu.memory_space<smem>>
    %890 = vector.broadcast %889 : f32 to vector<16x16xf32>
    %891 = arith.mulf %877, %890 : vector<16x16xf32>
    %892 = arith.addf %870, %891 : vector<16x16xf32>
    %893 = arith.index_cast %arg0 : i32 to index
    %c139 = arith.constant 139 : index
    %894 = memref.load %arg1[%893, %c139] : memref<2x180xf32, #tpu.memory_space<smem>>
    %895 = vector.broadcast %894 : f32 to vector<16x16xf32>
    %896 = arith.mulf %877, %895 : vector<16x16xf32>
    %897 = arith.addf %875, %896 : vector<16x16xf32>
    %c0_130 = arith.constant 0 : index
    %c3_131 = arith.constant 3 : index
    %c1_132 = arith.constant 1 : index
    %c2_133 = arith.constant 2 : index
    %898 = vector.load %arg2[%c0_130, %c3_131, %c1_132, %c2_133] : memref<1x4x18x18xf32, #tpu.memory_space<vmem>>, vector<1x1x16x16xf32>
    %899 = vector.shape_cast %898 : vector<1x1x16x16xf32> to vector<16x16xf32>
    %900 = arith.index_cast %arg0 : i32 to index
    %c32 = arith.constant 32 : index
    %901 = memref.load %arg1[%900, %c32] : memref<2x180xf32, #tpu.memory_space<smem>>
    %902 = vector.broadcast %901 : f32 to vector<16x16xf32>
    %903 = arith.mulf %899, %902 : vector<16x16xf32>
    %904 = arith.addf %882, %903 : vector<16x16xf32>
    %905 = arith.index_cast %arg0 : i32 to index
    %c68 = arith.constant 68 : index
    %906 = memref.load %arg1[%905, %c68] : memref<2x180xf32, #tpu.memory_space<smem>>
    %907 = vector.broadcast %906 : f32 to vector<16x16xf32>
    %908 = arith.mulf %899, %907 : vector<16x16xf32>
    %909 = arith.addf %887, %908 : vector<16x16xf32>
    %910 = arith.index_cast %arg0 : i32 to index
    %c104 = arith.constant 104 : index
    %911 = memref.load %arg1[%910, %c104] : memref<2x180xf32, #tpu.memory_space<smem>>
    %912 = vector.broadcast %911 : f32 to vector<16x16xf32>
    %913 = arith.mulf %899, %912 : vector<16x16xf32>
    %914 = arith.addf %892, %913 : vector<16x16xf32>
    %915 = arith.index_cast %arg0 : i32 to index
    %c140 = arith.constant 140 : index
    %916 = memref.load %arg1[%915, %c140] : memref<2x180xf32, #tpu.memory_space<smem>>
    %917 = vector.broadcast %916 : f32 to vector<16x16xf32>
    %918 = arith.mulf %899, %917 : vector<16x16xf32>
    %919 = arith.addf %897, %918 : vector<16x16xf32>
    %c0_134 = arith.constant 0 : index
    %c3_135 = arith.constant 3 : index
    %c2_136 = arith.constant 2 : index
    %c0_137 = arith.constant 0 : index
    %920 = vector.load %arg2[%c0_134, %c3_135, %c2_136, %c0_137] : memref<1x4x18x18xf32, #tpu.memory_space<vmem>>, vector<1x1x16x16xf32>
    %921 = vector.shape_cast %920 : vector<1x1x16x16xf32> to vector<16x16xf32>
    %922 = arith.index_cast %arg0 : i32 to index
    %c33 = arith.constant 33 : index
    %923 = memref.load %arg1[%922, %c33] : memref<2x180xf32, #tpu.memory_space<smem>>
    %924 = vector.broadcast %923 : f32 to vector<16x16xf32>
    %925 = arith.mulf %921, %924 : vector<16x16xf32>
    %926 = arith.addf %904, %925 : vector<16x16xf32>
    %927 = arith.index_cast %arg0 : i32 to index
    %c69 = arith.constant 69 : index
    %928 = memref.load %arg1[%927, %c69] : memref<2x180xf32, #tpu.memory_space<smem>>
    %929 = vector.broadcast %928 : f32 to vector<16x16xf32>
    %930 = arith.mulf %921, %929 : vector<16x16xf32>
    %931 = arith.addf %909, %930 : vector<16x16xf32>
    %932 = arith.index_cast %arg0 : i32 to index
    %c105 = arith.constant 105 : index
    %933 = memref.load %arg1[%932, %c105] : memref<2x180xf32, #tpu.memory_space<smem>>
    %934 = vector.broadcast %933 : f32 to vector<16x16xf32>
    %935 = arith.mulf %921, %934 : vector<16x16xf32>
    %936 = arith.addf %914, %935 : vector<16x16xf32>
    %937 = arith.index_cast %arg0 : i32 to index
    %c141 = arith.constant 141 : index
    %938 = memref.load %arg1[%937, %c141] : memref<2x180xf32, #tpu.memory_space<smem>>
    %939 = vector.broadcast %938 : f32 to vector<16x16xf32>
    %940 = arith.mulf %921, %939 : vector<16x16xf32>
    %941 = arith.addf %919, %940 : vector<16x16xf32>
    %c0_138 = arith.constant 0 : index
    %c3_139 = arith.constant 3 : index
    %c2_140 = arith.constant 2 : index
    %c1_141 = arith.constant 1 : index
    %942 = vector.load %arg2[%c0_138, %c3_139, %c2_140, %c1_141] : memref<1x4x18x18xf32, #tpu.memory_space<vmem>>, vector<1x1x16x16xf32>
    %943 = vector.shape_cast %942 : vector<1x1x16x16xf32> to vector<16x16xf32>
    %944 = arith.index_cast %arg0 : i32 to index
    %c34 = arith.constant 34 : index
    %945 = memref.load %arg1[%944, %c34] : memref<2x180xf32, #tpu.memory_space<smem>>
    %946 = vector.broadcast %945 : f32 to vector<16x16xf32>
    %947 = arith.mulf %943, %946 : vector<16x16xf32>
    %948 = arith.addf %926, %947 : vector<16x16xf32>
    %949 = arith.index_cast %arg0 : i32 to index
    %c70 = arith.constant 70 : index
    %950 = memref.load %arg1[%949, %c70] : memref<2x180xf32, #tpu.memory_space<smem>>
    %951 = vector.broadcast %950 : f32 to vector<16x16xf32>
    %952 = arith.mulf %943, %951 : vector<16x16xf32>
    %953 = arith.addf %931, %952 : vector<16x16xf32>
    %954 = arith.index_cast %arg0 : i32 to index
    %c106 = arith.constant 106 : index
    %955 = memref.load %arg1[%954, %c106] : memref<2x180xf32, #tpu.memory_space<smem>>
    %956 = vector.broadcast %955 : f32 to vector<16x16xf32>
    %957 = arith.mulf %943, %956 : vector<16x16xf32>
    %958 = arith.addf %936, %957 : vector<16x16xf32>
    %959 = arith.index_cast %arg0 : i32 to index
    %c142 = arith.constant 142 : index
    %960 = memref.load %arg1[%959, %c142] : memref<2x180xf32, #tpu.memory_space<smem>>
    %961 = vector.broadcast %960 : f32 to vector<16x16xf32>
    %962 = arith.mulf %943, %961 : vector<16x16xf32>
    %963 = arith.addf %941, %962 : vector<16x16xf32>
    %c0_142 = arith.constant 0 : index
    %c3_143 = arith.constant 3 : index
    %c2_144 = arith.constant 2 : index
    %c2_145 = arith.constant 2 : index
    %964 = vector.load %arg2[%c0_142, %c3_143, %c2_144, %c2_145] : memref<1x4x18x18xf32, #tpu.memory_space<vmem>>, vector<1x1x16x16xf32>
    %965 = vector.shape_cast %964 : vector<1x1x16x16xf32> to vector<16x16xf32>
    %966 = arith.index_cast %arg0 : i32 to index
    %c35 = arith.constant 35 : index
    %967 = memref.load %arg1[%966, %c35] : memref<2x180xf32, #tpu.memory_space<smem>>
    %968 = vector.broadcast %967 : f32 to vector<16x16xf32>
    %969 = arith.mulf %965, %968 : vector<16x16xf32>
    %970 = arith.addf %948, %969 : vector<16x16xf32>
    %971 = arith.index_cast %arg0 : i32 to index
    %c71 = arith.constant 71 : index
    %972 = memref.load %arg1[%971, %c71] : memref<2x180xf32, #tpu.memory_space<smem>>
    %973 = vector.broadcast %972 : f32 to vector<16x16xf32>
    %974 = arith.mulf %965, %973 : vector<16x16xf32>
    %975 = arith.addf %953, %974 : vector<16x16xf32>
    %976 = arith.index_cast %arg0 : i32 to index
    %c107 = arith.constant 107 : index
    %977 = memref.load %arg1[%976, %c107] : memref<2x180xf32, #tpu.memory_space<smem>>
    %978 = vector.broadcast %977 : f32 to vector<16x16xf32>
    %979 = arith.mulf %965, %978 : vector<16x16xf32>
    %980 = arith.addf %958, %979 : vector<16x16xf32>
    %981 = arith.index_cast %arg0 : i32 to index
    %c143 = arith.constant 143 : index
    %982 = memref.load %arg1[%981, %c143] : memref<2x180xf32, #tpu.memory_space<smem>>
    %983 = vector.broadcast %982 : f32 to vector<16x16xf32>
    %984 = arith.mulf %965, %983 : vector<16x16xf32>
    %985 = arith.addf %963, %984 : vector<16x16xf32>
    %986 = arith.negf %970 : vector<16x16xf32>
    %987 = math.exp %986 : vector<16x16xf32>
    %cst = arith.constant 1.000000e+00 : f32
    %988 = vector.broadcast %cst : f32 to vector<16x16xf32>
    %989 = arith.addf %988, %987 : vector<16x16xf32>
    %990 = arith.divf %988, %989 : vector<16x16xf32>
    %c0_146 = arith.constant 0 : index
    %c0_147 = arith.constant 0 : index
    %c0_148 = arith.constant 0 : index
    %c0_149 = arith.constant 0 : index
    %991 = vector.load %arg3[%c0_146, %c0_147, %c0_148, %c0_149] : memref<1x4x16x16xf32, #tpu.memory_space<vmem>>, vector<1x1x16x16xf32>
    %992 = vector.shape_cast %991 : vector<1x1x16x16xf32> to vector<16x16xf32>
    %993 = vector.shape_cast %990 : vector<16x16xf32> to vector<1x1x16x16xf32>
    tpu.vector_store %arg3[%c0_146, %c0_147, %c0_148, %c0_149], %993 {strides = array<i32>} : memref<1x4x16x16xf32, #tpu.memory_space<vmem>>, vector<1x1x16x16xf32>,
    %994 = arith.negf %975 : vector<16x16xf32>
    %995 = math.exp %994 : vector<16x16xf32>
    %cst_150 = arith.constant 1.000000e+00 : f32
    %996 = vector.broadcast %cst_150 : f32 to vector<16x16xf32>
    %997 = arith.addf %996, %995 : vector<16x16xf32>
    %998 = arith.divf %996, %997 : vector<16x16xf32>
    %c0_151 = arith.constant 0 : index
    %c1_152 = arith.constant 1 : index
    %c0_153 = arith.constant 0 : index
    %c0_154 = arith.constant 0 : index
    %999 = vector.load %arg3[%c0_151, %c1_152, %c0_153, %c0_154] : memref<1x4x16x16xf32, #tpu.memory_space<vmem>>, vector<1x1x16x16xf32>
    %1000 = vector.shape_cast %999 : vector<1x1x16x16xf32> to vector<16x16xf32>
    %1001 = vector.shape_cast %998 : vector<16x16xf32> to vector<1x1x16x16xf32>
    tpu.vector_store %arg3[%c0_151, %c1_152, %c0_153, %c0_154], %1001 {strides = array<i32>} : memref<1x4x16x16xf32, #tpu.memory_space<vmem>>, vector<1x1x16x16xf32>,
    %1002 = arith.negf %980 : vector<16x16xf32>
    %1003 = math.exp %1002 : vector<16x16xf32>
    %cst_155 = arith.constant 1.000000e+00 : f32
    %1004 = vector.broadcast %cst_155 : f32 to vector<16x16xf32>
    %1005 = arith.addf %1004, %1003 : vector<16x16xf32>
    %1006 = arith.divf %1004, %1005 : vector<16x16xf32>
    %c0_156 = arith.constant 0 : index
    %c2_157 = arith.constant 2 : index
    %c0_158 = arith.constant 0 : index
    %c0_159 = arith.constant 0 : index
    %1007 = vector.load %arg3[%c0_156, %c2_157, %c0_158, %c0_159] : memref<1x4x16x16xf32, #tpu.memory_space<vmem>>, vector<1x1x16x16xf32>
    %1008 = vector.shape_cast %1007 : vector<1x1x16x16xf32> to vector<16x16xf32>
    %1009 = vector.shape_cast %1006 : vector<16x16xf32> to vector<1x1x16x16xf32>
    tpu.vector_store %arg3[%c0_156, %c2_157, %c0_158, %c0_159], %1009 {strides = array<i32>} : memref<1x4x16x16xf32, #tpu.memory_space<vmem>>, vector<1x1x16x16xf32>,
    %1010 = arith.negf %985 : vector<16x16xf32>
    %1011 = math.exp %1010 : vector<16x16xf32>
    %cst_160 = arith.constant 1.000000e+00 : f32
    %1012 = vector.broadcast %cst_160 : f32 to vector<16x16xf32>
    %1013 = arith.addf %1012, %1011 : vector<16x16xf32>
    %1014 = arith.divf %1012, %1013 : vector<16x16xf32>
    %c0_161 = arith.constant 0 : index
    %c3_162 = arith.constant 3 : index
    %c0_163 = arith.constant 0 : index
    %c0_164 = arith.constant 0 : index
    %1015 = vector.load %arg3[%c0_161, %c3_162, %c0_163, %c0_164] : memref<1x4x16x16xf32, #tpu.memory_space<vmem>>, vector<1x1x16x16xf32>
    %1016 = vector.shape_cast %1015 : vector<1x1x16x16xf32> to vector<16x16xf32>
    %1017 = vector.shape_cast %1014 : vector<16x16xf32> to vector<1x1x16x16xf32>
    tpu.vector_store %arg3[%c0_161, %c3_162, %c0_163, %c0_164], %1017 {strides = array<i32>} : memref<1x4x16x16xf32, #tpu.memory_space<vmem>>, vector<1x1x16x16xf32>,
    return
  }
  func.func @transform_0(%arg0: i32, %arg1: memref<2x180xf32, #tpu.memory_space<smem>>) -> (i32, i32, i32, i32) {
    %c0_i32 = arith.constant 0 : i32
    %c0_i32_0 = arith.constant 0 : i32
    %c0_i32_1 = arith.constant 0 : i32
    %c0_i32_2 = arith.constant 0 : i32
    return %arg0, %c0_i32, %c0_i32_0, %c0_i32_1 : i32, i32, i32, i32
  }
  func.func @transform_1(%arg0: i32, %arg1: memref<2x180xf32, #tpu.memory_space<smem>>) -> (i32, i32, i32, i32) {
    %c0_i32 = arith.constant 0 : i32
    %c0_i32_0 = arith.constant 0 : i32
    %c0_i32_1 = arith.constant 0 : i32
    %c0_i32_2 = arith.constant 0 : i32
    return %arg0, %c0_i32, %c0_i32_0, %c0_i32_1 : i32, i32, i32, i32
  }
}

</mosaic_0001>

<bundles_post_ra>
// kernel: mda_forward.1
= control target key start
LH: loop header
LB: loop body
LE: loop exit
PB: predicated region body
PF: predicated region fallthrough
CT: control target
= control target key end

     0   :  { %s4633_s0 = inlined_call_operand.vmem [shape: f32[2,180], index: 0, kind: input, shape index: {}]   ;;  %s4634_s1 = inlined_call_operand.vmem [shape: f32[2,4,18,18], index: 1, kind: input, shape index: {}]   ;;  %s4635_s2 = inlined_call_operand.vmem [shape: f32[2,4,16,16], index: 2, kind: output, shape index: {}]  }
   0x1   :  { %s7_s11 = sshll.u32 %s4633_s0, 4  ;;  %s8_s11 = int_to_ptr.vmem [resolvable:$true] %s7_s11 }
   0x2   :  { %s2553_s12 = scalar_lea.vmem %s8_s11, 64  ;;  %p2558_p1 = scmp.lt.s32.totalorder %s8_s11, %s8_s11 }
   0x3   :  { %p2554_p0 = scmp.ne.s32.totalorder %s8_s11, %s2553_s12  ;;  %p2559_p2 = scmp.lt.s32.totalorder %s2553_s12, %s2553_s12 }
   0x5   :  { %p2560_p3 = por %p2559_p2, %p2558_p1 }
   0x7   :  { %p2561_p4 = pnand %p2560_p3, %p2554_p0 }
   0x9   :  { %2564 = shalt.err (!%p2561_p4)  }
   0xa   :  { %s2575_s13 = smov [#allocation3]  }
   0xb   :  { %10 = dma.vmem_to_smem %s8_s11, 64, %s2575_s13, [#allocation2] }
   0xc   :  { %2569 = dma.done.wait [#allocation2], 64 }
   0xd   :  { %2570 = vsyncadd [#allocation2], 4294967232 }
   0xe   :  { %12 = sfence }
   0xf   :  { %s2597_s14 = smov 0  }
  0x10 LB: > { %s2437_s0 = sadd.s32 4294967295, %s2573_s14   ;;  %p2441_p5 = scmp.ge.s32.totalorder %s2573_s14, 1  ;;  %s2573_s14 = sphi %s2597_s14, %s18_s14  }
  0x11   : > { %p94_p6 = scmp.lt.s32.totalorder %s2573_s14, 3 }
  0x13   : > { %p95_p7 = pnand %p2441_p5, %p94_p6 }
  0x15   : > { %98 = sbr.rel (%p95_p7) target bundleno = 569 (0x239), region = 24 }
  0x1c   : > { %p114_p8 = scmp.lt.s32.totalorder %s2437_s0, 1  ;;  %s155_s15 = sshra.s32 %s2437_s0, 1  ;;  %v124_v25 = vlaneseq  ;;  %v2578_v38 = vmov 0.0   ;;  %vm2334_vm4 = vcmask 130048  }
  0x1d   : > { %s161_s16 = sand.u32 1, %s2437_s0  ;;  %s2609_s18 = sshll.u32 %s155_s15, 9 }
  0x1e   : > { %s4726_s0 = smov (!%p114_p8, %s2437_s0), 1  ;;  %s2607_s17 = sshll.u32 %s161_s16, 7  ;;  %v2718_v33 = vshrl.u32 %v124_v25, 7 }
  0x1f   : > { %s315_s19 = sadd.s32 37, %s2607_s17  ;;  %s2492_s20 = smul.u32 96, %s4726_s0 }
  0x20   : > { %s476_s21 = sadd.s32 %s2609_s18, %s315_s19  ;;  %s4638_s22 = sadd.s32 1, %s2607_s17  ;;  %vm129_vm0 = vcmp.eq.s32.totalorder %v2718_v33, 0 }
  0x21   : > { %s477_s23 = sld [smem:[#allocation3 + %s476_s21]]  ;;  %s461_s24 = sadd.s32 %s2609_s18, %s4638_s22  ;;  %v2742_v39 = vsel %vm129_vm0, 1.0, %v2578_v38 }
  0x22   : > { %s2623_s27 = scalar_lea.vmem %s4634_s1, %s2492_s20  ;;  %s462_s28 = sld [smem:[#allocation3 + %s461_s24]] }
  0x23   : > { %s491_s29 = sadd.s32 73, %s2607_s17  ;;  %s507_s3 = sadd.s32 109, %s2607_s17  ;;  %v2629_v0 = vld [vmem:[%s2623_s27] sm:$0xff]  ;;  %v2634_v1 = vld [vmem:[%s2623_s27 + $0x8] sm:$0xff] }
  0x24   : > { %s492_s30 = sadd.s32 %s2609_s18, %s491_s29  ;;  %s508_s5 = sadd.s32 %s2609_s18, %s507_s3  ;;  %v2696_v27 = vld [vmem:[%s2623_s27 + $0x9] sm:$0xff]  ;;  %v2701_v29 = vld [vmem:[%s2623_s27 + $0x1] sm:$0xff] }
  0x25   : > { %s493_s4 = sld [smem:[#allocation3 + %s492_s30]]  ;;  %s4641_s6 = sadd.s32 2, %s2607_s17  ;;  %v2817_v62 = vld [vmem:[%s2623_s27 + $0xa] sm:$0xff] }
  0x26   : > { %s509_s7 = sld [smem:[#allocation3 + %s508_s5]]  ;;  %s524_s8 = sadd.s32 %s2609_s18, %s4641_s6 }
  0x27   : > { %v478_v2 = vstv %s477_s23  ;;  %s322_s9 = sadd.s32 38, %s2607_s17  ;;  %s4647_s10 = smov 127  }
  0x28   : > { %v479_v3 = vmul.f32 %v478_v2, %v2629_v0  ;;  %v463_v4 = vstv %s462_s28  ;;  %v480_v6 = vmul.f32 %v478_v2, %v2634_v1  ;;  %s525_s11 = sld [smem:[#allocation3 + %s524_s8]]  ;;  %s539_s12 = sadd.s32 %s2609_s18, %s322_s9  ;;  %v2826_v2 = vld [vmem:[%s2623_s27 + $0x2] sm:$0xff] }
  0x29   : > { %v464_v5 = vmul.f32 %v463_v4, %v2629_v0  ;;  %v465_v7 = vmul.f32 %v463_v4, %v2634_v1  ;;  %s554_s13 = sadd.s32 74, %s2607_s17  ;;  %s540_s15 = sld [smem:[#allocation3 + %s539_s12]] }
  0x2a   : > { %483 = vrot.lane.b32.xlu1 %v479_v3, %s4647_s10  ;;  %s555_s16 = sadd.s32 %s2609_s18, %s554_s13  ;;  %s570_s20 = sadd.s32 110, %s2607_s17 }
  0x2b   : > { %468 = vrot.lane.b32.xlu0 %v464_v5, %s4647_s10  ;;  %v494_v8 = vstv %s493_s4  ;;  %s556_s21 = sld [smem:[#allocation3 + %s555_s16]]  ;;  %s571_s23 = sadd.s32 %s2609_s18, %s570_s20 }
  0x2c   : > { %v496_v9 = vmul.f32 %v494_v8, %v2634_v1  ;;  %v495_v10 = vmul.f32 %v494_v8, %v2629_v0  ;;  %v510_v11 = vstv %s509_s7  ;;  %s4637_s24 = sadd.s32 4, %s2607_s17  ;;  %s572_s25 = sld [smem:[#allocation3 + %s571_s23]] }
  0x2d   : > { %v512_v12 = vmul.f32 %v510_v11, %v2634_v1  ;;  %v511_v13 = vmul.f32 %v510_v11, %v2629_v0  ;;  %s620_s26 = sadd.s32 %s2609_s18, %s4637_s24  ;;  %s337_s28 = sadd.s32 40, %s2607_s17 }
  0x2e   : > { %485 = vrot.lane.b32.xlu1 %v480_v6, %s4647_s10  ;;  %v526_v14 = vstv %s525_s11  ;;  %s2577_s29 = smov 126   ;;  %s621_s30 = sld [smem:[#allocation3 + %s620_s26]] }
  0x2f   : > { %470 = vrot.lane.b32.xlu0 %v465_v7, %s4647_s10  ;;  %v528_v15 = vmul.f32 %v526_v14, %v2634_v1  ;;  %v527_v16 = vmul.f32 %v526_v14, %v2629_v0  ;;  %v541_v17 = vstv %s540_s15  ;;  %s635_s3 = sadd.s32 %s2609_s18, %s337_s28  ;;  %s650_s4 = sadd.s32 76, %s2607_s17 }
  0x30   : > { %v543_v18 = vmul.f32 %v541_v17, %v2634_v1  ;;  %v542_v19 = vmul.f32 %v541_v17, %v2629_v0  ;;  %s2682_s5 = sld [smem:[#allocation3 + %s635_s3]]  ;;  %s651_s7 = sadd.s32 %s2609_s18, %s650_s4 }
  0x31   : > { %v557_v20 = vstv %s556_s21  ;;  %s666_s8 = sadd.s32 112, %s2607_s17  ;;  %s2687_s11 = sadd.s32 256, %s2609_s18 }
  0x32   : > { %501 = vrot.lane.b32.xlu1 %v496_v9, %s4647_s10  ;;  %v559_v21 = vmul.f32 %v557_v20, %v2634_v1  ;;  %v558_v22 = vmul.f32 %v557_v20, %v2629_v0  ;;  %v573_v23 = vstv %s572_s25  ;;  %s2691_s12 = sld [smem:[#allocation3 + %s651_s7]]  ;;  %s667_s13 = sadd.s32 %s2609_s18, %s666_s8 }
  0x33   : > { %499 = vrot.lane.b32.xlu0 %v495_v10, %s4647_s10  ;;  %v575_v24 = vmul.f32 %v573_v23, %v2634_v1  ;;  %v574_v26 = vmul.f32 %v573_v23, %v2629_v0  ;;  %s361_s15 = sadd.s32 43, %s2607_s17  ;;  %s4640_s20 = sadd.s32 5, %s2607_s17  ;;  %v126_v23 = vadd.s32 8, %v2718_v33 }
  0x34   : > { %v622_v28 = vstv %s621_s30  ;;  %s362_s16 = sadd.s32 %s2687_s11, %s361_s15  ;;  %s2709_s21 = sld [smem:[#allocation3 + %s667_s13]] }
  0x35   : > { %v624_v30 = vmul.f32 %v622_v28, %v2696_v27  ;;  %v623_v31 = vmul.f32 %v622_v28, %v2701_v29  ;;  %s2714_s23 = sld [smem:[#allocation3 + %s362_s16]]  ;;  %s364_s25 = sadd.s32 44, %s2607_s17  ;;  %vm136_vm3 = vcmp.eq.s32.totalorder %v126_v23, 15 }
  0x36   : > { %517 = vrot.lane.b32.xlu1 %v512_v12, %s4647_s10  ;;  %v637_v32 = vstv %s2682_s5  ;;  %s683_s26 = sadd.s32 %s2609_s18, %s4640_s20  ;;  %s365_s30 = sadd.s32 %s2687_s11, %s364_s25 }
  0x37   : > { %515 = vrot.lane.b32.xlu0 %v511_v13, %s4647_s10  ;;  %s345_s3 = sadd.s32 41, %s2607_s17  ;;  %s366_s4 = sld [smem:[#allocation3 + %s365_s30]]  ;;  %v639_v34 = vmul.f32 %v637_v32, %v2696_v27  ;;  %v638_v35 = vmul.f32 %v637_v32, %v2701_v29 }
  0x38   : > { %v653_v36 = vstv %s2691_s12  ;;  %s2732_s5 = sld [smem:[#allocation3 + %s683_s26]]  ;;  %s698_s7 = sadd.s32 %s2609_s18, %s345_s3 }
  0x39   : > { %s713_s8 = sadd.s32 77, %s2607_s17  ;;  %v655_v37 = vmul.f32 %v653_v36, %v2696_v27  ;;  %v654_v40 = vmul.f32 %v653_v36, %v2701_v29  ;;  %s699_s12 = sld [smem:[#allocation3 + %s698_s7]] }
  0x3a   : > { %533 = vrot.lane.b32.xlu1 %v528_v15, %s2577_s29  ;;  %v669_v41 = vstv %s2709_s21  ;;  %s714_s13 = sadd.s32 %s2609_s18, %s713_s8  ;;  %s729_s16 = sadd.s32 113, %s2607_s17 }
  0x3b   : > { %531 = vrot.lane.b32.xlu0 %v527_v16, %s2577_s29  ;;  %v370_v42 = vstv %s2714_s23  ;;  %v671_v46 = vmul.f32 %v669_v41, %v2696_v27  ;;  %v670_v49 = vmul.f32 %v669_v41, %v2701_v29  ;;  %s715_s21 = sld [smem:[#allocation3 + %s714_s13]]  ;;  %s730_s23 = sadd.s32 %s2609_s18, %s729_s16 }
  0x3c   : > { %s4636_s26 = sadd.s32 7, %s2607_s17  ;;  %s2766_s30 = sld [smem:[#allocation3 + %s730_s23]] }
  0x3d   : > { %v367_v43 = vstv %s366_s4  ;;  %s779_s4 = sadd.s32 %s2609_s18, %s4636_s26  ;;  %s794_s8 = sadd.s32 %s2609_s18, %s361_s15 }
  0x3e   : > { %548 = vrot.lane.b32.xlu1 %v543_v18, %s2577_s29  ;;  %v369_v44 = vmul.f32 0.0, %v367_v43  ;;  %v368_v45 = vmul.f32 %v2742_v39, %v367_v43  ;;  %v685_v50 = vstv %s2732_s5  ;;  %s316_s5 = sadd.s32 %s2687_s11, %s315_s19  ;;  %s2778_s7 = sld [smem:[#allocation3 + %s779_s4]] }
  0x3f   : > { %546 = vrot.lane.b32.xlu0 %v542_v19, %s2577_s29  ;;  %v687_v51 = vmul.f32 %v685_v50, %v2696_v27  ;;  %v686_v52 = vmul.f32 %v685_v50, %v2701_v29  ;;  %v700_v53 = vstv %s699_s12  ;;  %s809_s12 = sadd.s32 79, %s2607_s17  ;;  %s2784_s19 = sld [smem:[#allocation3 + %s316_s5]] }
  0x40   : > { %v2753_v47 = vsub.f32 %v370_v42, %v369_v44  ;;  %v2755_v48 = vsub.f32 %v370_v42, %v368_v45  ;;  %v702_v54 = vmul.f32 %v700_v53, %v2696_v27  ;;  %v701_v55 = vmul.f32 %v700_v53, %v2701_v29  ;;  %s825_s13 = sadd.s32 115, %s2607_s17  ;;  %s323_s16 = sadd.s32 %s2687_s11, %s322_s9 }
  0x41   : > { %v716_v56 = vstv %s715_s21  ;;  %s338_s23 = sadd.s32 %s2687_s11, %s337_s28  ;;  %s2798_s15 = sld [smem:[#allocation3 + %s794_s8]]  ;;  %v2977_v42 = vsel %vm136_vm3, 1.0, %v2578_v38 }
  0x42   : > { %564 = vrot.lane.b32.xlu1 %v559_v21, %s2577_s29  ;;  %v718_v57 = vmul.f32 %v716_v56, %v2696_v27  ;;  %v717_v58 = vmul.f32 %v716_v56, %v2701_v29  ;;  %v732_v59 = vstv %s2766_s30  ;;  %s810_s21 = sadd.s32 %s2609_s18, %s809_s12  ;;  %s826_s9 = sadd.s32 %s2609_s18, %s825_s13  ;;  %v128_v21 = vand.u32 127, %v124_v25 }
  0x43   : > { %562 = vrot.lane.b32.xlu0 %v558_v22, %s2577_s29  ;;  %s4639_s28 = sadd.s32 8, %s2607_s17  ;;  %s2803_s4 = sld [smem:[#allocation3 + %s323_s16]]  ;;  %v734_v60 = vmul.f32 %v732_v59, %v2696_v27  ;;  %v733_v61 = vmul.f32 %v732_v59, %v2701_v29 }
  0x44   : > { %s2805_s5 = sld [smem:[#allocation3 + %s338_s23]]  ;;  %s346_s26 = sadd.s32 %s2687_s11, %s345_s3  ;;  %v781_v63 = vstv %s2778_s7  ;;  %vm141_vm1 = vcmp.eq.s32.totalorder %v128_v21, 0  ;;  %vm144_vm2 = vcmp.eq.s32.totalorder %v128_v21, 15 }
  0x45   : > { %s2812_s30 = sld [smem:[#allocation3 + %s810_s21]]  ;;  %s842_s8 = sadd.s32 %s2609_s18, %s4639_s28  ;;  %v783_v3 = vmul.f32 %v781_v63, %v2817_v62  ;;  %v782_v4 = vmul.f32 %v781_v63, %v2826_v2  ;;  %v2942_v28 = vsel %vm141_vm1, 1.0, %v2578_v38  ;;  %v318_v33 = vstv %s2784_s19 }
  0x46   : > { %580 = vrot.lane.b32.xlu1 %v575_v24, %s2577_s29  ;;  %s2820_s3 = sld [smem:[#allocation3 + %s826_s9]]  ;;  %s857_s12 = sadd.s32 %s2609_s18, %s364_s25  ;;  %v2959_v36 = vmul.f32 %v2942_v28, %v2742_v39 }
  0x47   : > { %578 = vrot.lane.b32.xlu0 %v574_v26, %s2577_s29  ;;  %s872_s13 = sadd.s32 80, %s2607_s17  ;;  %s888_s16 = sadd.s32 116, %s2607_s17  ;;  %v796_v5 = vstv %s2798_s15 }
  0x48   : > { %s4645_s23 = sadd.s32 16, %s2607_s17  ;;  %s4642_s21 = sadd.s32 17, %s2607_s17  ;;  %v798_v6 = vmul.f32 %v796_v5, %v2817_v62  ;;  %v797_v7 = vmul.f32 %v796_v5, %v2826_v2 }
  0x49   : > { %s164_s7 = sadd.s32 %s2687_s11, %s4645_s23  ;;  %s167_s25 = sadd.s32 %s2687_s11, %s4642_s21 }
  0x4a   : > { %629 = vrot.lane.b32.xlu1 %v624_v30, %s4647_s10  ;;  %s2843_s9 = sld [smem:[#allocation3 + %s164_s7]]  ;;  %s873_s24 = sadd.s32 %s2609_s18, %s872_s13  ;;  %v2945_v30 = vsel %vm144_vm2, 1.0, %v2578_v38  ;;  %v2994_v38 = vmul.f32 %v2942_v28, %v2977_v42 }
  0x4b   : > { %627 = vrot.lane.b32.xlu0 %v623_v31, %s4647_s10  ;;  %s168_s22 = sld [smem:[#allocation3 + %s167_s25]]  ;;  %s889_s20 = sadd.s32 %s2609_s18, %s888_s16  ;;  %v812_v8 = vstv %s2812_s30  ;;  %v2970_v41 = vmul.f32 0.0, %v2945_v30  ;;  %v2987_v45 = vmul.f32 %v2945_v30, %v2742_v39 }
  0x4c   : > { %s2849_s28 = sld [smem:[#allocation3 + %s346_s26]]  ;;  %s4643_s7 = sadd.s32 10, %s2607_s17  ;;  %v814_v9 = vmul.f32 %v812_v8, %v2817_v62  ;;  %v813_v12 = vmul.f32 %v812_v8, %v2826_v2  ;;  %v828_v13 = vstv %s2820_s3 }
  0x4d   : > { %s2854_s15 = sld [smem:[#allocation3 + %s842_s8]]  ;;  %s381_s25 = sadd.s32 46, %s2607_s17  ;;  %v830_v17 = vmul.f32 %v828_v13, %v2817_v62  ;;  %v829_v19 = vmul.f32 %v828_v13, %v2826_v2 }
  0x4e   : > { %644 = vrot.lane.b32.xlu1 %v639_v34, %s4647_s10  ;;  %s2860_s26 = sld [smem:[#allocation3 + %s857_s12]]  ;;  %s939_s8 = sadd.s32 %s2609_s18, %s4643_s7  ;;  %v325_v34 = vstv %s2803_s4 }
  0x4f   : > { %642 = vrot.lane.b32.xlu0 %v638_v35, %s4647_s10  ;;  %s2862_s13 = sld [smem:[#allocation3 + %s873_s24]]  ;;  %s969_s6 = sadd.s32 82, %s2607_s17  ;;  %v340_v35 = vstv %s2805_s5 }
  0x50   : > { %s2864_s16 = sld [smem:[#allocation3 + %s889_s20]]  ;;  %s382_s21 = sadd.s32 %s2687_s11, %s381_s25  ;;  %v172_v11 = vstv %s2843_s9 }
  0x51   : > { %s985_s30 = sadd.s32 118, %s2607_s17  ;;  %v169_v10 = vstv %s168_s22  ;;  %s954_s24 = sadd.s32 %s2609_s18, %s381_s25 }
  0x52   : > { %660 = vrot.lane.b32.xlu1 %v655_v37, %s4647_s10  ;;  %v170_v14 = vmul.f32 %v2742_v39, %v169_v10  ;;  %s4644_s20 = sadd.s32 18, %s2607_s17  ;;  %v171_v15 = vmul.f32 0.0, %v169_v10  ;;  %s2882_s12 = sld [smem:[#allocation3 + %s939_s8]]  ;;  %v348_v37 = vstv %s2849_s28 }
  0x53   : > { %658 = vrot.lane.b32.xlu0 %v654_v40, %s4647_s10  ;;  %s970_s7 = sadd.s32 %s2609_s18, %s969_s6  ;;  %s2885_s22 = sld [smem:[#allocation3 + %s382_s21]]  ;;  %v844_v20 = vstv %s2854_s15  ;;  %v2967_v40 = vmul.f32 0.0, %v2942_v28 }
  0x54   : > { %s986_s9 = sadd.s32 %s2609_s18, %s985_s30  ;;  %v2888_v16 = vsub.f32 %v172_v11, %v170_v14  ;;  %s2892_s3 = sld [smem:[#allocation3 + %s954_s24]]  ;;  %v2897_v18 = vsub.f32 %v172_v11, %v171_v15  ;;  %v846_v22 = vmul.f32 %v844_v20, %v2817_v62  ;;  %v845_v24 = vmul.f32 %v844_v20, %v2826_v2 }
  0x55   : > { %s176_s25 = sadd.s32 %s2687_s11, %s4644_s20  ;;  %s2902_s6 = sld [smem:[#allocation3 + %s970_s7]]  ;;  %v859_v25 = vstv %s2860_s26  ;;  %v875_v32 = vstv %s2862_s13  ;;  %v3028_v56 = vmul.f32 %v348_v37, %v2967_v40 }
  0x56   : > { %676 = vrot.lane.b32.xlu1 %v671_v46, %s4647_s10  ;;  %s4646_s21 = sadd.s32 19, %s2607_s17  ;;  %s2906_s8 = sld [smem:[#allocation3 + %s986_s9]]  ;;  %v861_v26 = vmul.f32 %v859_v25, %v2817_v62  ;;  %v860_v31 = vmul.f32 %v859_v25, %v2826_v2  ;;  %v877_v43 = vmul.f32 %v875_v32, %v2817_v62  ;;  %v891_v44 = vstv %s2864_s16 }
  0x57   : > { %674 = vrot.lane.b32.xlu0 %v670_v49, %s4647_s10  ;;  %s4651_s24 = sadd.s32 36, %s2607_s17  ;;  %s2910_s20 = sld [smem:[#allocation3 + %s176_s25]]  ;;  %v319_v46 = vmul.f32 %v2942_v28, %v318_v33  ;;  %v3000_v49 = vmul.f32 %v2945_v30, %v325_v34  ;;  %v876_v50 = vmul.f32 %v875_v32, %v2826_v2 }
  0x58   : > { %s2917_s15 = sadd.s32 %s2687_s11, %s4646_s21  ;;  %s4656_s9 = sadd.s32 21, %s2607_s17  ;;  %v941_v53 = vstv %s2882_s12 }
  0x59   : > { %s4650_s25 = sadd.s32 34, %s2607_s17  ;;  %s4649_s7 = sadd.s32 35, %s2607_s17  ;;  %v384_v63 = vstv %s2885_s22 }
  0x5a   : > { %692 = vrot.lane.b32.xlu1 %v687_v51, %s2577_s29  ;;  %s296_s21 = sadd.s32 %s2687_s11, %s4650_s25  ;;  %s299_s26 = sadd.s32 %s2687_s11, %s4649_s7  ;;  %v3008_v51 = vmul.f32 %v340_v35, %v2970_v41  ;;  %v956_v8 = vstv %s2892_s3  ;;  %v3065_v15 = vmul.f32 %v2942_v28, %v384_v63 }
  0x5b   : > { %690 = vrot.lane.b32.xlu0 %v686_v52, %s2577_s29  ;;  %s2930_s30 = sld [smem:[#allocation3 + %s296_s21]]  ;;  %s4671_s25 = sadd.s32 20, %s2607_s17  ;;  %v3011_v52 = vld [vmem:[%s2623_s27 + $0x20] sm:$0xff]  ;;  %v972_v10 = vstv %s2902_s6 }
  0x5c   : > { %s2950_s21 = sld [smem:[#allocation3 + %s299_s26]]  ;;  %s329_s23 = sadd.s32 39, %s2607_s17  ;;  %v958_v20 = vmul.f32 %v3011_v52, %v956_v8  ;;  %v988_v21 = vstv %s2906_s8  ;;  %v974_v25 = vmul.f32 %v3011_v52, %v972_v10 }
  0x5d   : > { %s330_s19 = sadd.s32 %s2687_s11, %s329_s23  ;;  %s4672_s28 = sadd.s32 47, %s2607_s17  ;;  %v178_v11 = vstv %s2910_s20 }
  0x5e   : > { %707 = vrot.lane.b32.xlu1 %v702_v54, %s2577_s29  ;;  %s389_s4 = sadd.s32 %s2687_s11, %s4672_s28  ;;  %s2996_s5 = sld [smem:[#allocation3 + %s330_s19]]  ;;  %v3022_v54 = vmul.f32 %v348_v37, %v2994_v38 }
  0x5f   : > { %705 = vrot.lane.b32.xlu0 %v701_v55, %s2577_s29  ;;  %s3005_s13 = sld [smem:[#allocation3 + %s2917_s15]]  ;;  %s4673_s16 = sadd.s32 11, %s2607_s17  ;;  %v3025_v55 = vmul.f32 %v340_v35, %v2987_v45 }
  0x60   : > { %s3033_s12 = sld [smem:[#allocation3 + %s389_s4]]  ;;  %s403_s20 = sadd.s32 49, %s2607_s17 }
  0x61   : > { %v304_v59 = vstv %s2930_s30  ;;  %s411_s3 = sadd.s32 50, %s2607_s17  ;;  %s404_s6 = sadd.s32 %s2687_s11, %s403_s20 }
  0x62   : > { %723 = vrot.lane.b32.xlu1 %v718_v57, %s2577_s29  ;;  %v893_v57 = vmul.f32 %v891_v44, %v2817_v62  ;;  %s412_s19 = sadd.s32 %s2687_s11, %s411_s3  ;;  %s205_s28 = sadd.s32 22, %s2607_s17 }
  0x63   : > { %721 = vrot.lane.b32.xlu0 %v717_v58, %s2577_s29  ;;  %v301_v58 = vstv %s2950_s21  ;;  %s4660_s21 = sadd.s32 48, %s2607_s17  ;;  %s3085_s4 = sld [smem:[#allocation3 + %s404_s6]] }
  0x64   : > { %v302_v5 = vmul.f32 %v2742_v39, %v301_v58  ;;  %s396_s30 = sadd.s32 %s2687_s11, %s4660_s21 }
  0x66   : > { %739 = vrot.lane.b32.xlu1 %v734_v60, %s2577_s29  ;;  %v305_v13 = vsub.f32 %v304_v59, %v302_v5 }
  0x67   : > { %737 = vrot.lane.b32.xlu0 %v733_v61, %s2577_s29  ;;  %v3040_v61 = vld [vmem:[%s2623_s27 + $0x18] sm:$0xff] }
  0x68   : > { %v942_v14 = vmul.f32 %v3040_v61, %v941_v53  ;;  %v973_v37 = vmul.f32 %v3040_v61, %v972_v10 }
  0x6a   : > { %788 = vrot.lane.b32.xlu1 %v783_v3, %s4647_s10  ;;  %v303_v3 = vmul.f32 0.0, %v301_v58 }
  0x6b   : > { %786 = vrot.lane.b32.xlu0 %v782_v4, %s4647_s10 }
  0x6e   : > { %803 = vrot.lane.b32.xlu1 %v798_v6, %s4647_s10  ;;  %v892_v6 = vmul.f32 %v891_v44, %v2826_v2 }
  0x6f   : > { %801 = vrot.lane.b32.xlu0 %v797_v7, %s4647_s10  ;;  %v943_v7 = vmul.f32 %v3011_v52, %v941_v53 }
  0x72   : > { %819 = vrot.lane.b32.xlu1 %v814_v9, %s4647_s10 }
  0x73   : > { %817 = vrot.lane.b32.xlu0 %v813_v12, %s4647_s10  ;;  %v306_v12 = vsub.f32 %v304_v59, %v303_v3 }
  0x76   : > { %835 = vrot.lane.b32.xlu1 %v830_v17, %s4647_s10  ;;  %v180_v17 = vmul.f32 %v2977_v42, %v178_v11 }
  0x77   : > { %833 = vrot.lane.b32.xlu0 %v829_v19, %s4647_s10  ;;  %s308_s10 = sadd.s32 %s2687_s11, %s4651_s24  ;;  %s191_s24 = sadd.s32 %s2687_s11, %s4671_s25  ;;  %v332_v19 = vstv %s2996_s5 }
  0x78   : > { %s2952_s7 = sld [smem:[#allocation3 + %s308_s10]]  ;;  %s198_s10 = sadd.s32 %s2687_s11, %s4656_s9  ;;  %v334_v33 = vmul.f32 %v332_v19, %v2967_v40  ;;  %v333_v35 = vmul.f32 %v332_v19, %v2959_v36 }
  0x79   : > { %s3017_s25 = sadd.s32 %s2609_s18, %s4673_s16  ;;  %s3019_s26 = sld [smem:[#allocation3 + %s191_s24]] }
  0x7a   : > { %851 = vrot.lane.b32.xlu1 %v846_v22, %s2577_s29  ;;  %s3031_s15 = sld [smem:[#allocation3 + %s198_s10]]  ;;  %s4666_s24 = sadd.s32 45, %s2607_s17 }
  0x7b   : > { %849 = vrot.lane.b32.xlu0 %v845_v24, %s2577_s29  ;;  %s374_s22 = sadd.s32 %s2687_s11, %s4666_s24  ;;  %s3061_s10 = sld [smem:[#allocation3 + %s396_s30]]  ;;  %v957_v24 = vmul.f32 %v3040_v61, %v956_v8 }
  0x7c   : > { %s3089_s5 = sld [smem:[#allocation3 + %s412_s19]]  ;;  %s4669_s24 = sadd.s32 32, %s2607_s17 }
  0x7d   : > { %s3101_s16 = sld [smem:[#allocation3 + %s3017_s25]]  ;;  %s4667_s25 = sadd.s32 23, %s2607_s17 }
  0x7e   : > { %866 = vrot.lane.b32.xlu1 %v861_v26, %s2577_s29  ;;  %v310_v60 = vstv %s2952_s7  ;;  %s3059_s7 = sld [smem:[#allocation3 + %s374_s22]]  ;;  %v179_v26 = vmul.f32 0.0, %v178_v11  ;;  %s206_s22 = sadd.s32 %s2687_s11, %s205_s28 }
  0x7f   : > { %864 = vrot.lane.b32.xlu0 %v860_v31, %s2577_s29  ;;  %v312_v4 = vmul.f32 %v2977_v42, %v310_v60  ;;  %v311_v9 = vmul.f32 0.0, %v310_v60  ;;  %v186_v31 = vstv %s3005_s13  ;;  %v193_v44 = vstv %s3019_s26  ;;  %s4674_s13 = smov 127   ;;  %s4675_s26 = sadd.s32 47, %s2607_s17 }
  0x80   : > { %v181_v59 = vsub.f32 %v2888_v16, %v179_v26  ;;  %v3116_v3 = vmul.f32 %v2945_v30, %v193_v44  ;;  %s3123_s30 = sld [smem:[#allocation3 + %s206_s22]]  ;;  %s214_s6 = sadd.s32 %s2687_s11, %s4667_s25 }
  0x81   : > { %v314_v22 = vsub.f32 %v306_v12, %v312_v4  ;;  %v313_v23 = vsub.f32 %v305_v13, %v311_v9  ;;  %v398_v5 = vstv %s3061_s10  ;;  %v406_v12 = vstv %s3085_s4  ;;  %s3152_s4 = sld [smem:[#allocation3 + %s214_s6]]  ;;  %s1048_s22 = sadd.s32 119, %s2607_s17 }
  0x82   : > { %882 = vrot.lane.b32.xlu1 %v877_v43, %s2577_s29  ;;  %v3095_v43 = vmul.f32 %v3011_v52, %v988_v21  ;;  %v414_v19 = vstv %s3089_s5  ;;  %s1049_s8 = sadd.s32 %s2609_s18, %s1048_s22  ;;  %s1113_s22 = sadd.s32 %s2609_s18, %s403_s20 }
  0x83   : > { %880 = vrot.lane.b32.xlu0 %v876_v50, %s2577_s29  ;;  %v321_v32 = vsub.f32 %v314_v22, %v319_v46  ;;  %v320_v34 = vsub.f32 %v313_v23, %v319_v46  ;;  %v182_v50 = vsub.f32 %v2897_v18, %v180_v17  ;;  %v391_v46 = vstv %s3033_s12  ;;  %s1017_s12 = sadd.s32 %s2609_s18, %s4675_s26  ;;  %s3231_s20 = sld [smem:[#allocation3 + %s1113_s22]] }
  0x84   : > { %v376_v58 = vstv %s3059_s7  ;;  %v187_v18 = vmul.f32 %v2942_v28, %v186_v31  ;;  %v392_v16 = vmul.f32 %v2945_v30, %v391_v46  ;;  %s1032_s7 = sadd.s32 83, %s2607_s17  ;;  %s3138_s10 = sld [smem:[#allocation3 + %s1017_s12]]  ;;  %v408_v22 = vmul.f32 %v406_v12, %v2970_v41 }
  0x85   : > { %v328_v53 = vsub.f32 %v321_v32, %v3000_v49  ;;  %v378_v60 = vmul.f32 %v2977_v42, %v376_v58  ;;  %v377_v63 = vmul.f32 0.0, %v376_v58  ;;  %s1033_s19 = sadd.s32 %s2609_s18, %s1032_s7  ;;  %v407_v23 = vmul.f32 %v406_v12, %v2987_v45  ;;  %s4652_s12 = sadd.s32 13, %s2607_s17 }
  0x86   : > { %898 = vrot.lane.b32.xlu1 %v893_v57, %s2577_s29  ;;  %v327_v57 = vsub.f32 %v320_v34, %v3000_v49  ;;  %v189_v9 = vsub.f32 %v182_v50, %v187_v18  ;;  %s3168_s5 = sld [smem:[#allocation3 + %s1033_s19]]  ;;  %s430_s7 = sadd.s32 %s2609_s18, %s2607_s17 }
  0x87   : > { %896 = vrot.lane.b32.xlu0 %v892_v6, %s2577_s29  ;;  %v336_v49 = vadd.f32 %v334_v33, %v328_v53  ;;  %v200_v6 = vstv %s3031_s15  ;;  %v379_v8 = vsub.f32 %v2755_v48, %v377_v63  ;;  %s4653_s15 = sadd.s32 24, %s2607_s17  ;;  %v400_v48 = vmul.f32 %v398_v5, %v2967_v40  ;;  %s1098_s6 = sadd.s32 %s2609_s18, %s4652_s12 }
  0x88   : > { %v335_v4 = vadd.f32 %v333_v35, %v327_v57  ;;  %s222_s26 = sadd.s32 %s2687_s11, %s4653_s15  ;;  %v202_v26 = vmul.f32 %v200_v6, %v2967_v40  ;;  %v201_v34 = vmul.f32 %v200_v6, %v2959_v36  ;;  %v208_v35 = vstv %s3123_s30  ;;  %s3188_s30 = sld [smem:[#allocation3 + %s1049_s8]] }
  0x89   : > { %v344_v10 = vadd.f32 %v3008_v51, %v336_v49  ;;  %v386_v13 = vsub.f32 %v379_v8, %v3065_v15  ;;  %v399_v51 = vmul.f32 %v398_v5, %v2959_v36  ;;  %v210_v53 = vmul.f32 %v208_v35, %v2970_v41  ;;  %s3199_s19 = sld [smem:[#allocation3 + %s430_s7]]  ;;  %s1144_s7 = sadd.s32 121, %s2607_s17 }
  0x8a   : > { %948 = vrot.lane.b32.xlu1 %v943_v7, %s4674_s13  ;;  %v380_v7 = vsub.f32 %v2753_v47, %v378_v60  ;;  %v343_v11 = vadd.f32 %v3025_v55, %v335_v4  ;;  %v1019_v57 = vstv %s3138_s10  ;;  %v209_v60 = vmul.f32 %v208_v35, %v2987_v45  ;;  %s4665_s10 = sadd.s32 3, %s2607_s17  ;;  %s4662_s12 = sadd.s32 25, %s2607_s17 }
  0x8b   : > { %946 = vrot.lane.b32.xlu0 %v942_v14, %s4674_s13  ;;  %v188_v14 = vsub.f32 %v181_v59, %v187_v18  ;;  %v3146_v55 = vadd.f32 %v3022_v54, %v344_v10  ;;  %v989_v54 = vmul.f32 %v3040_v61, %v988_v21  ;;  %v415_v21 = vmul.f32 %v414_v19, %v2967_v40  ;;  %s589_s8 = sadd.s32 %s2609_s18, %s4665_s10  ;;  %s4661_s15 = sadd.s32 28, %s2607_s17 }
  0x8c   : > { %v387_v47 = vsub.f32 %v380_v7, %v3065_v15  ;;  %v3149_v17 = vadd.f32 %v3028_v56, %v343_v11  ;;  %v393_v15 = vsub.f32 %v386_v13, %v392_v16  ;;  %v196_v56 = vsub.f32 %v189_v9, %v3116_v3 }
  0x8d   : > { %v195_v33 = vsub.f32 %v188_v14, %v3116_v3  ;;  %v216_v63 = vstv %s3152_s4  ;;  %v1021_v3 = vmul.f32 %v3011_v52, %v1019_v57  ;;  %v3205_v49 = vmul.f32 %v2945_v30, %v2977_v42  ;;  %s3212_s4 = sld [smem:[#allocation3 + %s1098_s6]]  ;;  %s1145_s6 = sadd.s32 %s2609_s18, %s1144_s7 }
  0x8e   : > { %963 = vrot.lane.b32.xlu1 %v958_v20, %s4674_s13  ;;  %v394_v20 = vsub.f32 %v387_v47, %v392_v16  ;;  %v401_v32 = vadd.f32 %v399_v51, %v393_v15  ;;  %v204_v58 = vadd.f32 %v202_v26, %v196_v56  ;;  %v1020_v4 = vmul.f32 %v3040_v61, %v1019_v57  ;;  %v3247_v26 = vld [vmem:[%s2623_s27 + $0x21] sm:$0xff] }
  0x8f   : > { %961 = vrot.lane.b32.xlu0 %v957_v24, %s4674_s13  ;;  %v1004_v24 = vstv %s3101_s16  ;;  %s3176_s16 = sld [smem:[#allocation3 + %s222_s26]]  ;;  %v218_v6 = vmul.f32 %v216_v63, %v2994_v38  ;;  %v1035_v16 = vstv %s3168_s5  ;;  %v217_v9 = vmul.f32 %v216_v63, %v2967_v40  ;;  %s1128_s26 = sadd.s32 85, %s2607_s17 }
  0x90   : > { %v402_v31 = vadd.f32 %v400_v48, %v394_v20  ;;  %v409_v44 = vadd.f32 %v407_v23, %v401_v32  ;;  %v1006_v50 = vmul.f32 %v3011_v52, %v1004_v24  ;;  %v1005_v46 = vmul.f32 %v3040_v61, %v1004_v24  ;;  %s1129_s5 = sadd.s32 %s2609_s18, %s1128_s26 }
  0x91   : > { %v212_v5 = vadd.f32 %v210_v53, %v204_v58  ;;  %v1037_v12 = vmul.f32 %v3011_v52, %v1035_v16  ;;  %v1036_v13 = vmul.f32 %v3040_v61, %v1035_v16  ;;  %v1051_v51 = vstv %s3188_s30  ;;  %s3250_s30 = sld [smem:[#allocation3 + %s1129_s5]] }
  0x92   : > { %979 = vrot.lane.b32.xlu1 %v974_v25, %s4674_s13  ;;  %v416_v25 = vmul.f32 %v414_v19, %v2994_v38  ;;  %v3192_v18 = vadd.f32 %v415_v21, %v409_v44  ;;  %v1053_v23 = vmul.f32 %v3011_v52, %v1051_v51  ;;  %v1052_v56 = vmul.f32 %v3040_v61, %v1051_v51 }
  0x93   : > { %977 = vrot.lane.b32.xlu0 %v973_v37, %s4674_s13  ;;  %v410_v37 = vadd.f32 %v408_v22, %v402_v31  ;;  %v220_v47 = vadd.f32 %v218_v6, %v212_v5  ;;  %v432_v22 = vstv %s3199_s19  ;;  %v1100_v31 = vstv %s3212_s4  ;;  %s4654_s19 = sadd.s32 14, %s2607_s17  ;;  %s3267_s4 = sld [smem:[#allocation3 + %s1145_s6]] }
  0x94   : > { %v434_v24 = vmul.f32 %v432_v22, %v2634_v1  ;;  %v433_v32 = vmul.f32 %v432_v22, %v2629_v0  ;;  %v1115_v0 = vstv %s3231_s20  ;;  %s1161_s22 = sadd.s32 %s2609_s18, %s4654_s19  ;;  %s1191_s20 = sadd.s32 86, %s2607_s17 }
  0x95   : > { %v3190_v59 = vadd.f32 %v416_v25, %v410_v37  ;;  %v224_v10 = vstv %s3176_s16  ;;  %s3237_s16 = sld [smem:[#allocation3 + %s589_s8]]  ;;  %v1117_v57 = vmul.f32 %v3247_v26, %v1115_v0  ;;  %s1176_s8 = sadd.s32 %s2609_s18, %s411_s3 }
  0x96   : > { %995 = vrot.lane.b32.xlu1 %v3095_v43, %s4674_s13  ;;  %v203_v43 = vadd.f32 %v201_v34, %v195_v33  ;;  %v226_v48 = vmul.f32 %v224_v10, %v3205_v49  ;;  %v225_v19 = vmul.f32 %v224_v10, %v2970_v41  ;;  %v3256_v33 = vld [vmem:[%s2623_s27 + $0x19] sm:$0xff]  ;;  %v1102_v34 = vmul.f32 %v3247_v26, %v1100_v31  ;;  %s3282_s26 = sld [smem:[#allocation3 + %s1161_s22]]  ;;  %s1192_s3 = sadd.s32 %s2609_s18, %s1191_s20 }
  0x97   : > { %993 = vrot.lane.b32.xlu0 %v989_v54, %s4674_s13  ;;  %v1101_v37 = vmul.f32 %v3256_v33, %v1100_v31  ;;  %s1177_s5 = sld [smem:[#allocation3 + %s1176_s8]]  ;;  %s4657_s8 = sadd.s32 6, %s2607_s17 }
  0x98   : > { %v211_v8 = vadd.f32 %v209_v60, %v203_v43  ;;  %v228_v54 = vadd.f32 %v226_v48, %v220_v47  ;;  %v1116_v43 = vmul.f32 %v3256_v33, %v1115_v0  ;;  %v1131_v60 = vstv %s3250_s30  ;;  %s1193_s7 = sld [smem:[#allocation3 + %s1192_s3]]  ;;  %s1287_s3 = sadd.s32 88, %s2607_s17 }
  0x99   : > { %v1147_v10 = vstv %s3267_s4  ;;  %s4676_s4 = sadd.s32 16, %s2607_s17 }
  0x9a   : > { %1011 = vrot.lane.b32.xlu1 %v1006_v50, %s2577_s29  ;;  %v219_v14 = vadd.f32 %v217_v9, %v211_v8  ;;  %v436_v35 = vadd.f32 %v434_v24, %v228_v54  ;;  %v1133_v9 = vmul.f32 %v3247_v26, %v1131_v60  ;;  %v1149_v48 = vmul.f32 %v3247_v26, %v1147_v10  ;;  %s1256_s22 = sadd.s32 %s2609_s18, %s4676_s4 }
  0x9b   : > { %1009 = vrot.lane.b32.xlu0 %v1005_v46, %s2577_s29  ;;  %v591_v46 = vstv %s3237_s16  ;;  %s1207_s16 = sadd.s32 122, %s2607_s17  ;;  %s3334_s20 = sld [smem:[#allocation3 + %s1256_s22]] }
  0x9c   : > { %v3214_v7 = vpop.permute.xlu1 %483  ;;  %v227_v25 = vadd.f32 %v225_v19, %v219_v14  ;;  %v593_v63 = vmul.f32 %v591_v46, %v2696_v27  ;;  %v592_v5 = vmul.f32 %v591_v46, %v2701_v29  ;;  %v1132_v27 = vmul.f32 %v3256_v33, %v1131_v60  ;;  %s1208_s30 = sadd.s32 %s2609_s18, %s1207_s16  ;;  %s748_s16 = sadd.s32 %s2609_s18, %s4657_s8 }
  0x9d   : > { %v469_v11 = vpop.permute.xlu0 %468  ;;  %v1163_v51 = vstv %s3282_s26  ;;  %s3319_s6 = sld [smem:[#allocation3 + %s1208_s30]]  ;;  %s1271_s26 = sadd.s32 52, %s2607_s17 }
  0x9e   : > { %1026 = vrot.lane.b32.xlu1 %v1021_v3, %s2577_s29  ;;  %v435_v44 = vadd.f32 %v433_v32, %v227_v25  ;;  %v1165_v22 = vmul.f32 %v3247_v26, %v1163_v51  ;;  %v1194_v25 = vstv %s1193_s7  ;;  %s1288_s30 = sadd.s32 %s2609_s18, %s1287_s3  ;;  %s3351_s4 = sld [smem:[#allocation3 + %s748_s16]] }
  0x9f   : > { %1024 = vrot.lane.b32.xlu0 %v1020_v4, %s2577_s29  ;;  %s1303_s22 = sadd.s32 124, %s2607_s17  ;;  %s250_s8 = sadd.s32 %s2687_s11, %s4661_s15 }
  0xa0   : > { %v3234_v20 = vpop.permute.xlu1 %485  ;;  %v474_v3 = vadd.f32 %v469_v11, %v435_v44  ;;  %s1304_s16 = sadd.s32 %s2609_s18, %s1303_s22  ;;  %s1334_s22 = sadd.s32 53, %s2607_s17 }
  0xa1   : > { %v471_v15 = vpop.permute.xlu0 %470  ;;  %v1258_v60 = vstv %s3334_s20  ;;  %s3383_s20 = sld [smem:[#allocation3 + %s1304_s16]]  ;;  %s1350_s16 = sadd.s32 89, %s2607_s17 }
  0xa2   : > { %1042 = vrot.lane.b32.xlu1 %v1037_v12, %s2577_s29  ;;  %v475_v58 = vadd.f32 %v471_v15, %v436_v35  ;;  %v1164_v15 = vmul.f32 %v3256_v33, %v1163_v51  ;;  %v1196_v35 = vmul.f32 %v3247_v26, %v1194_v25  ;;  %s1351_s19 = sadd.s32 %s2609_s18, %s1350_s16 }
  0xa3   : > { %1040 = vrot.lane.b32.xlu0 %v1036_v13, %s2577_s29  ;;  %v1148_v13 = vmul.f32 %v3256_v33, %v1147_v10  ;;  %v1210_v0 = vstv %s3319_s6  ;;  %s3456_s16 = sld [smem:[#allocation3 + %s1351_s19]] }
  0xa4   : > { %v3253_v21 = vpop.permute.xlu1 %501 }
  0xa5   : > { %v3259_v1 = vpop.permute.xlu0 %499 }
  0xa6   : > { %1058 = vrot.lane.b32.xlu1 %v1053_v23, %s2577_s29  ;;  %v1178_v23 = vstv %s1177_s5  ;;  %s1272_s5 = sadd.s32 %s2609_s18, %s1271_s26  ;;  %s4655_s26 = sadd.s32 12, %s2607_s17 }
  0xa7   : > { %1056 = vrot.lane.b32.xlu0 %v1052_v56, %s2577_s29  ;;  %v1180_v56 = vmul.f32 %v3247_v26, %v1178_v23  ;;  %v1179_v31 = vmul.f32 %v3256_v33, %v1178_v23  ;;  %s3346_s7 = sld [smem:[#allocation3 + %s1272_s5]]  ;;  %s1067_s6 = sadd.s32 %s2609_s18, %s4655_s26 }
  0xa8   : > { %v3269_v50 = vpop.permute.xlu1 %517  ;;  %s3368_s5 = sld [smem:[#allocation3 + %s1288_s30]]  ;;  %s4678_s30 = sadd.s32 17, %s2607_s17 }
  0xa9   : > { %v3275_v53 = vpop.permute.xlu0 %515  ;;  %s1068_s3 = sld [smem:[#allocation3 + %s1067_s6]]  ;;  %s1319_s6 = sadd.s32 %s2609_s18, %s4678_s30 }
  0xaa   : > { %1107 = vrot.lane.b32.xlu1 %v1102_v34, %s4674_s13  ;;  %s3418_s30 = sadd.s32 %s2687_s11, %s4662_s12  ;;  %s3472_s12 = sld [smem:[#allocation3 + %s250_s8]] }
  0xab   : > { %1105 = vrot.lane.b32.xlu0 %v1101_v37, %s4674_s13  ;;  %v1195_v37 = vmul.f32 %v3256_v33, %v1194_v25  ;;  %s4681_s8 = sadd.s32 19, %s2607_s17 }
  0xac   : > { %v534_v4 = vpop.permute.xlu1 %533 }
  0xad   : > { %v538_v6 = vadd.f32 %v534_v4, %v475_v58  ;;  %v532_v16 = vpop.permute.xlu0 %531  ;;  %v1211_v58 = vmul.f32 %v3256_v33, %v1210_v0 }
  0xae   : > { %v537_v8 = vadd.f32 %v532_v16, %v474_v3  ;;  %1122 = vrot.lane.b32.xlu1 %v1117_v57, %s4674_s13  ;;  %v1212_v57 = vmul.f32 %v3247_v26, %v1210_v0  ;;  %v3373_v3 = vld [vmem:[%s2623_s27 + $0x1a] sm:$0xff]  ;;  %v1274_v16 = vstv %s3346_s7  ;;  %s4659_s7 = sadd.s32 26, %s2607_s17  ;;  %v1290_v23 = vstv %s3368_s5 }
  0xaf   : > { %1120 = vrot.lane.b32.xlu0 %v1116_v43, %s4674_s13  ;;  %v3295_v11 = vadd.f32 %v593_v63, %v538_v6  ;;  %v3365_v43 = vld [vmem:[%s2623_s27 + $0x22] sm:$0xff]  ;;  %v1259_v6 = vmul.f32 %v3373_v3, %v1258_v60  ;;  %v1069_v10 = vstv %s1068_s3  ;;  %s1335_s3 = sadd.s32 %s2609_s18, %s1334_s22  ;;  %s233_s5 = sadd.s32 %s2687_s11, %s4659_s7 }
  0xb0   : > { %v3297_v29 = vpop.permute.xlu1 %548  ;;  %v3299_v12 = vadd.f32 %v592_v5, %v537_v8  ;;  %v1260_v5 = vmul.f32 %v3365_v43, %v1258_v60  ;;  %v3401_v51 = vmul.f32 %v3256_v33, %v1069_v10  ;;  %s3431_s22 = sld [smem:[#allocation3 + %s1335_s3]]  ;;  %s4664_s3 = sadd.s32 29, %s2607_s17 }
  0xb1   : > { %v3302_v47 = vpop.permute.xlu0 %546  ;;  %s3439_s26 = sld [smem:[#allocation3 + %s233_s5]]  ;;  %s4663_s5 = sadd.s32 30, %s2607_s17 }
  0xb2   : > { %1138 = vrot.lane.b32.xlu1 %v1133_v9, %s4674_s13  ;;  %v750_v9 = vstv %s3351_s4  ;;  %s3408_s4 = sld [smem:[#allocation3 + %s1319_s6]]  ;;  %s4658_s6 = sadd.s32 27, %s2607_s17 }
  0xb3   : > { %1136 = vrot.lane.b32.xlu0 %v1132_v27, %s4674_s13  ;;  %s242_s9 = sadd.s32 %s2687_s11, %s4658_s6  ;;  %s3463_s7 = sld [smem:[#allocation3 + %s3418_s30]] }
  0xb4   : > { %v3310_v14 = vpop.permute.xlu1 %564  ;;  %s257_s21 = sadd.s32 %s2687_s11, %s4664_s3  ;;  %s3470_s15 = sld [smem:[#allocation3 + %s242_s9]] }
  0xb5   : > { %v3313_v19 = vpop.permute.xlu0 %562  ;;  %s264_s19 = sadd.s32 %s2687_s11, %s4663_s5  ;;  %s3484_s9 = sld [smem:[#allocation3 + %s257_s21]] }
  0xb6   : > { %1154 = vrot.lane.b32.xlu1 %v1149_v48, %s4674_s13  ;;  %v1276_v48 = vmul.f32 %v3365_v43, %v1274_v16  ;;  %s1416_s30 = sadd.s32 %s2609_s18, %s4681_s8  ;;  %s1431_s5 = sadd.s32 55, %s2607_s17 }
  0xb7   : > { %1152 = vrot.lane.b32.xlu0 %v1148_v13, %s4674_s13  ;;  %v3398_v13 = vmul.f32 %v3247_v26, %v1069_v10  ;;  %v752_v26 = vmul.f32 %v750_v9, %v2817_v62  ;;  %v1292_v62 = vmul.f32 %v3365_v43, %v1290_v23  ;;  %v1337_v10 = vstv %s3431_s22  ;;  %s3495_s22 = sld [smem:[#allocation3 + %s264_s19]]  ;;  %s4670_s21 = sadd.s32 9, %s2607_s17 }
  0xb8   : > { %v3321_v54 = vpop.permute.xlu1 %580  ;;  %v1321_v60 = vstv %s3408_s4  ;;  %s3505_s19 = sld [smem:[#allocation3 + %s1416_s30]]  ;;  %s1432_s3 = sadd.s32 %s2609_s18, %s1431_s5 }
  0xb9   : > { %v3326_v24 = vpop.permute.xlu0 %578  ;;  %s908_s10 = sadd.s32 %s2609_s18, %s4670_s21  ;;  %s3532_s5 = sld [smem:[#allocation3 + %s1432_s3]] }
  0xba   : > { %1170 = vrot.lane.b32.xlu1 %v1165_v22, %s2577_s29  ;;  %s419_s3 = sadd.s32 51, %s2607_s17 }
  0xbb   : > { %1168 = vrot.lane.b32.xlu0 %v1164_v15, %s2577_s29  ;;  %v1275_v15 = vmul.f32 %v3373_v3, %v1274_v16  ;;  %v1323_v16 = vmul.f32 %v3365_v43, %v1321_v60 }
  0xbc   : > { %v630_v32 = vpop.permute.xlu1 %629 }
  0xbd   : > { %v628_v34 = vpop.permute.xlu0 %627  ;;  %v634_v22 = vadd.f32 %v630_v32, %v3295_v11 }
  0xbe   : > { %1185 = vrot.lane.b32.xlu1 %v1180_v56, %s2577_s29  ;;  %v633_v56 = vadd.f32 %v628_v34, %v3299_v12  ;;  %v1306_v12 = vstv %s3383_s20  ;;  %s1366_s20 = sadd.s32 125, %s2607_s17 }
  0xbf   : > { %1183 = vrot.lane.b32.xlu0 %v1179_v31, %s2577_s29  ;;  %v751_v31 = vmul.f32 %v750_v9, %v2826_v2  ;;  %v1291_v2 = vmul.f32 %v3373_v3, %v1290_v23  ;;  %s1367_s6 = sadd.s32 %s2609_s18, %s1366_s20  ;;  %v1322_v9 = vmul.f32 %v3373_v3, %v1321_v60  ;;  %s4668_s20 = sadd.s32 31, %s2607_s17  ;;  %v235_v23 = vstv %s3439_s26 }
  0xc0   : > { %v3348_v44 = vpop.permute.xlu1 %644  ;;  %s3482_s4 = sld [smem:[#allocation3 + %s1367_s6]]  ;;  %s353_s6 = sadd.s32 42, %s2607_s17 }
  0xc1   : > { %v3353_v46 = vpop.permute.xlu0 %642  ;;  %s272_s8 = sadd.s32 %s2687_s11, %s4668_s20  ;;  %s1447_s26 = sadd.s32 91, %s2607_s17 }
  0xc2   : > { %4677 = vst [vmem:[#allocation5_spill] sm:$0xff] %v3353_v46  ;;  %1201 = vrot.lane.b32.xlu1 %v1196_v35, %s2577_s29  ;;  %s354_s25 = sadd.s32 %s2687_s11, %s353_s6  ;;  %s1448_s30 = sadd.s32 %s2609_s18, %s1447_s26 }
  0xc3   : > { %1199 = vrot.lane.b32.xlu0 %v1195_v37, %s2577_s29  ;;  %s3537_s20 = sld [smem:[#allocation3 + %s908_s10]]  ;;  %s280_s26 = sadd.s32 %s2687_s11, %s4669_s24 }
  0xc4   : > { %v3370_v63 = vpop.permute.xlu1 %660 }
  0xc5   : > { %v3376_v4 = vpop.permute.xlu0 %658 }
  0xc6   : > { %1217 = vrot.lane.b32.xlu1 %v1212_v57, %s2577_s29  ;;  %v1308_v57 = vmul.f32 %v3365_v43, %v1306_v12 }
  0xc7   : > { %1215 = vrot.lane.b32.xlu0 %v1211_v58, %s2577_s29  ;;  %v1307_v58 = vmul.f32 %v3373_v3, %v1306_v12  ;;  %v1369_v12 = vstv %s3482_s4  ;;  %s3544_s4 = sld [smem:[#allocation3 + %s354_s25]] }
  0xc8   : > { %v3385_v8 = vpop.permute.xlu1 %676  ;;  %s3557_s25 = sld [smem:[#allocation3 + %s1448_s30]] }
  0xc9   : > { %v3391_v27 = vpop.permute.xlu0 %674 }
  0xca   : > { %1265 = vrot.lane.b32.xlu1 %v1260_v5, %s4674_s13 }
  0xcb   : > { %1263 = vrot.lane.b32.xlu0 %v1259_v6, %s4674_s13 }
  0xcc   : > { %v693_v33 = vpop.permute.xlu1 %692 }
  0xcd   : > { %v697_v25 = vadd.f32 %v693_v33, %v634_v22  ;;  %v691_v11 = vpop.permute.xlu0 %690 }
  0xce   : > { %v696_v32 = vadd.f32 %v691_v11, %v633_v56  ;;  %1281 = vrot.lane.b32.xlu1 %v1276_v48, %s4674_s13  ;;  %v1353_v56 = vstv %s3456_s16  ;;  %s444_s16 = sadd.s32 72, %s2607_s17 }
  0xcf   : > { %1279 = vrot.lane.b32.xlu0 %v1275_v15, %s4674_s13  ;;  %v3429_v34 = vadd.f32 %v752_v26, %v697_v25  ;;  %v1339_v15 = vmul.f32 %v3365_v43, %v1337_v10  ;;  %v1338_v26 = vmul.f32 %v3373_v3, %v1337_v10  ;;  %v236_v25 = vmul.f32 %v2742_v39, %v235_v23  ;;  %s445_s10 = sadd.s32 %s2609_s18, %s444_s16  ;;  %s420_s16 = sadd.s32 %s2687_s11, %s419_s3 }
  0xd0   : > { %v3434_v35 = vpop.permute.xlu1 %707  ;;  %v3436_v37 = vadd.f32 %v751_v31, %v696_v32  ;;  %v1355_v11 = vmul.f32 %v3365_v43, %v1353_v56  ;;  %v238_v32 = vstv %s3463_s7  ;;  %v237_v39 = vmul.f32 0.0, %v235_v23  ;;  %s1463_s7 = sadd.s32 127, %s2607_s17  ;;  %v3554_v23 = vld [vmem:[%s2623_s27 + $0x38] sm:$0xff]  ;;  %s3578_s30 = sld [smem:[#allocation3 + %s445_s10]] }
  0xd1   : > { %4679 = vst [vmem:[#allocation6_spill] sm:$0xff] %v3434_v35  ;;  %v3441_v0 = vpop.permute.xlu0 %705  ;;  %v239_v60 = vsub.f32 %v238_v32, %v236_v25  ;;  %v252_v10 = vstv %s3472_s12  ;;  %s1464_s12 = sadd.s32 %s2609_s18, %s1463_s7  ;;  %s4684_s10 = sadd.s32 20, %s2607_s17 }
  0xd2   : > { %4680 = vst [vmem:[#allocation7_spill] sm:$0xff] %v3441_v0  ;;  %1297 = vrot.lane.b32.xlu1 %v1292_v62, %s4674_s13  ;;  %v244_v62 = vstv %s3470_s15  ;;  %s3539_s15 = sld [smem:[#allocation3 + %s272_s8]]  ;;  %s452_s8 = sadd.s32 108, %s2607_s17 }
  0xd3   : > { %1295 = vrot.lane.b32.xlu0 %v1291_v2, %s4674_s13  ;;  %v1354_v2 = vmul.f32 %v3373_v3, %v1353_v56  ;;  %v240_v56 = vsub.f32 %v238_v32, %v237_v39  ;;  %v246_v25 = vmul.f32 %v2977_v42, %v244_v62  ;;  %v253_v32 = vmul.f32 %v2942_v28, %v252_v10  ;;  %s453_s7 = sadd.s32 %s2609_s18, %s452_s8  ;;  %s3586_s24 = sld [smem:[#allocation3 + %s1464_s12]] }
  0xd4   : > { %v3459_v5 = vpop.permute.xlu1 %723  ;;  %v259_v42 = vstv %s3484_s9  ;;  %v1434_v39 = vstv %s3532_s5  ;;  %s3588_s9 = sld [smem:[#allocation3 + %s420_s16]]  ;;  %s1479_s21 = sadd.s32 %s2609_s18, %s4684_s10 }
  0xd5   : > { %v3468_v6 = vpop.permute.xlu0 %721  ;;  %v248_v28 = vsub.f32 %v240_v56, %v246_v25  ;;  %s3599_s8 = sld [smem:[#allocation3 + %s280_s26]]  ;;  %s1494_s5 = sadd.s32 56, %s2607_s17  ;;  %v356_v56 = vstv %s3544_s4  ;;  %v1436_v25 = vmul.f32 %v3554_v23, %v1434_v39 }
  0xd6   : > { %1313 = vrot.lane.b32.xlu1 %v1308_v57, %s4674_s13  ;;  %s3609_s16 = sld [smem:[#allocation3 + %s453_s7]]  ;;  %s1495_s4 = sadd.s32 %s2609_s18, %s1494_s5 }
  0xd7   : > { %1311 = vrot.lane.b32.xlu0 %v1307_v58, %s4674_s13  ;;  %s4685_s26 = sadd.s32 36, %s2607_s17  ;;  %s3647_s5 = sld [smem:[#allocation3 + %s1495_s4]] }
  0xd8   : > { %v3486_v48 = vpop.permute.xlu1 %739  ;;  %s437_s7 = sadd.s32 %s2609_s18, %s4685_s26  ;;  %s4688_s4 = sadd.s32 2, %s2607_s17 }
  0xd9   : > { %v3492_v22 = vpop.permute.xlu0 %737 }
  0xda   : > { %1328 = vrot.lane.b32.xlu1 %v1323_v16, %s2577_s29  ;;  %v245_v16 = vmul.f32 0.0, %v244_v62 }
  0xdb   : > { %1326 = vrot.lane.b32.xlu0 %v1322_v9, %s2577_s29  ;;  %v1371_v9 = vmul.f32 %v3365_v43, %v1369_v12  ;;  %v3564_v43 = vld [vmem:[%s2623_s27 + $0x30] sm:$0xff] }
  0xdc   : > { %v3510_v33 = vpop.permute.xlu1 %788 }
  0xdd   : > { %v3513_v31 = vpop.permute.xlu0 %786 }
  0xde   : > { %1344 = vrot.lane.b32.xlu1 %v1339_v15, %s2577_s29  ;;  %v1370_v15 = vmul.f32 %v3373_v3, %v1369_v12 }
  0xdf   : > { %1342 = vrot.lane.b32.xlu0 %v1338_v26, %s2577_s29  ;;  %v1418_v26 = vstv %s3505_s19  ;;  %s287_s19 = sadd.s32 33, %s2607_s17 }
  0xe0   : > { %v3534_v57 = vpop.permute.xlu1 %803  ;;  %v1420_v62 = vmul.f32 %v3554_v23, %v1418_v26  ;;  %v1419_v12 = vmul.f32 %v3564_v43, %v1418_v26  ;;  %v266_v26 = vstv %s3495_s22  ;;  %s288_s12 = sadd.s32 %s2687_s11, %s287_s19  ;;  %s3619_s22 = sld [smem:[#allocation3 + %s1479_s21]] }
  0xe1   : > { %4682 = vst [vmem:[#allocation8_spill] sm:$0xff] %v3534_v57  ;;  %v3541_v58 = vpop.permute.xlu0 %801  ;;  %v792_v57 = vadd.f32 %v3513_v31, %v3436_v37  ;;  %s1510_s21 = sadd.s32 92, %s2607_s17  ;;  %v447_v31 = vstv %s3578_s30 }
  0xe2   : > { %4683 = vst [vmem:[#allocation9_spill] sm:$0xff] %v3541_v58  ;;  %1360 = vrot.lane.b32.xlu1 %v1355_v11, %s2577_s29  ;;  %s1511_s30 = sadd.s32 %s2609_s18, %s1510_s21  ;;  %s1620_s21 = sadd.s32 %s2687_s11, %s4688_s4 }
  0xe3   : > { %1358 = vrot.lane.b32.xlu0 %v1354_v2, %s2577_s29  ;;  %v247_v2 = vsub.f32 %v239_v60, %v245_v16  ;;  %v910_v16 = vstv %s3537_s20  ;;  %s603_s20 = sadd.s32 75, %s2607_s17 }
  0xe4   : > { %v3561_v11 = vpop.permute.xlu1 %819  ;;  %v912_v58 = vmul.f32 %v3011_v52, %v910_v16  ;;  %s604_s10 = sadd.s32 %s2609_s18, %s603_s20  ;;  %s1526_s20 = sadd.s32 %s2687_s11, %s2607_s17 }
  0xe5   : > { %v3573_v3 = vpop.permute.xlu0 %817 }
  0xe6   : > { %1376 = vrot.lane.b32.xlu1 %v1371_v9, %s2577_s29  ;;  %v3597_v9 = vmul.f32 %v2945_v30, %v259_v42  ;;  %v793_v30 = vadd.f32 %v3510_v33, %v3429_v34  ;;  %v1450_v42 = vstv %s3557_s25  ;;  %v911_v34 = vmul.f32 %v3040_v61, %v910_v16  ;;  %s3628_s25 = sld [smem:[#allocation3 + %s288_s12]] }
  0xe7   : > { %1374 = vrot.lane.b32.xlu0 %v1370_v15, %s2577_s29  ;;  %v254_v15 = vsub.f32 %v247_v2, %v253_v32  ;;  %v1435_v2 = vmul.f32 %v3564_v43, %v1434_v39  ;;  %v267_v33 = vmul.f32 %v266_v26, %v2959_v36  ;;  %v268_v39 = vmul.f32 %v266_v26, %v2967_v40 }
  0xe8   : > { %v3590_v60 = vpop.permute.xlu1 %835  ;;  %v358_v61 = vmul.f32 %v356_v56, %v3205_v49  ;;  %v1452_v36 = vmul.f32 %v3554_v23, %v1450_v42 }
  0xe9   : > { %v3601_v10 = vpop.permute.xlu0 %833 }
  0xea   : > { %1425 = vrot.lane.b32.xlu1 %v1420_v62, %s4674_s13  ;;  %v255_v62 = vsub.f32 %v248_v28, %v253_v32  ;;  %v261_v32 = vsub.f32 %v254_v15, %v3597_v9  ;;  %v1466_v28 = vstv %s3586_s24  ;;  %v422_v15 = vstv %s3588_s9  ;;  %s3659_s24 = sld [smem:[#allocation3 + %s437_s7]]  ;;  %s770_s7 = sadd.s32 114, %s2607_s17 }
  0xeb   : > { %1423 = vrot.lane.b32.xlu0 %v1419_v12, %s4674_s13  ;;  %v274_v12 = vstv %s3539_s15  ;;  %s611_s15 = sadd.s32 111, %s2607_s17  ;;  %s3669_s9 = sld [smem:[#allocation3 + %s604_s10]]  ;;  %v423_v46 = vmul.f32 %v422_v15, %v2970_v41 }
  0xec   : > { %v852_v0 = vpop.permute.xlu1 %851  ;;  %s612_s12 = sadd.s32 %s2609_s18, %s611_s15  ;;  %s3710_s10 = sld [smem:[#allocation3 + %s1620_s21]] }
  0xed   : > { %v856_v52 = vadd.f32 %v852_v0, %v793_v30  ;;  %v850_v35 = vpop.permute.xlu0 %849  ;;  %v1451_v0 = vmul.f32 %v3564_v43, %v1450_v42  ;;  %v275_v30 = vmul.f32 %v274_v12, %v2987_v45  ;;  %v1468_v45 = vmul.f32 %v3554_v23, %v1466_v28  ;;  %s1573_s15 = sadd.s32 %s2609_s18, %s205_s28  ;;  %s930_s21 = sadd.s32 117, %s2607_s17 }
  0xee   : > { %v855_v37 = vadd.f32 %v850_v35, %v792_v57  ;;  %1441 = vrot.lane.b32.xlu1 %v1436_v25, %s4674_s13  ;;  %v262_v35 = vsub.f32 %v255_v62, %v3597_v9  ;;  %v357_v57 = vmul.f32 %v356_v56, %v2970_v41  ;;  %v269_v9 = vadd.f32 %v267_v33, %v261_v32  ;;  %v3665_v62 = vld [vmem:[%s2623_s27 + $0x8] sm:$0xff]  ;;  %s3737_s28 = sld [smem:[#allocation3 + %s1573_s15]]  ;;  %s1081_s15 = sadd.s32 84, %s2607_s17 }
  0xef   : > { %1439 = vrot.lane.b32.xlu0 %v1435_v2, %s4674_s13  ;;  %v3645_v16 = vadd.f32 %v912_v58, %v856_v52  ;;  %v282_v2 = vstv %s3599_s8  ;;  %v276_v58 = vmul.f32 %v274_v12, %v2970_v41  ;;  %v449_v56 = vmul.f32 %v3665_v62, %v447_v31  ;;  %s762_s8 = sadd.s32 78, %s2607_s17 }
  0xf0   : > { %v3652_v26 = vpop.permute.xlu1 %866  ;;  %v3654_v25 = vadd.f32 %v911_v34, %v855_v37  ;;  %v455_v34 = vstv %s3609_s16  ;;  %v360_v12 = vadd.f32 %v358_v61, %v3146_v55  ;;  %v424_v33 = vmul.f32 %v422_v15, %v3205_v49  ;;  %s3680_s16 = sld [smem:[#allocation3 + %s1511_s30]]  ;;  %s763_s26 = sadd.s32 %s2609_s18, %s762_s8 }
  0xf1   : > { %4686 = vst [vmem:[#allocation10_spill] sm:$0xff] %v3652_v26  ;;  %v3662_v42 = vpop.permute.xlu0 %864  ;;  %v1467_v52 = vmul.f32 %v3564_v43, %v1466_v28  ;;  %v1481_v32 = vstv %s3619_s22  ;;  %v270_v37 = vadd.f32 %v268_v39, %v262_v35  ;;  %v283_v61 = vmul.f32 %v282_v2, %v2967_v40  ;;  %s3698_s22 = sld [smem:[#allocation3 + %s612_s12]]  ;;  %s1588_s30 = sadd.s32 58, %s2607_s17 }
  0xf2   : > { %4687 = vst [vmem:[#allocation11_spill] sm:$0xff] %v3662_v42  ;;  %1457 = vrot.lane.b32.xlu1 %v1452_v36, %s4674_s13  ;;  %v359_v36 = vadd.f32 %v357_v57, %v3149_v17  ;;  %v2538_v42 = vld [vmem:[%s2623_s27] sm:$0xff]  ;;  %v277_v39 = vadd.f32 %v275_v30, %v269_v9  ;;  %v290_v35 = vstv %s3628_s25  ;;  %v457_v17 = vmul.f32 %v3665_v62, %v455_v34  ;;  %s3708_s25 = sld [smem:[#allocation3 + %s1526_s20]]  ;;  %s771_s8 = sadd.s32 %s2609_s18, %s770_s7 }
  0xf3   : > { %1455 = vrot.lane.b32.xlu0 %v1451_v0, %s4674_s13  ;;  %v448_v26 = vmul.f32 %v2538_v42, %v447_v31  ;;  %v284_v0 = vmul.f32 %v282_v2, %v2994_v38  ;;  %v1483_v31 = vmul.f32 %v3554_v23, %v1481_v32  ;;  %v451_v40 = vadd.f32 %v449_v56, %v360_v12  ;;  %s3727_s12 = sld [smem:[#allocation3 + %s763_s26]] }
  0xf4   : > { %v3685_v55 = vpop.permute.xlu1 %882  ;;  %v426_v38 = vadd.f32 %v424_v33, %v3190_v59  ;;  %v1482_v57 = vmul.f32 %v3564_v43, %v1481_v32  ;;  %v1497_v15 = vstv %s3647_s5  ;;  %v278_v30 = vadd.f32 %v276_v58, %v270_v37  ;;  %s596_s5 = sadd.s32 %s2609_s18, %s329_s23  ;;  %s922_s23 = sadd.s32 81, %s2607_s17 }
  0xf5   : > { %v3694_v28 = vpop.permute.xlu0 %880  ;;  %v450_v2 = vadd.f32 %v448_v26, %v359_v36  ;;  %v425_v9 = vadd.f32 %v423_v46, %v3192_v18  ;;  %v456_v56 = vmul.f32 %v2538_v42, %v455_v34  ;;  %v285_v33 = vadd.f32 %v283_v61, %v277_v39  ;;  %s3760_s20 = sld [smem:[#allocation3 + %s771_s8]]  ;;  %s923_s4 = sadd.s32 %s2609_s18, %s922_s23 }
  0xf6   : > { %1473 = vrot.lane.b32.xlu1 %v1468_v45, %s4674_s13  ;;  %v291_v45 = vmul.f32 %v290_v35, %v2970_v41  ;;  %v606_v58 = vstv %s3669_s9  ;;  %v1499_v18 = vmul.f32 %v3554_v23, %v1497_v15  ;;  %v506_v46 = vadd.f32 %v3253_v21, %v451_v40  ;;  %s1589_s9 = sadd.s32 %s2609_s18, %s1588_s30  ;;  %s3782_s7 = sld [smem:[#allocation3 + %s923_s4]] }
  0xf7   : > { %1471 = vrot.lane.b32.xlu0 %v1467_v52, %s4674_s13  ;;  %v439_v52 = vstv %s3659_s24  ;;  %v459_v41 = vadd.f32 %v457_v17, %v426_v38  ;;  %v1498_v26 = vmul.f32 %v3564_v43, %v1497_v15  ;;  %v1513_v34 = vstv %s3680_s16  ;;  %s3741_s24 = sld [smem:[#allocation3 + %s596_s5]]  ;;  %s1604_s16 = sadd.s32 94, %s2607_s17 }
  0xf8   : > { %v3713_v59 = vpop.permute.xlu1 %898  ;;  %v286_v32 = vadd.f32 %v284_v0, %v278_v30  ;;  %v292_v37 = vmul.f32 %v290_v35, %v3205_v49  ;;  %v505_v36 = vadd.f32 %v3259_v1, %v450_v2  ;;  %v458_v61 = vadd.f32 %v456_v56, %v425_v9  ;;  %v3756_v1 = vld [vmem:[%s2623_s27 + $0x1] sm:$0xff]  ;;  %s3770_s26 = sld [smem:[#allocation3 + %s1589_s9]]  ;;  %s1089_s8 = sadd.s32 120, %s2607_s17 }
  0xf9   : > { %v3722_v12 = vpop.permute.xlu0 %896  ;;  %v440_v39 = vmul.f32 %v2538_v42, %v439_v52  ;;  %v569_v17 = vadd.f32 %v3310_v14, %v506_v46  ;;  %v607_v35 = vmul.f32 %v3756_v1, %v606_v58  ;;  %v614_v38 = vstv %s3698_s22  ;;  %s1605_s22 = sadd.s32 %s2609_s18, %s1604_s16  ;;  %s755_s23 = sadd.s32 %s2609_s18, %s353_s6 }
  0xfa   : > { %1488 = vrot.lane.b32.xlu1 %v1483_v31, %s2577_s29  ;;  %v3748_v31 = vld [vmem:[%s2623_s27 + $0x9] sm:$0xff]  ;;  %v568_v49 = vadd.f32 %v3313_v19, %v505_v36  ;;  %v1515_v14 = vmul.f32 %v3554_v23, %v1513_v34  ;;  %v293_v42 = vadd.f32 %v291_v45, %v285_v33  ;;  %v1514_v19 = vmul.f32 %v3564_v43, %v1513_v34  ;;  %s3797_s5 = sld [smem:[#allocation3 + %s1605_s22]]  ;;  %s4689_s6 = sadd.s32 23, %s2607_s17 }
  0xfb   : > { %1486 = vrot.lane.b32.xlu0 %v1482_v57, %s2577_s29  ;;  %v608_v0 = vmul.f32 %v3748_v31, %v606_v58  ;;  %v522_v57 = vadd.f32 %v3269_v50, %v459_v41  ;;  %v1528_v15 = vstv %s3708_s25  ;;  %v294_v30 = vadd.f32 %v292_v37, %v286_v32  ;;  %s931_s25 = sadd.s32 %s2609_s18, %s930_s21  ;;  %s1650_s16 = sadd.s32 59, %s2607_s17 }
  0xfc   : > { %v3743_v21 = vpop.permute.xlu1 %948  ;;  %v441_v2 = vmul.f32 %v3665_v62, %v439_v52  ;;  %v521_v9 = vadd.f32 %v3275_v53, %v458_v61  ;;  %v616_v33 = vmul.f32 %v3748_v31, %v614_v38  ;;  %v615_v58 = vmul.f32 %v3756_v1, %v614_v38  ;;  %v3804_v61 = vld [vmem:[%s2623_s27 + $0x31] sm:$0xff]  ;;  %s3818_s30 = sld [smem:[#allocation3 + %s931_s25]] }
  0xfd   : > { %v3751_v40 = vpop.permute.xlu0 %946  ;;  %v585_v50 = vadd.f32 %v3321_v54, %v522_v57  ;;  %v610_v45 = vadd.f32 %v608_v0, %v569_v17  ;;  %v609_v53 = vadd.f32 %v607_v35, %v568_v49  ;;  %v765_v52 = vstv %s3727_s12  ;;  %v3809_v17 = vld [vmem:[%s2623_s27 + $0xa] sm:$0xff]  ;;  %v3813_v49 = vld [vmem:[%s2623_s27 + $0x2] sm:$0xff]  ;;  %s1082_s12 = sadd.s32 %s2609_s18, %s1081_s15  ;;  %s3864_s4 = sld [smem:[#allocation3 + %s755_s23]] }
  0xfe   : > { %1504 = vrot.lane.b32.xlu1 %v1499_v18, %s2577_s29  ;;  %v584_v62 = vadd.f32 %v3326_v24, %v521_v9  ;;  %v1530_v54 = vmul.f32 %v3554_v23, %v1528_v15  ;;  %v442_v46 = vadd.f32 %v440_v39, %v293_v42  ;;  %v3794_v24 = vld [vmem:[%s2623_s27 + $0x39] sm:$0xff]  ;;  %v1575_v34 = vstv %s3737_s28  ;;  %s1635_s28 = sadd.s32 %s2609_s18, %s4689_s6  ;;  %s3851_s9 = sld [smem:[#allocation3 + %s1082_s12]] }
  0xff   : > { %1502 = vrot.lane.b32.xlu0 %v1498_v26, %s2577_s29  ;;  %v665_v41 = vadd.f32 %v3370_v63, %v610_v45  ;;  %v1529_v26 = vmul.f32 %v3564_v43, %v1528_v15  ;;  %v443_v32 = vadd.f32 %v441_v2, %v294_v30  ;;  %v598_v37 = vstv %s3741_s24  ;;  %s3872_s21 = sld [smem:[#allocation3 + %s1635_s28]]  ;;  %s4690_s24 = sadd.s32 45, %s2607_s17 }
 0x100   : > { %v3774_v56 = vpop.permute.xlu1 %963  ;;  %v664_v23 = vadd.f32 %v3376_v4, %v609_v53  ;;  %v1622_v63 = vstv %s3710_s10  ;;  %v618_v39 = vadd.f32 %v616_v33, %v585_v50  ;;  %v767_v0 = vmul.f32 %v3809_v17, %v765_v52  ;;  %s4691_s10 = sadd.s32 3, %s2607_s17  ;;  %s4693_s6 = sadd.s32 25, %s2607_s17 }
 0x101   : > { %v3780_v18 = vpop.permute.xlu0 %961  ;;  %v728_v43 = vadd.f32 %v3459_v5, %v665_v41  ;;  %v766_v4 = vmul.f32 %v3813_v49, %v765_v52  ;;  %v617_v38 = vadd.f32 %v615_v58, %v584_v62  ;;  %v773_v5 = vstv %s3760_s20  ;;  %s1090_s20 = sadd.s32 %s2609_s18, %s1089_s8  ;;  %s1682_s12 = sadd.s32 %s2687_s11, %s4691_s10 }
 0x102   : > { %1520 = vrot.lane.b32.xlu1 %v1515_v14, %s2577_s29  ;;  %v727_v14 = vadd.f32 %v3468_v6, %v664_v23  ;;  %v1577_v42 = vmul.f32 %v3794_v24, %v1575_v34  ;;  %v681_v57 = vadd.f32 %v3385_v8, %v618_v39  ;;  %v1591_v6 = vstv %s3770_s26  ;;  %s1651_s26 = sadd.s32 %s2609_s18, %s1650_s16  ;;  %s3886_s22 = sld [smem:[#allocation3 + %s1090_s20]] }
 0x103   : > { %1518 = vrot.lane.b32.xlu0 %v1514_v19, %s2577_s29  ;;  %v1576_v19 = vmul.f32 %v3804_v61, %v1575_v34  ;;  %v3836_v15 = vmul.f32 %v3794_v24, %v1622_v63  ;;  %v489_v30 = vadd.f32 %v3214_v7, %v442_v46  ;;  %v490_v2 = vadd.f32 %v3234_v20, %v443_v32  ;;  %v3882_v34 = vld [vmem:[%s2623_s27 + $0x18] sm:$0xff]  ;;  %s3901_s25 = sld [smem:[#allocation3 + %s1651_s26]]  ;;  %s1729_s28 = sadd.s32 %s2609_s18, %s4693_s6 }
 0x104   : > { %v3801_v36 = vpop.permute.xlu1 %979  ;;  %v3843_v8 = vmul.f32 %v3748_v31, %v598_v37  ;;  %v680_v9 = vadd.f32 %v3391_v27, %v617_v38  ;;  %v744_v45 = vadd.f32 %v3486_v48, %v681_v57  ;;  %v769_v33 = vadd.f32 %v767_v0, %v728_v43  ;;  %s3960_s23 = sld [smem:[#allocation3 + %s1682_s12]]  ;;  %s1225_s16 = sadd.s32 15, %s2607_s17 }
 0x105   : > { %v3816_v35 = vpop.permute.xlu0 %977  ;;  %v775_v7 = vmul.f32 %v3809_v17, %v773_v5  ;;  %v925_v58 = vstv %s3782_s7  ;;  %v768_v31 = vadd.f32 %v766_v4, %v727_v14  ;;  %v774_v62 = vmul.f32 %v3813_v49, %v773_v5  ;;  %s1666_s7 = sadd.s32 95, %s2607_s17  ;;  %s4696_s20 = sadd.s32 48, %s2607_s17 }
 0x106   : > { %1535 = vrot.lane.b32.xlu1 %v1530_v54, %s2577_s29  ;;  %v743_v27 = vadd.f32 %v3492_v22, %v680_v9  ;;  %v1593_v48 = vmul.f32 %v3794_v24, %v1591_v6  ;;  %v824_v53 = vadd.f32 %v3561_v11, %v769_v33  ;;  %v953_v52 = vadd.f32 %v3743_v21, %v3645_v16  ;;  %s1667_s15 = sadd.s32 %s2609_s18, %s1666_s7  ;;  %v3935_v9 = vld [vmem:[%s2623_s27 + $0x21] sm:$0xff]  ;;  %s1226_s7 = sadd.s32 %s2609_s18, %s1225_s16 }
 0x107   : > { %1533 = vrot.lane.b32.xlu0 %v1529_v26, %s2577_s29  ;;  %v1592_v22 = vmul.f32 %v3804_v61, %v1591_v6  ;;  %v1607_v54 = vstv %s3797_s5  ;;  %v823_v46 = vadd.f32 %v3573_v3, %v768_v31  ;;  %v952_v41 = vadd.f32 %v3751_v40, %v3654_v25  ;;  %v3878_v26 = vld [vmem:[%s2623_s27 + $0x20] sm:$0xff]  ;;  %s915_s5 = sadd.s32 %s2609_s18, %s4690_s24  ;;  %s1240_s10 = sadd.s32 87, %s2607_s17 }
 0x108   : > { %v3846_v50 = vpop.permute.xlu1 %995  ;;  %v927_v11 = vmul.f32 %v3878_v26, %v925_v58  ;;  %v926_v16 = vmul.f32 %v3882_v34, %v925_v58  ;;  %v777_v32 = vadd.f32 %v775_v7, %v744_v45  ;;  %v887_v23 = vadd.f32 %v3685_v55, %v824_v53  ;;  %s3949_s8 = sld [smem:[#allocation3 + %s915_s5]]  ;;  %s4701_s12 = sadd.s32 5, %s2607_s17 }
 0x109   : > { %v3856_v20 = vpop.permute.xlu0 %993  ;;  %v933_v3 = vstv %s3818_s30  ;;  %v776_v25 = vadd.f32 %v774_v62, %v743_v27  ;;  %v886_v40 = vadd.f32 %v3694_v28, %v823_v46  ;;  %v1609_v4 = vmul.f32 %v3794_v24, %v1607_v54  ;;  %s3932_s30 = sld [smem:[#allocation3 + %s1667_s15]]  ;;  %s1241_s6 = sadd.s32 %s2609_s18, %s1240_s10 }
 0x10a   : > { %1582 = vrot.lane.b32.xlu1 %v1577_v42, %s4674_s13  ;;  %v553_v38 = vadd.f32 %v3297_v29, %v490_v2  ;;  %v840_v14 = vadd.f32 %v3590_v60, %v777_v32  ;;  %v1608_v55 = vmul.f32 %v3804_v61, %v1607_v54  ;;  %v599_v28 = vmul.f32 %v3756_v1, %v598_v37  ;;  %s4015_s5 = sld [smem:[#allocation3 + %s1226_s7]] }
 0x10b   : > { %1580 = vrot.lane.b32.xlu0 %v1576_v19, %s4674_s13  ;;  %v839_v42 = vadd.f32 %v3601_v10, %v776_v25  ;;  %v1084_v57 = vstv %s3851_s9  ;;  %v929_v6 = vadd.f32 %v927_v11, %v887_v23  ;;  %v935_v1 = vmul.f32 %v3878_v26, %v933_v3  ;;  %s1744_s9 = sadd.s32 61, %s2607_s17 }
 0x10c   : > { %v1012_v21 = vpop.permute.xlu1 %1011  ;;  %v903_v19 = vadd.f32 %v3713_v59, %v840_v14  ;;  %v928_v2 = vadd.f32 %v926_v16, %v886_v40  ;;  %v602_v59 = vadd.f32 %v3843_v8, %v553_v38  ;;  %v1086_v45 = vmul.f32 %v3935_v9, %v1084_v57  ;;  %v4692_v16 = vld [vmem:[#allocation5_spill] sm:$0xff]  ;;  %s1745_s26 = sadd.s32 %s2609_s18, %s1744_s9  ;;  %s1248_s9 = sadd.s32 123, %s2607_s17 }
 0x10d   : > { %v1016_v39 = vadd.f32 %v1012_v21, %v953_v52  ;;  %v1010_v43 = vpop.permute.xlu0 %1009  ;;  %v902_v37 = vadd.f32 %v3722_v12, %v839_v42  ;;  %v1637_v12 = vstv %s3872_s21  ;;  %v757_v33 = vstv %s3864_s4  ;;  %s1074_s4 = sadd.s32 %s2609_s18, %s4696_s20  ;;  %s3987_s21 = sld [smem:[#allocation3 + %s1729_s28]] }
 0x10e   : > { %v1015_v0 = vadd.f32 %v1010_v43, %v952_v41  ;;  %1598 = vrot.lane.b32.xlu1 %v1593_v48, %s4674_s13  ;;  %v983_v7 = vadd.f32 %v3816_v35, %v928_v2  ;;  %v649_v27 = vadd.f32 %v3348_v44, %v602_v59  ;;  %v937_v62 = vadd.f32 %v935_v1, %v903_v19  ;;  %s4009_s15 = sld [smem:[#allocation3 + %s1745_s26]]  ;;  %v4698_v59 = vld [vmem:[#allocation9_spill] sm:$0xff]  ;;  %s4702_s20 = sadd.s32 26, %s2607_s17 }
 0x10f   : > { %1596 = vrot.lane.b32.xlu0 %v1592_v22, %s4674_s13  ;;  %v3899_v5 = vadd.f32 %v3398_v13, %v1016_v39  ;;  %v552_v13 = vadd.f32 %v3302_v47, %v489_v30  ;;  %v1623_v47 = vmul.f32 %v3804_v61, %v1622_v63  ;;  %v984_v30 = vadd.f32 %v3801_v36, %v929_v6  ;;  %v3941_v63 = vld [vmem:[%s2623_s27 + $0x19] sm:$0xff]  ;;  %s1806_s26 = sadd.s32 62, %s2607_s17 }
 0x110   : > { %v3907_v29 = vpop.permute.xlu1 %1026  ;;  %v3910_v60 = vadd.f32 %v3401_v51, %v1015_v0  ;;  %v934_v51 = vmul.f32 %v3882_v34, %v933_v3  ;;  %v1085_v8 = vmul.f32 %v3941_v63, %v1084_v57  ;;  %v1092_v36 = vstv %s3886_s22  ;;  %v4694_v3 = vld [vmem:[#allocation6_spill] sm:$0xff]  ;;  %v4695_v0 = vld [vmem:[#allocation7_spill] sm:$0xff]  ;;  %s1760_s22 = sadd.s32 97, %s2607_s17 }
 0x111   : > { %v3917_v10 = vpop.permute.xlu0 %1024  ;;  %v601_v31 = vadd.f32 %v599_v28, %v552_v13  ;;  %v1639_v22 = vmul.f32 %v3794_v24, %v1637_v12  ;;  %v1638_v54 = vmul.f32 %v3804_v61, %v1637_v12  ;;  %v1000_v46 = vadd.f32 %v3846_v50, %v937_v62  ;;  %s1761_s24 = sadd.s32 %s2609_s18, %s1760_s22  ;;  %v4035_v62 = vld [vmem:[%s2623_s27 + $0x3a] sm:$0xff]  ;;  %s1249_s22 = sadd.s32 %s2609_s18, %s1248_s9 }
 0x112   : > { %1614 = vrot.lane.b32.xlu1 %v1609_v4, %s4674_s13  ;;  %v936_v52 = vadd.f32 %v934_v51, %v902_v37  ;;  %v1653_v44 = vstv %s3901_s25  ;;  %v1094_v11 = vmul.f32 %v3935_v9, %v1092_v36  ;;  %v1093_v50 = vmul.f32 %v3941_v63, %v1092_v36  ;;  %s4002_s25 = sld [smem:[#allocation3 + %s1074_s4]]  ;;  %v4697_v37 = vld [vmem:[#allocation8_spill] sm:$0xff]  ;;  %s1791_s4 = sadd.s32 %s2609_s18, %s4702_s20 }
 0x113   : > { %1612 = vrot.lane.b32.xlu0 %v1608_v55, %s4674_s13  ;;  %v648_v21 = vadd.f32 %v4692_v16, %v601_v31  ;;  %v712_v39 = vadd.f32 %v4694_v3, %v649_v27  ;;  %v759_v43 = vmul.f32 %v3809_v17, %v757_v33  ;;  %v758_v4 = vmul.f32 %v3813_v49, %v757_v33  ;;  %s4084_s7 = sld [smem:[#allocation3 + %s1791_s4]]  ;;  %s1917_s4 = sadd.s32 100, %s2607_s17 }
 0x114   : > { %v1043_v58 = vpop.permute.xlu1 %1042  ;;  %v1655_v14 = vmul.f32 %v3794_v24, %v1653_v44  ;;  %v1654_v17 = vmul.f32 %v3804_v61, %v1653_v44  ;;  %v1669_v55 = vstv %s3932_s30  ;;  %v917_v6 = vstv %s3949_s8  ;;  %s1233_s30 = sadd.s32 %s2609_s18, %s419_s3  ;;  %s1776_s8 = sadd.s32 %s2687_s11, %s4701_s12 }
 0x115   : > { %v1047_v48 = vadd.f32 %v1043_v58, %v984_v30  ;;  %v1041_v53 = vpop.permute.xlu0 %1040  ;;  %v761_v57 = vadd.f32 %v759_v43, %v712_v39  ;;  %v1671_v1 = vmul.f32 %v3794_v24, %v1669_v55  ;;  %v1670_v51 = vmul.f32 %v3804_v61, %v1669_v55  ;;  %s4038_s3 = sld [smem:[#allocation3 + %s1761_s24]]  ;;  %s1822_s24 = sadd.s32 98, %s2607_s17 }
 0x116   : > { %v1046_v35 = vadd.f32 %v1041_v53, %v983_v7  ;;  %1629 = vrot.lane.b32.xlu1 %v3836_v15, %s4674_s13  ;;  %v999_v15 = vadd.f32 %v3856_v20, %v936_v52  ;;  %v711_v20 = vadd.f32 %v4695_v0, %v648_v21  ;;  %v919_v7 = vmul.f32 %v3878_v26, %v917_v6  ;;  %v4043_v53 = vld [vmem:[%s2623_s27 + $0x32] sm:$0xff]  ;;  %s4050_s28 = sld [smem:[#allocation3 + %s1776_s8]]  ;;  %s4703_s12 = sadd.s32 6, %s2607_s17 }
 0x117   : > { %1627 = vrot.lane.b32.xlu0 %v1623_v47, %s4674_s13  ;;  %v3958_v41 = vadd.f32 %v1086_v45, %v1047_v48  ;;  %v808_v2 = vadd.f32 %v4697_v37, %v761_v57  ;;  %v1684_v47 = vstv %s3960_s23  ;;  %v4699_v45 = vld [vmem:[#allocation10_spill] sm:$0xff]  ;;  %v918_v27 = vmul.f32 %v3882_v34, %v917_v6  ;;  %s4045_s23 = sld [smem:[#allocation3 + %s1233_s30]]  ;;  %s1823_s30 = sadd.s32 %s2609_s18, %s1822_s24 }
 0x118   : > { %v1059_v32 = vpop.permute.xlu1 %1058  ;;  %v3965_v23 = vadd.f32 %v1085_v8, %v1046_v35  ;;  %v760_v19 = vadd.f32 %v758_v4, %v711_v20  ;;  %v4700_v8 = vld [vmem:[#allocation11_spill] sm:$0xff]  ;;  %v1686_v31 = vmul.f32 %v3794_v24, %v1684_v47  ;;  %v1685_v26 = vmul.f32 %v3804_v61, %v1684_v47  ;;  %v2548_v20 = vld [vmem:[%s2623_s27 + $0x1a] sm:$0xff]  ;;  %s4119_s10 = sld [smem:[#allocation3 + %s1823_s30]]  ;;  %s1838_s8 = sadd.s32 %s2687_s11, %s4703_s12 }
 0x119   : > { %v1063_v25 = vadd.f32 %v1059_v32, %v1000_v46  ;;  %v1057_v40 = vpop.permute.xlu0 %1056  ;;  %v871_v33 = vadd.f32 %v4699_v45, %v808_v2  ;;  %v1731_v48 = vstv %s3987_s21  ;;  %v1747_v16 = vstv %s4009_s15  ;;  %s4067_s21 = sld [smem:[#allocation3 + %s1241_s6]]  ;;  %s4706_s30 = sadd.s32 8, %s2607_s17 }
 0x11a   : > { %v1062_v38 = vadd.f32 %v1057_v40, %v999_v15  ;;  %1644 = vrot.lane.b32.xlu1 %v1639_v22, %s2577_s29  ;;  %v807_v30 = vadd.f32 %v4698_v59, %v760_v19  ;;  %v1733_v46 = vmul.f32 %v4035_v62, %v1731_v48  ;;  %v1228_v32 = vstv %s4015_s5  ;;  %v2547_v40 = vld [vmem:[%s2623_s27 + $0x22] sm:$0xff]  ;;  %s4092_s15 = sld [smem:[#allocation3 + %s1249_s22]]  ;;  %s1392_s22 = sadd.s32 54, %s2607_s17 }
 0x11b   : > { %1642 = vrot.lane.b32.xlu0 %v1638_v54, %s2577_s29  ;;  %v3985_v28 = vadd.f32 %v1094_v11, %v1063_v25  ;;  %v921_v52 = vadd.f32 %v919_v7, %v871_v33  ;;  %v1076_v54 = vstv %s4002_s25  ;;  %v1732_v11 = vmul.f32 %v4043_v53, %v1731_v48  ;;  %s1807_s25 = sadd.s32 %s2609_s18, %s1806_s26  ;;  %s1393_s24 = sadd.s32 %s2609_s18, %s1392_s22 }
 0x11c   : > { %v3989_v49 = vpop.permute.xlu1 %1107  ;;  %v3991_v42 = vadd.f32 %v1093_v50, %v1062_v38  ;;  %v870_v36 = vadd.f32 %v4700_v8, %v807_v30  ;;  %v1077_v39 = vmul.f32 %v3941_v63, %v1076_v54  ;;  %v1749_v43 = vmul.f32 %v4035_v62, %v1747_v16  ;;  %s4103_s5 = sld [smem:[#allocation3 + %s1807_s25]]  ;;  %s1918_s25 = sadd.s32 %s2609_s18, %s1917_s4 }
 0x11d   : > { %v3994_v13 = vpop.permute.xlu0 %1105  ;;  %v968_v44 = vadd.f32 %v3774_v56, %v921_v52  ;;  %v1078_v56 = vmul.f32 %v3935_v9, %v1076_v54  ;;  %v1748_v9 = vmul.f32 %v4043_v53, %v1747_v16  ;;  %v1763_v25 = vstv %s4038_s3  ;;  %s4138_s3 = sld [smem:[#allocation3 + %s1838_s8]]  ;;  %s1963_s4 = sadd.s32 65, %s2607_s17 }
 0x11e   : > { %1660 = vrot.lane.b32.xlu1 %v1655_v14, %s2577_s29  ;;  %v920_v22 = vadd.f32 %v918_v27, %v870_v36  ;;  %v1111_v63 = vadd.f32 %v3994_v13, %v3910_v60  ;;  %v1229_v4 = vmul.f32 %v2548_v20, %v1228_v32  ;;  %v1235_v38 = vstv %s4045_s23  ;;  %s4704_s23 = sadd.s32 28, %s2607_s17  ;;  %s4188_s12 = sld [smem:[#allocation3 + %s1918_s25]] }
 0x11f   : > { %1658 = vrot.lane.b32.xlu0 %v1654_v17, %s2577_s29  ;;  %v1031_v50 = vadd.f32 %v3907_v29, %v968_v44  ;;  %v1112_v29 = vadd.f32 %v3989_v49, %v3899_v5  ;;  %v1765_v57 = vmul.f32 %v4035_v62, %v1763_v25  ;;  %v1778_v60 = vstv %s4050_s28  ;;  %s1886_s6 = sadd.s32 %s2609_s18, %s4704_s23  ;;  %s1901_s28 = sadd.s32 64, %s2607_s17 }
 0x120   : > { %v4012_v12 = vpop.permute.xlu1 %1122  ;;  %v967_v21 = vadd.f32 %v3780_v18, %v920_v22  ;;  %v1764_v19 = vmul.f32 %v4043_v53, %v1763_v25  ;;  %v1236_v47 = vmul.f32 %v2548_v20, %v1235_v38  ;;  %v1243_v59 = vstv %s4067_s21  ;;  %s4155_s9 = sld [smem:[#allocation3 + %s1886_s6]]  ;;  %s1902_s20 = sadd.s32 %s2609_s18, %s1901_s28 }
 0x121   : > { %v4019_v58 = vpop.permute.xlu0 %1120  ;;  %v1080_v5 = vadd.f32 %v1078_v56, %v1031_v50  ;;  %v1780_v33 = vmul.f32 %v4035_v62, %v1778_v60  ;;  %v1779_v7 = vmul.f32 %v4043_v53, %v1778_v60  ;;  %v1793_v8 = vstv %s4084_s7  ;;  %s4705_s21 = sadd.s32 18, %s2607_s17  ;;  %s4170_s7 = sld [smem:[#allocation3 + %s1902_s20]] }
 0x122   : > { %1676 = vrot.lane.b32.xlu1 %v1671_v1, %s2577_s29  ;;  %v1030_v18 = vadd.f32 %v3917_v10, %v967_v21  ;;  %v1230_v10 = vmul.f32 %v2547_v40, %v1228_v32  ;;  %v1237_v1 = vmul.f32 %v2547_v40, %v1235_v38  ;;  %v1245_v27 = vmul.f32 %v2547_v40, %v1243_v59  ;;  %s1385_s26 = sadd.s32 %s2609_s18, %s4705_s21  ;;  %s4193_s8 = sld [smem:[#allocation3 + %s1393_s24]] }
 0x123   : > { %1674 = vrot.lane.b32.xlu0 %v1670_v51, %s2577_s29  ;;  %v1127_v13 = vadd.f32 %v4012_v12, %v1080_v5  ;;  %v1244_v52 = vmul.f32 %v2548_v20, %v1243_v59  ;;  %v1251_v22 = vstv %s4092_s15  ;;  %v1794_v44 = vmul.f32 %v4043_v53, %v1793_v8  ;;  %s4173_s15 = sld [smem:[#allocation3 + %s1385_s26]]  ;;  %v4185_v5 = vld [vmem:[%s2623_s27 + $0x50] sm:$0xff]  ;;  %s1408_s6 = sadd.s32 126, %s2607_s17 }
 0x124   : > { %v4040_v34 = vpop.permute.xlu1 %1138  ;;  %v1079_v55 = vadd.f32 %v1077_v39, %v1030_v18  ;;  %v1253_v16 = vmul.f32 %v2547_v40, %v1251_v22  ;;  %v1252_v56 = vmul.f32 %v2548_v20, %v1251_v22  ;;  %s4707_s28 = sadd.s32 29, %s2607_s17  ;;  %s1409_s21 = sadd.s32 %s2609_s18, %s1408_s6 }
 0x125   : > { %v4047_v35 = vpop.permute.xlu0 %1136  ;;  %s1964_s22 = sadd.s32 %s2609_s18, %s1963_s4  ;;  %s1979_s25 = sadd.s32 101, %s2607_s17 }
 0x126   : > { %1691 = vrot.lane.b32.xlu1 %v1686_v31, %s2577_s29  ;;  %v1126_v37 = vadd.f32 %v4019_v58, %v1079_v55  ;;  %v1143_v58 = vadd.f32 %v4040_v34, %v3958_v41  ;;  %v1142_v31 = vadd.f32 %v4047_v35, %v3965_v23  ;;  %v1809_v35 = vstv %s4103_s5  ;;  %s1400_s5 = sadd.s32 90, %s2607_s17  ;;  %v4191_v55 = vld [vmem:[%s2623_s27 + $0x48] sm:$0xff]  ;;  %s1980_s24 = sadd.s32 %s2609_s18, %s1979_s25 }
 0x127   : > { %1689 = vrot.lane.b32.xlu0 %v1685_v26, %s2577_s29  ;;  %v1811_v39 = vmul.f32 %v4035_v62, %v1809_v35 }
 0x128   : > { %v4061_v15 = vpop.permute.xlu1 %1154 }
 0x129   : > { %v4071_v3 = vpop.permute.xlu0 %1152  ;;  %v1159_v23 = vadd.f32 %v4061_v15, %v3985_v28 }
 0x12a   : > { %1738 = vrot.lane.b32.xlu1 %v1733_v46, %s4674_s13  ;;  %v1795_v46 = vmul.f32 %v4035_v62, %v1793_v8  ;;  %v1158_v21 = vadd.f32 %v4071_v3, %v3991_v42  ;;  %v1810_v42 = vmul.f32 %v4043_v53, %v1809_v35  ;;  %v1825_v3 = vstv %s4119_s10  ;;  %s1933_s10 = sadd.s32 %s2687_s11, %s4706_s30  ;;  %s4708_s30 = sadd.s32 9, %s2607_s17 }
 0x12b   : > { %1736 = vrot.lane.b32.xlu0 %v1732_v11, %s4674_s13  ;;  %v1827_v40 = vmul.f32 %v4035_v62, %v1825_v3  ;;  %s4198_s23 = sld [smem:[#allocation3 + %s1933_s10]]  ;;  %s1995_s10 = sadd.s32 %s2687_s11, %s4708_s30 }
 0x12c   : > { %v1171_v0 = vpop.permute.xlu1 %1170  ;;  %s4713_s30 = sadd.s32 21, %s2607_s17 }
 0x12d   : > { %v1175_v14 = vadd.f32 %v1171_v0, %v1112_v29  ;;  %v1169_v17 = vpop.permute.xlu0 %1168 }
 0x12e   : > { %v1174_v49 = vadd.f32 %v1169_v17, %v1111_v63  ;;  %1754 = vrot.lane.b32.xlu1 %v1749_v43, %s4674_s13  ;;  %v1840_v63 = vstv %s4138_s3  ;;  %s1401_s3 = sadd.s32 %s2609_s18, %s1400_s5  ;;  %s4251_s5 = sld [smem:[#allocation3 + %s1980_s24]] }
 0x12f   : > { %1752 = vrot.lane.b32.xlu0 %v1748_v9, %s4674_s13  ;;  %v4101_v6 = vadd.f32 %v1230_v10, %v1175_v14  ;;  %v1826_v10 = vmul.f32 %v4043_v53, %v1825_v3  ;;  %v1841_v38 = vmul.f32 %v4043_v53, %v1840_v63  ;;  %v1888_v14 = vstv %s4155_s9  ;;  %s1948_s9 = sadd.s32 %s2609_s18, %s4707_s28  ;;  %s4212_s20 = sld [smem:[#allocation3 + %s1401_s3]] }
 0x130   : > { %v1186_v2 = vpop.permute.xlu1 %1185  ;;  %v4106_v51 = vadd.f32 %v1229_v4, %v1174_v49  ;;  %v1842_v4 = vmul.f32 %v4035_v62, %v1840_v63  ;;  %v1889_v60 = vmul.f32 %v4191_v55, %v1888_v14  ;;  %s4224_s26 = sld [smem:[#allocation3 + %s1948_s9]]  ;;  %s2073_s9 = sadd.s32 103, %s2607_s17 }
 0x131   : > { %v1190_v30 = vadd.f32 %v1186_v2, %v1127_v13  ;;  %v1184_v12 = vpop.permute.xlu0 %1183  ;;  %v1904_v13 = vstv %s4170_s7  ;;  %s4231_s7 = sld [smem:[#allocation3 + %s1409_s21]]  ;;  %v1935_v22 = vstv %s4198_s23  ;;  %s2057_s23 = sadd.s32 67, %s2607_s17 }
 0x132   : > { %v1189_v45 = vadd.f32 %v1184_v12, %v1126_v37  ;;  %1770 = vrot.lane.b32.xlu1 %v1765_v57, %s4674_s13  ;;  %v1890_v57 = vmul.f32 %v4185_v5, %v1888_v14  ;;  %v1906_v2 = vmul.f32 %v4185_v5, %v1904_v13  ;;  %v1905_v59 = vmul.f32 %v4191_v55, %v1904_v13  ;;  %v2549_v12 = vld [vmem:[%s2623_s27 + $0x38] sm:$0xff]  ;;  %s2058_s28 = sadd.s32 %s2609_s18, %s2057_s23  ;;  %s2074_s4 = sadd.s32 %s2609_s18, %s2073_s9 }
 0x133   : > { %1768 = vrot.lane.b32.xlu0 %v1764_v19, %s4674_s13  ;;  %v4117_v36 = vadd.f32 %v1237_v1, %v1190_v30  ;;  %v1387_v1 = vstv %s4173_s15  ;;  %v1920_v30 = vstv %s4188_s12  ;;  %s4240_s15 = sld [smem:[#allocation3 + %s1964_s22]]  ;;  %s4712_s24 = sadd.s32 32, %s2607_s17 }
 0x134   : > { %v1202_v26 = vpop.permute.xlu1 %1201  ;;  %v4123_v48 = vadd.f32 %v1236_v47, %v1189_v45  ;;  %v1389_v45 = vmul.f32 %v2549_v12, %v1387_v1  ;;  %s4266_s12 = sld [smem:[#allocation3 + %s1995_s10]]  ;;  %s1543_s10 = sadd.s32 %s2609_s18, %s4713_s30 }
 0x135   : > { %v1206_v41 = vadd.f32 %v1202_v26, %v1143_v58  ;;  %v1200_v34 = vpop.permute.xlu0 %1199  ;;  %v2550_v58 = vld [vmem:[%s2623_s27 + $0x30] sm:$0xff]  ;;  %s4299_s21 = sld [smem:[#allocation3 + %s2074_s4]]  ;;  %s1558_s4 = sadd.s32 93, %s2607_s17 }
 0x136   : > { %v1205_v54 = vadd.f32 %v1200_v34, %v1142_v31  ;;  %1785 = vrot.lane.b32.xlu1 %v1780_v33, %s4674_s13  ;;  %v1388_v8 = vmul.f32 %v2550_v58, %v1387_v1 }
 0x137   : > { %1783 = vrot.lane.b32.xlu0 %v1779_v7, %s4674_s13  ;;  %v4136_v11 = vadd.f32 %v1245_v27, %v1206_v41  ;;  %v1395_v27 = vstv %s4193_s8  ;;  %v1921_v41 = vmul.f32 %v4191_v55, %v1920_v30  ;;  %s4709_s8 = sadd.s32 31, %s2607_s17 }
 0x138   : > { %v1218_v32 = vpop.permute.xlu1 %1217  ;;  %v4142_v50 = vadd.f32 %v1244_v52, %v1205_v54  ;;  %v1922_v52 = vmul.f32 %v4185_v5, %v1920_v30  ;;  %v1397_v54 = vmul.f32 %v2549_v12, %v1395_v27  ;;  %v1396_v35 = vmul.f32 %v2550_v58, %v1395_v27  ;;  %s2042_s3 = sadd.s32 %s2609_s18, %s4709_s8  ;;  %s1550_s8 = sadd.s32 57, %s2607_s17 }
 0x139   : > { %v1222_v28 = vadd.f32 %v1218_v32, %v1159_v23  ;;  %v1216_v15 = vpop.permute.xlu0 %1215  ;;  %s4279_s6 = sld [smem:[#allocation3 + %s2042_s3]]  ;;  %s1551_s9 = sadd.s32 %s2609_s18, %s1550_s8 }
 0x13a   : > { %v1221_v18 = vadd.f32 %v1216_v15, %v1158_v21  ;;  %1800 = vrot.lane.b32.xlu1 %v1795_v46, %s2577_s29  ;;  %s2213_s8 = sadd.s32 70, %s2607_s17 }
 0x13b   : > { %1798 = vrot.lane.b32.xlu0 %v1794_v44, %s2577_s29  ;;  %v4153_v43 = vadd.f32 %v1253_v16, %v1222_v28  ;;  %v1403_v16 = vstv %s4212_s20  ;;  %v1936_v28 = vmul.f32 %v4191_v55, %v1935_v22  ;;  %s4288_s20 = sld [smem:[#allocation3 + %s2058_s28]] }
 0x13c   : > { %v1266_v29 = vpop.permute.xlu1 %1265  ;;  %v4157_v9 = vadd.f32 %v1252_v56, %v1221_v18  ;;  %v1937_v56 = vmul.f32 %v4185_v5, %v1935_v22  ;;  %v4296_v22 = vld [vmem:[%s2623_s27 + $0x51] sm:$0xff] }
 0x13d   : > { %v1264_v25 = vpop.permute.xlu0 %1263  ;;  %v1270_v47 = vadd.f32 %v1266_v29, %v4101_v6 }
 0x13e   : > { %1816 = vrot.lane.b32.xlu1 %v1811_v39, %s2577_s29  ;;  %v1269_v33 = vadd.f32 %v1264_v25, %v4106_v51  ;;  %v1405_v39 = vmul.f32 %v2549_v12, %v1403_v16  ;;  %v1404_v25 = vmul.f32 %v2550_v58, %v1403_v16 }
 0x13f   : > { %1814 = vrot.lane.b32.xlu0 %v1810_v42, %s2577_s29 }
 0x140   : > { %v1282_v0 = vpop.permute.xlu1 %1281 }
 0x141   : > { %v1280_v20 = vpop.permute.xlu0 %1279  ;;  %v1286_v51 = vadd.f32 %v1282_v0, %v4117_v36  ;;  %v2060_v16 = vstv %s4288_s20  ;;  %s2135_s20 = sadd.s32 104, %s2607_s17 }
 0x142   : > { %1832 = vrot.lane.b32.xlu1 %v1827_v40, %s2577_s29  ;;  %v1285_v46 = vadd.f32 %v1280_v20, %v4123_v48  ;;  %v1950_v48 = vstv %s4224_s26  ;;  %v1411_v40 = vstv %s4231_s7  ;;  %s4710_s26 = sadd.s32 11, %s2607_s17  ;;  %s4711_s7 = sadd.s32 1, %s2607_s17 }
 0x143   : > { %1830 = vrot.lane.b32.xlu0 %v1826_v10, %s2577_s29  ;;  %v1952_v0 = vmul.f32 %v4185_v5, %v1950_v48  ;;  %v1951_v20 = vmul.f32 %v4191_v55, %v1950_v48  ;;  %v1413_v14 = vmul.f32 %v2549_v12, %v1411_v40  ;;  %s2089_s22 = sadd.s32 %s2687_s11, %s4710_s26  ;;  %s1566_s25 = sadd.s32 %s2687_s11, %s4711_s7  ;;  %v2076_v48 = vstv %s4299_s21 }
 0x144   : > { %v1298_v17 = vpop.permute.xlu1 %1297  ;;  %s4325_s3 = sld [smem:[#allocation3 + %s1566_s25]]  ;;  %s1559_s7 = sadd.s32 %s2609_s18, %s1558_s4 }
 0x145   : > { %v4195_v49 = vpop.permute.xlu0 %1295  ;;  %v1302_v15 = vadd.f32 %v1298_v17, %v4136_v11  ;;  %s4347_s26 = sld [smem:[#allocation3 + %s1551_s9]]  ;;  %s4716_s4 = sadd.s32 14, %s2607_s17 }
 0x146   : > { %1847 = vrot.lane.b32.xlu1 %v1842_v4, %s2577_s29  ;;  %v1301_v42 = vadd.f32 %v4195_v49, %v4142_v50  ;;  %v1966_v4 = vstv %s4240_s15  ;;  %s4312_s15 = sld [smem:[#allocation3 + %s2089_s22]]  ;;  %s2136_s22 = sadd.s32 %s2609_s18, %s2135_s20 }
 0x147   : > { %1845 = vrot.lane.b32.xlu0 %v1841_v38, %s2577_s29  ;;  %v1968_v1 = vmul.f32 %v4185_v5, %v1966_v4  ;;  %s4357_s25 = sld [smem:[#allocation3 + %s2136_s22]]  ;;  %s4717_s22 = sadd.s32 35, %s2607_s17 }
 0x148   : > { %v4206_v19 = vpop.permute.xlu1 %1313 }
 0x149   : > { %v4214_v37 = vpop.permute.xlu0 %1311  ;;  %v1318_v50 = vadd.f32 %v4206_v19, %v4153_v43 }
 0x14a   : > { %1895 = vrot.lane.b32.xlu1 %v1890_v57, %s4674_s13  ;;  %v1317_v17 = vadd.f32 %v4214_v37, %v4157_v9  ;;  %v1967_v9 = vmul.f32 %v4191_v55, %v1966_v4  ;;  %v1982_v37 = vstv %s4251_s5  ;;  %s2104_s5 = sadd.s32 %s2609_s18, %s4712_s24  ;;  %s4714_s24 = sadd.s32 12, %s2607_s17 }
 0x14b   : > { %1893 = vrot.lane.b32.xlu0 %v1889_v60, %s4674_s13  ;;  %v1412_v60 = vmul.f32 %v2550_v58, %v1411_v40  ;;  %v1997_v58 = vstv %s4266_s12  ;;  %s2119_s12 = sadd.s32 68, %s2607_s17  ;;  %s4332_s23 = sld [smem:[#allocation3 + %s2104_s5]] }
 0x14c   : > { %v1329_v7 = vpop.permute.xlu1 %1328  ;;  %s2120_s28 = sadd.s32 %s2609_s18, %s2119_s12  ;;  %v2091_v40 = vstv %s4312_s15  ;;  %s4359_s15 = sld [smem:[#allocation3 + %s1559_s7]] }
 0x14d   : > { %v1333_v6 = vadd.f32 %v1329_v7, %v1270_v47  ;;  %v1327_v31 = vpop.permute.xlu0 %1326  ;;  %v1983_v7 = vmul.f32 %v4191_v55, %v1982_v37  ;;  %s4345_s21 = sld [smem:[#allocation3 + %s2120_s28]]  ;;  %s2151_s5 = sadd.s32 %s2687_s11, %s4714_s24 }
 0x14e   : > { %v1332_v26 = vadd.f32 %v1327_v31, %v1269_v33  ;;  %1911 = vrot.lane.b32.xlu1 %v1906_v2, %s4674_s13  ;;  %v1984_v33 = vmul.f32 %v4185_v5, %v1982_v37  ;;  %s4374_s30 = sld [smem:[#allocation3 + %s2151_s5]]  ;;  %v2551_v37 = vld [vmem:[%s2623_s27 + $0x39] sm:$0xff]  ;;  %s4718_s7 = sadd.s32 24, %s2607_s17 }
 0x14f   : > { %1909 = vrot.lane.b32.xlu0 %v1905_v59, %s4674_s13  ;;  %v1391_v34 = vadd.f32 %v1389_v45, %v1333_v6  ;;  %s1706_s24 = sadd.s32 60, %s2607_s17 }
 0x150   : > { %v1345_v44 = vpop.permute.xlu1 %1344  ;;  %v1390_v23 = vadd.f32 %v1388_v8, %v1332_v26  ;;  %v1999_v26 = vmul.f32 %v4185_v5, %v1997_v58 }
 0x151   : > { %v1349_v21 = vadd.f32 %v1345_v44, %v1286_v51  ;;  %v1343_v36 = vpop.permute.xlu0 %1342  ;;  %v2044_v51 = vstv %s4279_s6  ;;  %s4334_s6 = sld [smem:[#allocation3 + %s1543_s10]]  ;;  %v2106_v4 = vstv %s4332_s23  ;;  %s4715_s10 = sadd.s32 34, %s2607_s17 }
 0x152   : > { %v1348_v32 = vadd.f32 %v1343_v36, %v1285_v46  ;;  %1927 = vrot.lane.b32.xlu1 %v1922_v52, %s4674_s13  ;;  %v1998_v52 = vmul.f32 %v4191_v55, %v1997_v58  ;;  %s2198_s12 = sadd.s32 %s2609_s18, %s4715_s10  ;;  %s2214_s23 = sadd.s32 %s2609_s18, %s2213_s8 }
 0x153   : > { %1925 = vrot.lane.b32.xlu0 %v1921_v41, %s4674_s13  ;;  %v1399_v18 = vadd.f32 %v1397_v54, %v1349_v21  ;;  %s4399_s28 = sld [smem:[#allocation3 + %s2214_s23]]  ;;  %s2291_s8 = sadd.s32 107, %s2607_s17 }
 0x154   : > { %v1361_v3 = vpop.permute.xlu1 %1360  ;;  %v1398_v29 = vadd.f32 %v1396_v35, %v1348_v32 }
 0x155   : > { %v1365_v10 = vadd.f32 %v1361_v3, %v1302_v15  ;;  %v1359_v11 = vpop.permute.xlu0 %1358 }
 0x156   : > { %v1364_v63 = vadd.f32 %v1359_v11, %v1301_v42  ;;  %1942 = vrot.lane.b32.xlu1 %v1937_v56, %s4674_s13 }
 0x157   : > { %1940 = vrot.lane.b32.xlu0 %v1936_v28, %s4674_s13  ;;  %v1407_v38 = vadd.f32 %v1405_v39, %v1365_v10  ;;  %v2062_v28 = vmul.f32 %v4296_v22, %v2060_v16 }
 0x158   : > { %v1377_v49 = vpop.permute.xlu1 %1376  ;;  %v1406_v57 = vadd.f32 %v1404_v25, %v1364_v63 }
 0x159   : > { %v1381_v13 = vadd.f32 %v1377_v49, %v1318_v50  ;;  %v1375_v43 = vpop.permute.xlu0 %1374 }
 0x15a   : > { %v1380_v19 = vadd.f32 %v1375_v43, %v1317_v17  ;;  %1957 = vrot.lane.b32.xlu1 %v1952_v0, %s2577_s29  ;;  %v1568_v17 = vstv %s4325_s3  ;;  %s4388_s3 = sld [smem:[#allocation3 + %s2198_s12]]  ;;  %s1707_s12 = sadd.s32 %s2609_s18, %s1706_s24 }
 0x15b   : > { %1955 = vrot.lane.b32.xlu0 %v1951_v20, %s2577_s29  ;;  %v1415_v2 = vadd.f32 %v1413_v14, %v1381_v13  ;;  %v2093_v20 = vmul.f32 %v4296_v22, %v2091_v40  ;;  %v2108_v13 = vmul.f32 %v4296_v22, %v2106_v4  ;;  %s1871_s24 = sadd.s32 99, %s2607_s17 }
 0x15c   : > { %v1426_v47 = vpop.permute.xlu1 %1425  ;;  %v1414_v59 = vadd.f32 %v1412_v60, %v1380_v19 }
 0x15d   : > { %v1430_v30 = vadd.f32 %v1426_v47, %v1391_v34  ;;  %v1424_v12 = vpop.permute.xlu0 %1423  ;;  %v4305_v34 = vld [vmem:[%s2623_s27 + $0x49] sm:$0xff] }
 0x15e   : > { %v1429_v45 = vadd.f32 %v1424_v12, %v1390_v23  ;;  %1973 = vrot.lane.b32.xlu1 %v1968_v1, %s2577_s29  ;;  %v2046_v23 = vmul.f32 %v4296_v22, %v2044_v51  ;;  %v2045_v35 = vmul.f32 %v4305_v34, %v2044_v51  ;;  %v2061_v15 = vmul.f32 %v4305_v34, %v2060_v16 }
 0x15f   : > { %1971 = vrot.lane.b32.xlu0 %v1967_v9, %s2577_s29  ;;  %v2077_v25 = vmul.f32 %v4305_v34, %v2076_v48  ;;  %v2092_v50 = vmul.f32 %v4305_v34, %v2091_v40  ;;  %v2107_v19 = vmul.f32 %v4305_v34, %v2106_v4  ;;  %v2122_v1 = vstv %s4345_s21  ;;  %s2245_s21 = sadd.s32 %s2687_s11, %s4716_s4 }
 0x160   : > { %v1442_v8 = vpop.permute.xlu1 %1441  ;;  %v1553_v9 = vstv %s4347_s26  ;;  %v1561_v51 = vstv %s4359_s15  ;;  %s4421_s26 = sld [smem:[#allocation3 + %s2245_s21]]  ;;  %s2275_s15 = sadd.s32 71, %s2607_s17 }
 0x161   : > { %v1446_v27 = vadd.f32 %v1442_v8, %v1399_v18  ;;  %v1440_v6 = vpop.permute.xlu0 %1439  ;;  %v2138_v8 = vstv %s4357_s25  ;;  %s1699_s25 = sadd.s32 %s2609_s18, %s4718_s7  ;;  %s2276_s10 = sadd.s32 %s2609_s18, %s2275_s15 }
 0x162   : > { %v1445_v31 = vadd.f32 %v1440_v6, %v1398_v29  ;;  %1989 = vrot.lane.b32.xlu1 %v1984_v33, %s2577_s29  ;;  %v2078_v29 = vmul.f32 %v4296_v22, %v2076_v48  ;;  %v2124_v33 = vmul.f32 %v4296_v22, %v2122_v1  ;;  %v2139_v16 = vmul.f32 %v4305_v34, %v2138_v8  ;;  %s4452_s23 = sld [smem:[#allocation3 + %s2276_s10]]  ;;  %s2307_s21 = sadd.s32 %s2687_s11, %s1225_s16 }
 0x163   : > { %1987 = vrot.lane.b32.xlu0 %v1983_v7, %s2577_s29  ;;  %v1555_v7 = vmul.f32 %v2551_v37, %v1553_v9  ;;  %s1863_s15 = sadd.s32 63, %s2607_s17 }
 0x164   : > { %v1458_v41 = vpop.permute.xlu1 %1457 }
 0x165   : > { %v1462_v54 = vadd.f32 %v1458_v41, %v1407_v38  ;;  %v1456_v46 = vpop.permute.xlu0 %1455  ;;  %v1545_v38 = vstv %s4334_s6  ;;  %s2229_s6 = sadd.s32 106, %s2607_s17 }
 0x166   : > { %v1461_v44 = vadd.f32 %v1456_v46, %v1406_v57  ;;  %2004 = vrot.lane.b32.xlu1 %v1999_v26, %s2577_s29  ;;  %v1547_v43 = vmul.f32 %v3794_v24, %v1545_v38  ;;  %v2552_v26 = vld [vmem:[%s2623_s27 + $0x31] sm:$0xff]  ;;  %s2230_s9 = sadd.s32 %s2609_s18, %s2229_s6  ;;  %s4454_s6 = sld [smem:[#allocation3 + %s1707_s12]] }
 0x167   : > { %2002 = vrot.lane.b32.xlu0 %v1998_v52, %s2577_s29  ;;  %v1554_v52 = vmul.f32 %v2552_v26, %v1553_v9  ;;  %s4410_s20 = sld [smem:[#allocation3 + %s2230_s9]]  ;;  %s4721_s12 = sadd.s32 7, %s2607_s17 }
 0x168   : > { %v1474_v21 = vpop.permute.xlu1 %1473 }
 0x169   : > { %v1478_v36 = vadd.f32 %v1474_v21, %v1415_v2  ;;  %v1472_v32 = vpop.permute.xlu0 %1471  ;;  %v1570_v2 = vmul.f32 %v2551_v37, %v1568_v17  ;;  %v1563_v21 = vmul.f32 %v2551_v37, %v1561_v51 }
 0x16a   : > { %v1477_v56 = vadd.f32 %v1472_v32, %v1414_v59  ;;  %2051 = vrot.lane.b32.xlu1 %v2046_v23, %s4674_s13  ;;  %v1546_v59 = vmul.f32 %v3804_v61, %v1545_v38  ;;  %v2140_v23 = vmul.f32 %v4296_v22, %v2138_v8  ;;  %v2216_v38 = vstv %s4399_s28  ;;  %s2292_s28 = sadd.s32 %s2609_s18, %s2291_s8  ;;  %s1879_s8 = sadd.s32 %s2687_s11, %s4721_s12 }
 0x16b   : > { %2049 = vrot.lane.b32.xlu0 %v2045_v35, %s4674_s13 }
 0x16c   : > { %v1489_v18 = vpop.permute.xlu1 %1488 }
 0x16d   : > { %v1493_v39 = vadd.f32 %v1489_v18, %v1430_v30  ;;  %v1487_v42 = vpop.permute.xlu0 %1486  ;;  %v1569_v30 = vmul.f32 %v3804_v61, %v1568_v17  ;;  %v2123_v61 = vmul.f32 %v4305_v34, %v2122_v1 }
 0x16e   : > { %v1492_v3 = vadd.f32 %v1487_v42, %v1429_v45  ;;  %2067 = vrot.lane.b32.xlu1 %v2062_v28, %s4674_s13  ;;  %v1562_v28 = vmul.f32 %v2552_v26, %v1561_v51 }
 0x16f   : > { %2065 = vrot.lane.b32.xlu0 %v2061_v15, %s4674_s13  ;;  %v1549_v58 = vadd.f32 %v1547_v43, %v1493_v39  ;;  %v2232_v43 = vstv %s4410_s20  ;;  %s4463_s20 = sld [smem:[#allocation3 + %s2292_s28]] }
 0x170   : > { %v1505_v10 = vpop.permute.xlu1 %1504 }
 0x171   : > { %v1509_v11 = vadd.f32 %v1505_v10, %v1446_v27  ;;  %v1503_v63 = vpop.permute.xlu0 %1502 }
 0x172   : > { %v1508_v0 = vadd.f32 %v1503_v63, %v1445_v31  ;;  %2083 = vrot.lane.b32.xlu1 %v2078_v29, %s4674_s13  ;;  %v1548_v31 = vadd.f32 %v1546_v59, %v1492_v3  ;;  %v4407_v29 = vld [vmem:[%s2623_s27 + $0x52] sm:$0xff]  ;;  %v2247_v59 = vstv %s4421_s26  ;;  %s4719_s26 = sadd.s32 4, %s2607_s17 }
 0x173   : > { %2081 = vrot.lane.b32.xlu0 %v2077_v25, %s4674_s13  ;;  %v1557_v35 = vadd.f32 %v1555_v7, %v1509_v11  ;;  %v2200_v25 = vstv %s4388_s3  ;;  %v4417_v11 = vld [vmem:[%s2623_s27 + $0x4a] sm:$0xff]  ;;  %s2260_s27 = sadd.s32 %s2609_s18, %s4717_s22  ;;  %s1714_s3 = sadd.s32 96, %s2607_s17 }
 0x174   : > { %v1521_v14 = vpop.permute.xlu1 %1520  ;;  %v2201_v4 = vmul.f32 %v4417_v11, %v2200_v25  ;;  %s4439_s5 = sld [smem:[#allocation3 + %s2260_s27]]  ;;  %s1715_s9 = sadd.s32 %s2609_s18, %s1714_s3  ;;  %v2248_v7 = vmul.f32 %v4417_v11, %v2247_v59 }
 0x175   : > { %v1525_v49 = vadd.f32 %v1521_v14, %v1462_v54  ;;  %v1519_v57 = vpop.permute.xlu0 %1518  ;;  %s4466_s4 = sld [smem:[#allocation3 + %s1715_s9]]  ;;  %s1722_s22 = sadd.s32 %s2687_s11, %s4719_s26 }
 0x176   : > { %v4365_v60 = vadd.f32 %v1519_v57, %v1461_v44  ;;  %2098 = vrot.lane.b32.xlu1 %v2093_v20, %s4674_s13  ;;  %s4480_s27 = sld [smem:[#allocation3 + %s2307_s21]]  ;;  %s2168_s9 = sadd.s32 %s2609_s18, %s287_s19 }
 0x177   : > { %2096 = vrot.lane.b32.xlu0 %v2092_v50, %s4674_s13  ;;  %v1565_v42 = vadd.f32 %v1563_v21, %v1525_v49  ;;  %v2202_v50 = vmul.f32 %v4407_v29, %v2200_v25  ;;  %s4484_s16 = sld [smem:[#allocation3 + %s1722_s22]]  ;;  %s2019_s19 = sadd.s32 66, %s2607_s17 }
 0x178   : > { %v1536_v47 = vpop.permute.xlu1 %1535  ;;  %v1564_v10 = vadd.f32 %v1562_v28, %v4365_v60  ;;  %v2218_v60 = vmul.f32 %v4407_v29, %v2216_v38  ;;  %v2294_v28 = vstv %s4463_s20  ;;  %s1880_s3 = sld [smem:[#allocation3 + %s1879_s8]]  ;;  %s2027_s21 = sadd.s32 102, %s2607_s17 }
 0x179   : > { %v1540_v24 = vadd.f32 %v1536_v47, %v1478_v36  ;;  %v1534_v12 = vpop.permute.xlu0 %1533  ;;  %v2153_v36 = vstv %s4374_s30  ;;  %s4441_s30 = sld [smem:[#allocation3 + %s1699_s25]]  ;;  %v2233_v47 = vmul.f32 %v4417_v11, %v2232_v43  ;;  %s2028_s22 = sadd.s32 %s2609_s18, %s2027_s21 }
 0x17a   : > { %v1539_v45 = vadd.f32 %v1534_v12, %v1477_v56  ;;  %2113 = vrot.lane.b32.xlu1 %v2108_v13, %s2577_s29  ;;  %v1556_v56 = vadd.f32 %v1554_v52, %v1508_v0  ;;  %v2155_v39 = vmul.f32 %v4296_v22, %v2153_v36  ;;  %v2154_v3 = vmul.f32 %v4305_v34, %v2153_v36  ;;  %s2169_s20 = sld [smem:[#allocation3 + %s2168_s9]] }
 0x17b   : > { %2111 = vrot.lane.b32.xlu0 %v2107_v19, %s2577_s29  ;;  %v1572_v27 = vadd.f32 %v1570_v2, %v1540_v24  ;;  %v2217_v13 = vmul.f32 %v4417_v11, %v2216_v38  ;;  %v2234_v2 = vmul.f32 %v4407_v29, %v2232_v43 }
 0x17c   : > { %v1583_v6 = vpop.permute.xlu1 %1582  ;;  %v1571_v41 = vadd.f32 %v1569_v30, %v1539_v45 }
 0x17d   : > { %v1587_v54 = vadd.f32 %v1583_v6, %v1549_v58  ;;  %v1581_v46 = vpop.permute.xlu0 %1580  ;;  %v2262_v58 = vstv %s4439_s5 }
 0x17e   : > { %v1586_v44 = vadd.f32 %v1581_v46, %v1548_v31  ;;  %2129 = vrot.lane.b32.xlu1 %v2124_v33, %s2577_s29  ;;  %v2249_v33 = vmul.f32 %v4407_v29, %v2247_v59  ;;  %v2264_v26 = vmul.f32 %v4407_v29, %v2262_v58  ;;  %v2263_v52 = vmul.f32 %v4417_v11, %v2262_v58 }
 0x17f   : > { %2127 = vrot.lane.b32.xlu0 %v2123_v61, %s2577_s29  ;;  %v1701_v8 = vstv %s4441_s30  ;;  %s1872_s30 = sadd.s32 %s2609_s18, %s1871_s24 }
 0x180   : > { %v1599_v32 = vpop.permute.xlu1 %1598  ;;  %v1703_v51 = vmul.f32 %v4035_v62, %v1701_v8  ;;  %v1702_v46 = vmul.f32 %v4043_v53, %v1701_v8  ;;  %s1873_s10 = sld [smem:[#allocation3 + %s1872_s30]] }
 0x181   : > { %v1603_v15 = vadd.f32 %v1599_v32, %v1557_v35  ;;  %v1597_v48 = vpop.permute.xlu0 %1596 }
 0x182   : > { %v1602_v18 = vadd.f32 %v1597_v48, %v1556_v56  ;;  %2145 = vrot.lane.b32.xlu1 %v2140_v23, %s2577_s29 }
 0x183   : > { %2143 = vrot.lane.b32.xlu0 %v2139_v16, %s2577_s29 }
 0x184   : > { %v1615_v40 = vpop.permute.xlu1 %1614 }
 0x185   : > { %v1619_v63 = vadd.f32 %v1615_v40, %v1565_v42  ;;  %v1613_v0 = vpop.permute.xlu0 %1612  ;;  %v2296_v40 = vmul.f32 %v4407_v29, %v2294_v28 }
 0x186   : > { %v1618_v20 = vadd.f32 %v1613_v0, %v1564_v10  ;;  %2160 = vrot.lane.b32.xlu1 %v2155_v39, %s2577_s29  ;;  %v1717_v39 = vstv %s4466_s4  ;;  %s2020_s4 = sadd.s32 %s2609_s18, %s2019_s19 }
 0x187   : > { %2158 = vrot.lane.b32.xlu0 %v2154_v3, %s2577_s29  ;;  %v1719_v0 = vmul.f32 %v4035_v62, %v1717_v39  ;;  %v1718_v38 = vmul.f32 %v4043_v53, %v1717_v39  ;;  %s2021_s26 = sld [smem:[#allocation3 + %s2020_s4]] }
 0x188   : > { %v1630_v14 = vpop.permute.xlu1 %1629 }
 0x189   : > { %v1634_v17 = vadd.f32 %v1630_v14, %v1572_v27  ;;  %v1628_v49 = vpop.permute.xlu0 %1627  ;;  %v1724_v14 = vstv %s4484_s16  ;;  %s2029_s16 = sld [smem:[#allocation3 + %s2028_s22]] }
 0x18a   : > { %v1633_v57 = vadd.f32 %v1628_v49, %v1571_v41  ;;  %2207 = vrot.lane.b32.xlu1 %v2202_v50, %s4674_s13  ;;  %v2278_v41 = vstv %s4452_s23  ;;  %s4722_s23 = sadd.s32 30, %s2607_s17 }
 0x18b   : > { %2205 = vrot.lane.b32.xlu0 %v2201_v4, %s4674_s13  ;;  %v2280_v21 = vmul.f32 %v4407_v29, %v2278_v41  ;;  %v2279_v32 = vmul.f32 %v4417_v11, %v2278_v41 }
 0x18c   : > { %v1645_v19 = vpop.permute.xlu1 %1644 }
 0x18d   : > { %v1649_v1 = vadd.f32 %v1645_v19, %v1587_v54  ;;  %v1643_v9 = vpop.permute.xlu0 %1642  ;;  %v1726_v19 = vmul.f32 %v4035_v62, %v1724_v14 }
 0x18e   : > { %v1648_v37 = vadd.f32 %v1643_v9, %v1586_v44  ;;  %2223 = vrot.lane.b32.xlu1 %v2218_v60, %s4674_s13  ;;  %v1709_v44 = vstv %s4454_s6  ;;  %s2012_s6 = sadd.s32 %s2609_s18, %s4722_s23 }
 0x18f   : > { %2221 = vrot.lane.b32.xlu0 %v2217_v13, %s4674_s13  ;;  %v1705_v36 = vadd.f32 %v1703_v51, %v1649_v1  ;;  %v1711_v56 = vmul.f32 %v4035_v62, %v1709_v44  ;;  %s2013_s28 = sld [smem:[#allocation3 + %s2012_s6]] }
 0x190   : > { %v1661_v30 = vpop.permute.xlu1 %1660  ;;  %v1704_v48 = vadd.f32 %v1702_v46, %v1648_v37  ;;  %v1725_v37 = vmul.f32 %v4043_v53, %v1724_v14 }
 0x191   : > { %v1665_v24 = vadd.f32 %v1661_v30, %v1603_v15  ;;  %v1659_v12 = vpop.permute.xlu0 %1658 }
 0x192   : > { %v1664_v45 = vadd.f32 %v1659_v12, %v1602_v18  ;;  %2239 = vrot.lane.b32.xlu1 %v2234_v2, %s4674_s13  ;;  %v1710_v18 = vmul.f32 %v4043_v53, %v1709_v44 }
 0x193   : > { %2237 = vrot.lane.b32.xlu0 %v2233_v47, %s4674_s13  ;;  %v1713_v10 = vadd.f32 %v1711_v56, %v1665_v24 }
 0x194   : > { %v1677_v61 = vpop.permute.xlu1 %1676  ;;  %v1712_v4 = vadd.f32 %v1710_v18, %v1664_v45  ;;  %v1874_v18 = vstv %s1873_s10  ;;  %s4724_s10 = sadd.s32 13, %s2607_s17 }
 0x195   : > { %v1681_v27 = vadd.f32 %v1677_v61, %v1619_v63  ;;  %v1675_v6 = vpop.permute.xlu0 %1674  ;;  %v2295_v63 = vmul.f32 %v4417_v11, %v2294_v28  ;;  %s2191_s12 = sadd.s32 %s2687_s11, %s4724_s10 }
 0x196   : > { %v1680_v31 = vadd.f32 %v1675_v6, %v1618_v20  ;;  %2254 = vrot.lane.b32.xlu1 %v2249_v33, %s4674_s13  ;;  %v2309_v20 = vstv %s4480_s27  ;;  %s2175_s27 = sadd.s32 69, %s2607_s17 }
 0x197   : > { %2252 = vrot.lane.b32.xlu0 %v2248_v7, %s4674_s13  ;;  %s4720_s13 = sadd.s32 27, %s2607_s17  ;;  %v2311_v60 = vmul.f32 %v4407_v29, %v2309_v20  ;;  %v1721_v13 = vadd.f32 %v1719_v0, %v1681_v27  ;;  %v2310_v43 = vmul.f32 %v4417_v11, %v2309_v20  ;;  %v1875_v0 = vmul.f32 %v4191_v55, %v1874_v18 }
 0x198   : > { %v1692_v54 = vpop.permute.xlu1 %1691  ;;  %s1856_s7 = sadd.s32 %s2609_s18, %s4720_s13  ;;  %v1720_v9 = vadd.f32 %v1718_v38, %v1680_v31  ;;  %v1881_v20 = vstv %s1880_s3  ;;  %s4723_s13 = sadd.s32 10, %s2607_s17 }
 0x199   : > { %v1696_v23 = vadd.f32 %v1692_v54, %v1634_v17  ;;  %v1690_v35 = vpop.permute.xlu0 %1689  ;;  %s1857_s25 = sld [smem:[#allocation3 + %s1856_s7]]  ;;  %s2035_s7 = sadd.s32 %s2687_s11, %s4723_s13 }
 0x19a   : > { %v1695_v16 = vadd.f32 %v1690_v35, %v1633_v57  ;;  %2269 = vrot.lane.b32.xlu1 %v2264_v26, %s2577_s29 }
 0x19b   : > { %2267 = vrot.lane.b32.xlu0 %v2263_v52, %s2577_s29  ;;  %v1728_v30 = vadd.f32 %v1726_v19, %v1696_v23 }
 0x19c   : > { %v1739_v15 = vpop.permute.xlu1 %1738  ;;  %v1727_v12 = vadd.f32 %v1725_v37, %v1695_v16 }
 0x19d   : > { %v1743_v42 = vadd.f32 %v1739_v15, %v1705_v36  ;;  %v1737_v3 = vpop.permute.xlu0 %1736 }
 0x19e   : > { %v1742_v25 = vadd.f32 %v1737_v3, %v1704_v48  ;;  %2285 = vrot.lane.b32.xlu1 %v2280_v21, %s2577_s29 }
 0x19f   : > { %2283 = vrot.lane.b32.xlu0 %v2279_v32, %s2577_s29  ;;  %v1858_v45 = vstv %s1857_s25  ;;  %s2183_s25 = sadd.s32 105, %s2607_s17  ;;  %s2487_s17 = sshll.u32 %s4726_s0, 6 }
 0x1a0   : > { %v1755_v50 = vpop.permute.xlu1 %1754  ;;  %v1860_v53 = vmul.f32 %v4185_v5, %v1858_v45  ;;  %v1859_v61 = vmul.f32 %v4191_v55, %v1858_v45  ;;  %s2184_s24 = sadd.s32 %s2609_s18, %s2183_s25  ;;  %s123_s3 = scalar_lea.vmem %s4635_s2, %s2487_s17 }
 0x1a1   : > { %v1759_v17 = vadd.f32 %v1755_v50, %v1713_v10  ;;  %v1753_v49 = vpop.permute.xlu0 %1752  ;;  %s4581_s30 = sld [smem:[#allocation3 + %s2184_s24]] }
 0x1a2   : > { %v1758_v57 = vadd.f32 %v1753_v49, %v1712_v4  ;;  %2301 = vrot.lane.b32.xlu1 %v2296_v40, %s2577_s29  ;;  %v1876_v40 = vmul.f32 %v4185_v5, %v1874_v18 }
 0x1a3   : > { %2299 = vrot.lane.b32.xlu0 %v2295_v63, %s2577_s29 }
 0x1a4   : > { %v1771_v1 = vpop.permute.xlu1 %1770 }
 0x1a5   : > { %v1775_v2 = vadd.f32 %v1771_v1, %v1721_v13  ;;  %v1769_v47 = vpop.permute.xlu0 %1768 }
 0x1a6   : > { %v1774_v59 = vadd.f32 %v1769_v47, %v1720_v9  ;;  %2316 = vrot.lane.b32.xlu1 %v2311_v60, %s2577_s29  ;;  %v1882_v60 = vmul.f32 %v4191_v55, %v1881_v20 }
 0x1a7   : > { %2314 = vrot.lane.b32.xlu0 %v2310_v43, %s2577_s29  ;;  %s1864_s29 = sadd.s32 %s2609_s18, %s1863_s15  ;;  %s2176_s15 = sadd.s32 %s2609_s18, %s2175_s27 }
 0x1a8   : > { %v1786_v24 = vpop.permute.xlu1 %1785  ;;  %s1865_s5 = sld [smem:[#allocation3 + %s1864_s29]] }
 0x1a9   : > { %v1790_v33 = vadd.f32 %v1786_v24, %v1728_v30  ;;  %v1784_v62 = vpop.permute.xlu0 %1783  ;;  %s2036_s29 = sld [smem:[#allocation3 + %s2035_s7]] }
 0x1aa   : > { %v1789_v7 = vadd.f32 %v1784_v62, %v1727_v12  ;;  %s4590_s18 = sld [smem:[#allocation3 + %s2191_s12]] }
 0x1ac   : > { %v1801_v58 = vpop.permute.xlu1 %1800 }
 0x1ad   : > { %v1805_v8 = vadd.f32 %v1801_v58, %v1743_v42  ;;  %v1799_v27 = vpop.permute.xlu0 %1798 }
 0x1ae   : > { %v1804_v6 = vadd.f32 %v1799_v27, %v1742_v25  ;;  %v1866_v21 = vstv %s1865_s5  ;;  %s4579_s5 = sld [smem:[#allocation3 + %s2176_s15]] }
 0x1af   : > { %v1862_v31 = vadd.f32 %v1860_v53, %v1805_v8  ;;  %v1868_v28 = vmul.f32 %v4185_v5, %v1866_v21  ;;  %v1867_v48 = vmul.f32 %v4191_v55, %v1866_v21 }
 0x1b0   : > { %v1817_v26 = vpop.permute.xlu1 %1816  ;;  %v1861_v52 = vadd.f32 %v1859_v61, %v1804_v6 }
 0x1b1   : > { %v1821_v51 = vadd.f32 %v1817_v26, %v1759_v17  ;;  %v1815_v41 = vpop.permute.xlu0 %1814  ;;  %v1883_v17 = vmul.f32 %v4185_v5, %v1881_v20  ;;  %v2022_v20 = vstv %s2021_s26 }
 0x1b2   : > { %v1820_v54 = vadd.f32 %v1815_v41, %v1758_v57 }
 0x1b3   : > { %v1870_v25 = vadd.f32 %v1868_v28, %v1821_v51 }
 0x1b4   : > { %v1833_v46 = vpop.permute.xlu1 %1832  ;;  %v1869_v63 = vadd.f32 %v1867_v48, %v1820_v54 }
 0x1b5   : > { %v1837_v44 = vadd.f32 %v1833_v46, %v1775_v2  ;;  %v1831_v23 = vpop.permute.xlu0 %1830  ;;  %v2014_v2 = vstv %s2013_s28 }
 0x1b6   : > { %v1836_v35 = vadd.f32 %v1831_v23, %v1774_v59  ;;  %v2016_v5 = vmul.f32 %v4296_v22, %v2014_v2  ;;  %v2015_v55 = vmul.f32 %v4305_v34, %v2014_v2  ;;  %v2037_v2 = vstv %s2036_s29 }
 0x1b7   : > { %v1878_v14 = vadd.f32 %v1876_v40, %v1837_v44  ;;  %v2170_v44 = vstv %s2169_s20 }
 0x1b8   : > { %v1848_v16 = vpop.permute.xlu1 %1847  ;;  %v1877_v57 = vadd.f32 %v1875_v0, %v1836_v35 }
 0x1b9   : > { %v1852_v36 = vadd.f32 %v1848_v16, %v1790_v33  ;;  %v1846_v32 = vpop.permute.xlu0 %1845  ;;  %v2172_v16 = vmul.f32 %v4407_v29, %v2170_v44 }
 0x1ba   : > { %v1851_v56 = vadd.f32 %v1846_v32, %v1789_v7  ;;  %v2171_v32 = vmul.f32 %v4417_v11, %v2170_v44 }
 0x1bb   : > { %v1885_v1 = vadd.f32 %v1883_v17, %v1852_v36  ;;  %v2024_v17 = vmul.f32 %v4296_v22, %v2022_v20 }
 0x1bc   : > { %v1896_v15 = vpop.permute.xlu1 %1895  ;;  %v1884_v37 = vadd.f32 %v1882_v60, %v1851_v56  ;;  %v2023_v60 = vmul.f32 %v4305_v34, %v2022_v20 }
 0x1bd   : > { %v1900_v39 = vadd.f32 %v1896_v15, %v1862_v31  ;;  %v1894_v42 = vpop.permute.xlu0 %1893 }
 0x1be   : > { %v1899_v3 = vadd.f32 %v1894_v42, %v1861_v52 }
 0x1c0   : > { %v1912_v10 = vpop.permute.xlu1 %1911 }
 0x1c1   : > { %v4529_v50 = vadd.f32 %v1912_v10, %v1870_v25  ;;  %v1910_v4 = vpop.permute.xlu0 %1909 }
 0x1c2   : > { %v4531_v38 = vadd.f32 %v1910_v4, %v1869_v63 }
 0x1c4   : > { %v1928_v49 = vpop.permute.xlu1 %1927 }
 0x1c5   : > { %v4535_v13 = vadd.f32 %v1928_v49, %v1878_v14  ;;  %v1926_v43 = vpop.permute.xlu0 %1925 }
 0x1c6   : > { %v4537_v19 = vadd.f32 %v1926_v43, %v1877_v57  ;;  %v2030_v43 = vstv %s2029_s16 }
 0x1c8   : > { %v1943_v9 = vpop.permute.xlu1 %1942 }
 0x1c9   : > { %v4539_v47 = vadd.f32 %v1943_v9, %v1885_v1  ;;  %v1941_v59 = vpop.permute.xlu0 %1940 }
 0x1ca   : > { %v4541_v30 = vadd.f32 %v1941_v59, %v1884_v37 }
 0x1cc   : > { %v1958_v24 = vpop.permute.xlu1 %1957 }
 0x1cd   : > { %v1962_v12 = vadd.f32 %v1958_v24, %v1900_v39  ;;  %v1956_v45 = vpop.permute.xlu0 %1955 }
 0x1ce   : > { %v1961_v33 = vadd.f32 %v1956_v45, %v1899_v3 }
 0x1cf   : > { %v2018_v62 = vadd.f32 %v2016_v5, %v1962_v12 }
 0x1d0   : > { %v1974_v7 = vpop.permute.xlu1 %1973  ;;  %v2017_v53 = vadd.f32 %v2015_v55, %v1961_v33  ;;  %v2031_v55 = vmul.f32 %v4305_v34, %v2030_v43  ;;  %v2039_v33 = vmul.f32 %v4296_v22, %v2037_v2 }
 0x1d1   : > { %v1972_v58 = vpop.permute.xlu0 %1971  ;;  %v1978_v14 = vadd.f32 %v1974_v7, %v4529_v50  ;;  %v2032_v50 = vmul.f32 %v4296_v22, %v2030_v43  ;;  %v2186_v7 = vstv %s4581_s30 }
 0x1d2   : > { %v1977_v57 = vadd.f32 %v1972_v58, %v4531_v38  ;;  %v2178_v38 = vstv %s4579_s5  ;;  %v2188_v44 = vmul.f32 %v4407_v29, %v2186_v7 }
 0x1d3   : > { %v2026_v37 = vadd.f32 %v2024_v17, %v1978_v14  ;;  %v2179_v22 = vmul.f32 %v4417_v11, %v2178_v38 }
 0x1d4   : > { %v1990_v61 = vpop.permute.xlu1 %1989  ;;  %v2025_v24 = vadd.f32 %v2023_v60, %v1977_v57 }
 0x1d5   : > { %v1988_v8 = vpop.permute.xlu0 %1987  ;;  %v1994_v9 = vadd.f32 %v1990_v61, %v4535_v13 }
 0x1d6   : > { %v1993_v5 = vadd.f32 %v1988_v8, %v4537_v19  ;;  %v2180_v19 = vmul.f32 %v4407_v29, %v2178_v38 }
 0x1d7   : > { %v2034_v58 = vadd.f32 %v2032_v50, %v1994_v9 }
 0x1d8   : > { %v4545_v27 = vpop.permute.xlu1 %2004 }
 0x1d9   : > { %v4547_v6 = vpop.permute.xlu0 %2002  ;;  %v2009_v13 = vadd.f32 %v4545_v27, %v4539_v47  ;;  %v2187_v27 = vmul.f32 %v4417_v11, %v2186_v7 }
 0x1dc   : > { %v2052_v31 = vpop.permute.xlu1 %2051 }
 0x1dd   : > { %v2050_v26 = vpop.permute.xlu0 %2049  ;;  %v2056_v35 = vadd.f32 %v2052_v31, %v2018_v62  ;;  %v2038_v62 = vmul.f32 %v4305_v34, %v2037_v2  ;;  %v2008_v31 = vadd.f32 %v4547_v6, %v4541_v30 }
 0x1de   : > { %v2055_v21 = vadd.f32 %v2050_v26, %v2017_v53  ;;  %v2033_v26 = vadd.f32 %v2031_v55, %v1993_v5 }
 0x1e0   : > { %v2068_v52 = vpop.permute.xlu1 %2067 }
 0x1e1   : > { %v2066_v51 = vpop.permute.xlu0 %2065  ;;  %v2072_v12 = vadd.f32 %v2068_v52, %v2026_v37 }
 0x1e2   : > { %v2071_v45 = vadd.f32 %v2066_v51, %v2025_v24 }
 0x1e4   : > { %v4552_v41 = vpop.permute.xlu1 %2083 }
 0x1e5   : > { %v4554_v54 = vpop.permute.xlu0 %2081  ;;  %v2088_v34 = vadd.f32 %v4552_v41, %v2034_v58 }
 0x1e8   : > { %v4556_v46 = vpop.permute.xlu1 %2098 }
 0x1e9   : > { %v4558_v23 = vpop.permute.xlu0 %2096 }
 0x1ec   : > { %v2114_v36 = vpop.permute.xlu1 %2113 }
 0x1ed   : > { %v2118_v56 = vadd.f32 %v2114_v36, %v2056_v35  ;;  %v2112_v28 = vpop.permute.xlu0 %2111  ;;  %v2087_v35 = vadd.f32 %v4554_v54, %v2033_v26  ;;  %v2041_v36 = vadd.f32 %v2039_v33, %v2009_v13 }
 0x1ee   : > { %v2117_v15 = vadd.f32 %v2112_v28, %v2055_v21  ;;  %v2040_v28 = vadd.f32 %v2038_v62, %v2008_v31 }
 0x1ef   : > { %v2174_v48 = vadd.f32 %v2172_v16, %v2118_v56  ;;  %v2193_v16 = vstv %s4590_s18 }
 0x1f0   : > { %v2130_v18 = vpop.permute.xlu1 %2129  ;;  %v2173_v39 = vadd.f32 %v2171_v32, %v2117_v15  ;;  %v2195_v54 = vmul.f32 %v4407_v29, %v2193_v16  ;;  %v2194_v20 = vmul.f32 %v4417_v11, %v2193_v16 }
 0x1f1   : > { %v2128_v42 = vpop.permute.xlu0 %2127  ;;  %v2134_v61 = vadd.f32 %v2130_v18, %v2072_v12 }
 0x1f2   : > { %v2133_v52 = vadd.f32 %v2128_v42, %v2071_v45 }
 0x1f3   : > { %v2182_v56 = vadd.f32 %v2180_v19, %v2134_v61 }
 0x1f4   : > { %v2146_v3 = vpop.permute.xlu1 %2145  ;;  %v2181_v18 = vadd.f32 %v2179_v22, %v2133_v52 }
 0x1f5   : > { %v4565_v25 = vpop.permute.xlu0 %2143  ;;  %v2150_v32 = vadd.f32 %v2146_v3, %v2088_v34 }
 0x1f6   : > { %v2149_v15 = vadd.f32 %v4565_v25, %v2087_v35 }
 0x1f7   : > { %v2190_v57 = vadd.f32 %v2188_v44, %v2150_v32 }
 0x1f8   : > { %v4568_v40 = vpop.permute.xlu1 %2160 }
 0x1f9   : > { %v4571_v10 = vpop.permute.xlu0 %2158 }
 0x1fc   : > { %v2208_v63 = vpop.permute.xlu1 %2207 }
 0x1fd   : > { %v2206_v0 = vpop.permute.xlu0 %2205  ;;  %v2212_v51 = vadd.f32 %v2208_v63, %v2174_v48  ;;  %v2103_v48 = vadd.f32 %v4556_v46, %v2041_v36  ;;  %v2102_v63 = vadd.f32 %v4558_v23, %v2040_v28  ;;  %v2189_v46 = vadd.f32 %v2187_v27, %v2149_v15 }
 0x1fe   : > { %v2211_v47 = vadd.f32 %v2206_v0, %v2173_v39 }
 0x1ff   : > { %v2165_v17 = vadd.f32 %v4568_v40, %v2103_v48  ;;  %v2164_v43 = vadd.f32 %v4571_v10, %v2102_v63 }
 0x200   : > { %v2224_v4 = vpop.permute.xlu1 %2223 }
 0x201   : > { %v2222_v49 = vpop.permute.xlu0 %2221  ;;  %v2228_v42 = vadd.f32 %v2224_v4, %v2182_v56  ;;  %v2197_v50 = vadd.f32 %v2195_v54, %v2165_v17  ;;  %v2196_v5 = vadd.f32 %v2194_v20, %v2164_v43 }
 0x202   : > { %v2227_v0 = vadd.f32 %v2222_v49, %v2181_v18 }
 0x204   : > { %v2240_v1 = vpop.permute.xlu1 %2239 }
 0x205   : > { %v2238_v59 = vpop.permute.xlu0 %2237  ;;  %v2244_v29 = vadd.f32 %v2240_v1, %v2190_v57 }
 0x206   : > { %v2243_v37 = vadd.f32 %v2238_v59, %v2189_v46 }
 0x208   : > { %v2255_v53 = vpop.permute.xlu1 %2254 }
 0x209   : > { %v2253_v8 = vpop.permute.xlu0 %2252  ;;  %v2259_v24 = vadd.f32 %v2255_v53, %v2197_v50 }
 0x20a   : > { %v2258_v38 = vadd.f32 %v2253_v8, %v2196_v5 }
 0x20c   : > { %v2270_v21 = vpop.permute.xlu1 %2269 }
 0x20d   : > { %v2274_v30 = vadd.f32 %v2270_v21, %v2212_v51  ;;  %v2268_v6 = vpop.permute.xlu0 %2267 }
 0x20e   : > { %v2273_v41 = vadd.f32 %v2268_v6, %v2211_v47 }
 0x20f   : > { %v2472_v39 = vmul.f32 -1.442695, %v2274_v30 }
 0x210   : > { %v2471_v3 = vmul.f32 -1.442695, %v2273_v41  ;;  %v2286_v14 = vpop.permute.xlu1 %2285 }
 0x211   : > { %2505 = vpow2.f32 %v2472_v39  ;;  %v2290_v25 = vadd.f32 %v2286_v14, %v2228_v42  ;;  %v2284_v60 = vpop.permute.xlu0 %2283 }
 0x212   : > { %2507 = vpow2.f32 %v2471_v3  ;;  %v2289_v4 = vadd.f32 %v2284_v60, %v2227_v0 }
 0x213   : > { %v2474_v9 = vmul.f32 -1.442695, %v2290_v25 }
 0x214   : > { %v2473_v23 = vmul.f32 -1.442695, %v2289_v4  ;;  %v2302_v49 = vpop.permute.xlu1 %2301 }
 0x215   : > { %2509 = vpow2.f32 %v2474_v9  ;;  %v2306_v11 = vadd.f32 %v2302_v49, %v2244_v29  ;;  %v2300_v2 = vpop.permute.xlu0 %2299 }
 0x216   : > { %2511 = vpow2.f32 %v2473_v23  ;;  %v2305_v40 = vadd.f32 %v2300_v2, %v2243_v37 }
 0x217   : > { %v2478_v55 = vmul.f32 -1.442695, %v2306_v11 }
 0x218   : > { %v2477_v12 = vmul.f32 -1.442695, %v2305_v40  ;;  %v2317_v10 = vpop.permute.xlu1 %2316 }
 0x219   : > { %2513 = vpow2.f32 %v2478_v55  ;;  %v2321_v45 = vadd.f32 %v2317_v10, %v2259_v24  ;;  %v2315_v33 = vpop.permute.xlu0 %2314 }
 0x21a   : > { %2515 = vpow2.f32 %v2477_v12  ;;  %v2320_v1 = vadd.f32 %v2315_v33, %v2258_v38 }
 0x21b   : > { %v2506_v59 = vpop.eup %2505  ;;  %v2482_v62 = vmul.f32 -1.442695, %v2321_v45 }
 0x21c   : > { %v2508_v7 = vpop.eup %2507  ;;  %v2329_v13 = vadd.f32 1.0, %v2506_v59  ;;  %v2481_v58 = vmul.f32 -1.442695, %v2320_v1 }
 0x21d   : > { %v2328_v61 = vadd.f32 1.0, %v2508_v7  ;;  %2517 = vpow2.f32 %v2482_v62 }
 0x21e   : > { %2519 = vrcp.f32 %v2329_v13 }
 0x21f   : > { %v2510_v19 = vpop.eup %2509  ;;  %2521 = vrcp.f32 %v2328_v61 }
 0x220   : > { %v2512_v53 = vpop.eup %2511  ;;  %v2344_v8 = vadd.f32 1.0, %v2510_v19  ;;  %2523 = vpow2.f32 %v2481_v58 }
 0x221   : > { %v2343_v31 = vadd.f32 1.0, %v2512_v53 }
 0x222   : > { %2525 = vrcp.f32 %v2344_v8 }
 0x223   : > { %v2514_v26 = vpop.eup %2513  ;;  %2527 = vrcp.f32 %v2343_v31 }
 0x224   : > { %v2516_v52 = vpop.eup %2515  ;;  %v2359_v22 = vadd.f32 1.0, %v2514_v26 }
 0x225   : > { %v2358_v34 = vadd.f32 1.0, %v2516_v52 }
 0x226   : > { %2529 = vrcp.f32 %v2359_v22 }
 0x227   : > { %v2518_v51 = vpop.eup %2517  ;;  %2531 = vrcp.f32 %v2358_v34 }
 0x228   : > { %v2520_v44 = vpop.eup %2519  ;;  %v2374_v35 = vadd.f32 1.0, %v2518_v51 }
 0x229   : > { %v2522_v47 = vpop.eup %2521  ;;  %2336 = vst.msk [vmem:[%s123_s3 + $0x8] sm:$0xff] %vm2334_vm4, %v2520_v44 }
 0x22a   : > { %v2524_v27 = vpop.eup %2523  ;;  %2335 = vst.msk [vmem:[%s123_s3] sm:$0xff] %vm2334_vm4, %v2522_v47  ;;  %2533 = vrcp.f32 %v2374_v35 }
 0x22b   : > { %v2373_v16 = vadd.f32 1.0, %v2524_v27 }
 0x22c   : > { %v2526_v21 = vpop.eup %2525 }
 0x22d   : > { %v2528_v36 = vpop.eup %2527  ;;  %2476 = vst.msk [vmem:[%s123_s3 + $0x18] sm:$0xff] %vm2334_vm4, %v2526_v21  ;;  %2535 = vrcp.f32 %v2373_v16 }
 0x22e   : > { %2475 = vst.msk [vmem:[%s123_s3 + $0x10] sm:$0xff] %vm2334_vm4, %v2528_v36 }
 0x230   : > { %v2530_v32 = vpop.eup %2529 }
 0x231   : > { %v2532_v56 = vpop.eup %2531  ;;  %2480 = vst.msk [vmem:[%s123_s3 + $0x28] sm:$0xff] %vm2334_vm4, %v2530_v32 }
 0x232   : > { %2479 = vst.msk [vmem:[%s123_s3 + $0x20] sm:$0xff] %vm2334_vm4, %v2532_v56 }
 0x234   : > { %v2534_v30 = vpop.eup %2533 }
 0x235   : > { %2484 = vst.msk [vmem:[%s123_s3 + $0x38] sm:$0xff] %vm2334_vm4, %v2534_v30 }
 0x237   : > { %v2536_v6 = vpop.eup %2535 }
 0x238   : > { %2483 = vst.msk [vmem:[%s123_s3 + $0x30] sm:$0xff] %vm2334_vm4, %v2536_v6 }
 0x239 PF: > { %s18_s14 = sadd.s32 1, %s2573_s14  }
 0x23a   : > { %p15_p9 = scmp.ge.s32.totalorder %s18_s14, 4  }
 0x23c   :  { %17 = sbr.rel (!%p15_p9) target bundleno = 16 (0x10), region = 60 }

</bundles_post_ra>
